<compile_context>
chip_gen: v7x
topology: tpu7x:2x2x1
jax: 0.10.0
libtpu: 0.0.40
codegen_flags: <defaults>
</compile_context>

<pallas_src>
import math

import jax
import jax.numpy as jnp
from jax.experimental import pallas as pl
from jax.experimental.pallas import tpu as pltpu

# ---------------- configuration (small, forward-consistent shapes) -----------
B = 2                  # batch
L = 8                  # context length
OBS_DIM = 16           # observation_space = (16,)
NUM_ACTIONS = 4
MAX_TIMESTEPS = 32
EMBED_DIM = 32
NUM_BLOCKS = 2
NUM_HEADS = 2
T = 3 * L              # interleaved (rtg, state, action) tokens per sequence
FF = 4 * EMBED_DIM
HEAD_DIM = EMBED_DIM // NUM_HEADS

BT = B * T                               # 48 rows (batch folded)
HBT = NUM_HEADS * BT                     # 96 rows (heads stacked on sublanes)
HEAD_OUT = 1 + OBS_DIM + NUM_ACTIONS     # 21 useful output lanes
HEAD_PAD = 128                           # lane-dense fused head output width

# vec32 slab row layout
_V_ELN_W, _V_ELN_B, _V_OLN_W, _V_OLN_B = 0, 1, 2, 3
_V_BLK_BASE = 4        # per block: ln1_w, ln1_b, ln2_w, ln2_b, bproj, bfc2
_V_PER_BLK = 6


# ---------------------------- Pallas kernel ----------------------------------
def _ln(x, w, b, eps=1e-5):
    mu = jnp.mean(x, axis=-1, keepdims=True)
    var = jnp.mean((x - mu) ** 2, axis=-1, keepdims=True)
    return (x - mu) * jax.lax.rsqrt(var + eps) * w + b


def dt_kernel(x_ref, mask_ref, vec32_ref, vec128_ref,
              wqkv_ref, bqkv_ref, wproj_ref, wfc1_ref, wfc2_ref, whead_ref,
              out_ref):
    f32 = jnp.float32
    bf16 = jnp.bfloat16
    scale = 1.0 / math.sqrt(HEAD_DIM)

    x = x_ref[...]          # (BT, E) f32
    mask = mask_ref[...]    # (HBT, HBT) f32 additive bias (0 / -1e30)

    h = _ln(x, vec32_ref[_V_ELN_W], vec32_ref[_V_ELN_B])       # embed_layer_norm

    for blk in range(NUM_BLOCKS):                              # static unroll
        base = _V_BLK_BASE + _V_PER_BLK * blk

        # ---------------- causal multi-head self-attention ----------------
        a_in = _ln(h, vec32_ref[base + 0], vec32_ref[base + 1])
        a_bf = a_in.astype(bf16)

        def _qkv(j):
            # heads stacked on the sublane axis -> (H*BT, HEAD_DIM)
            parts = [
                jnp.dot(a_bf, wqkv_ref[(blk * 3 + j) * NUM_HEADS + hh],
                        preferred_element_type=f32)
                for hh in range(NUM_HEADS)
            ]
            return jnp.concatenate(parts, axis=0) + bqkv_ref[blk * 3 + j]

        q_s = _qkv(0) * scale                 # (HBT, D) f32
        k_s = _qkv(1)                         # (HBT, D) f32
        v_s = _qkv(2).astype(bf16)            # (HBT, D) bf16 (MXU input)

        # one fused score matmul for all heads & batches: (96, 96)
        s = jax.lax.dot_general(
            q_s.astype(bf16), k_s.astype(bf16),
            dimension_numbers=(((1,), (1,)), ((), ())),
            preferred_element_type=f32)
        s = s + mask                          # block-diag causal mask

        # softmax in f32, division on the EUP slot
        m = jnp.max(s, axis=-1, keepdims=True)
        e = jnp.exp(s - m)
        p = e * pl.reciprocal(jnp.sum(e, axis=-1, keepdims=True), approx=True)

        o_s = jnp.dot(p.astype(bf16), v_s, preferred_element_type=f32)   # (HBT, D)
        o_bf = o_s.astype(bf16)

        # output projection: accumulate per-head sublane halves (no lane concat)
        att = jnp.zeros((BT, EMBED_DIM), f32)
        for hh in range(NUM_HEADS):
            att = att + jnp.dot(o_bf[hh * BT:(hh + 1) * BT],
                                wproj_ref[blk * NUM_HEADS + hh],
                                preferred_element_type=f32)
        att = att + vec32_ref[base + 4]       # bproj
        h = h + att

        # ---------------------------- feed-forward -------------------------
        m_in = _ln(h, vec32_ref[base + 2], vec32_ref[base + 3])
        mm = jnp.dot(m_in.astype(bf16), wfc1_ref[blk],
                     preferred_element_type=f32) + vec128_ref[blk]        # (BT, FF)
        # TODO(synk): PyTorch nn.GELU defaults to exact erf GELU; tanh approx used here.
        mm = jax.nn.gelu(mm, approximate=True)
        mm = jnp.dot(mm.astype(bf16), wfc2_ref[blk],
                     preferred_element_type=f32) + vec32_ref[base + 5]    # (BT, E)
        h = h + mm

    y = _ln(h, vec32_ref[_V_OLN_W], vec32_ref[_V_OLN_B])        # out_layer_norm

    # fused heads: one lane-dense (BT, 128) store; glue splits rtg/state/action
    out_ref[...] = (jnp.dot(y.astype(bf16), whead_ref[...],
                            preferred_element_type=f32)
                    + vec128_ref[NUM_BLOCKS])


# ------------------------------ packing ---------------------------------------
def pack_params(params):
    """Pack raw parameters into the few slabs the kernel consumes."""
    bf16 = jnp.bfloat16
    f32 = jnp.float32

    wq_list, bq_list = [], []
    for blk in range(NUM_BLOCKS):
        wqkv = params["wqkv"][blk]            # (E, 3E)
        bqkv = params["bqkv"][blk]            # (3E,)
        for j in range(3):                    # 0:q 1:k 2:v
            for hh in range(NUM_HEADS):
                c0 = j * EMBED_DIM + hh * HEAD_DIM
                wq_list.append(wqkv[:, c0:c0 + HEAD_DIM])
            bq_list.append(jnp.concatenate(
                [jnp.broadcast_to(
                    bqkv[j * EMBED_DIM + hh * HEAD_DIM:
                         j * EMBED_DIM + (hh + 1) * HEAD_DIM], (BT, HEAD_DIM))
                 for hh in range(NUM_HEADS)], axis=0))
    w_qkv = jnp.stack(wq_list).astype(bf16)                      # (NB*3*H, E, D)
    b_qkv = jnp.stack(bq_list).astype(f32)                       # (NB*3, HBT, D)

    w_proj = jnp.stack(
        [params["wproj"][blk, hh * HEAD_DIM:(hh + 1) * HEAD_DIM, :]
         for blk in range(NUM_BLOCKS) for hh in range(NUM_HEADS)]).astype(bf16)
    w_fc1 = params["wfc1"].astype(bf16)                          # (NB, E, FF)
    w_fc2 = params["wfc2"].astype(bf16)                          # (NB, FF, E)

    w_head = jnp.concatenate([params["w_rtg"], params["w_st"], params["w_ac"]],
                             axis=1)                             # (E, HEAD_OUT)
    w_head = jnp.pad(w_head, ((0, 0), (0, HEAD_PAD - HEAD_OUT))).astype(bf16)

    rows = [params["eln_w"], params["eln_b"], params["oln_w"], params["oln_b"]]
    for blk in range(NUM_BLOCKS):
        rows += [params["ln1_w"][blk], params["ln1_b"][blk],
                 params["ln2_w"][blk], params["ln2_b"][blk],
                 params["bproj"][blk], params["bfc2"][blk]]
    vec32 = jnp.stack(rows).astype(f32)                          # (4+6*NB, E)

    b_head = jnp.pad(jnp.concatenate([params["b_rtg"], params["b_st"],
                                      params["b_ac"]]),
                     (0, HEAD_PAD - HEAD_OUT))
    vec128 = jnp.concatenate([params["bfc1"], b_head[None, :]],
                             axis=0).astype(f32)                 # (NB+1, 128)

    # block-diagonal causal mask over (head, batch) groups, rows = h*BT + b*T + t
    idx = jnp.arange(HBT)
    grp = idx // T
    pos = idx % T
    allowed = (grp[:, None] == grp[None, :]) & (pos[None, :] <= pos[:, None])
    mask = jnp.where(allowed, 0.0, -1e30).astype(f32)            # (HBT, HBT)

    return dict(mask=mask, vec32=vec32, vec128=vec128, w_qkv=w_qkv, b_qkv=b_qkv,
                w_proj=w_proj, w_fc1=w_fc1, w_fc2=w_fc2, w_head=w_head)


# ------------------------------ wrapper ---------------------------------------
def _full_spec(shape):
    nd = len(shape)
    return pl.BlockSpec(shape, lambda i, _nd=nd: (0,) * _nd)


_OPERAND_ORDER = ["mask", "vec32", "vec128", "w_qkv", "b_qkv",
                  "w_proj", "w_fc1", "w_fc2", "w_head"]


def decision_transformer_forward(params, returns_to_go, states, actions, timestep):
    """
    returns_to_go: [B,L,1] f32, states: [B,L,OBS_DIM] f32,
    actions: [B,L,1] i32, timestep: [B,1,1] i32
    """
    packed = pack_params(params)

    # ---- plain-JAX glue: embeddings + token interleave ----
    rtg_emb = jnp.tanh(returns_to_go @ params["w_ret"] + params["b_ret"])         # [B,L,E]
    state_emb = jnp.tanh(states @ params["w_state_emb"] + params["b_state_emb"])  # [B,L,E]
    act_emb = params["action_table"][actions[..., 0]]                             # [B,L,E]
    time_emb = params["time_table"][timestep[:, 0, 0]][:, None, :]                # [B,1,E]

    rtg_emb = rtg_emb + time_emb
    state_emb = state_emb + time_emb
    act_emb = act_emb + time_emb

    seq = jnp.stack([rtg_emb, state_emb, act_emb], axis=1)                        # [B,3,L,E]
    seq = jnp.transpose(seq, (0, 2, 1, 3)).reshape(BT, EMBED_DIM)                 # [B*3L,E]

    operands = [packed[k] for k in _OPERAND_ORDER]
    in_specs = [_full_spec((BT, EMBED_DIM))] + [_full_spec(o.shape) for o in operands]
    out_spec = _full_spec((BT, HEAD_PAD))

    out = pl.pallas_call(
        dt_kernel,
        out_shape=jax.ShapeDtypeStruct((BT, HEAD_PAD), jnp.float32),
        grid_spec=pltpu.PrefetchScalarGridSpec(
            num_scalar_prefetch=0,
            grid=(1,),                       # batch folded into one grid step
            in_specs=in_specs,
            out_specs=out_spec),
        compiler_params=pltpu.CompilerParams(
            dimension_semantics=("arbitrary",)),
    )(seq, *operands)

    out = out.reshape(B, T, HEAD_PAD)
    # fused-head lane split + strided token selection (matches the PyTorch forward)
    rtg_predict = out[:, 0::3, 0:1]                                   # [B,L,1]
    state_predict = out[:, 1::3, 1:1 + OBS_DIM]                       # [B,L,OBS_DIM]
    action_predict = out[:, 2::3, 1 + OBS_DIM:1 + OBS_DIM + NUM_ACTIONS]  # [B,L,A]
    return rtg_predict, state_predict, action_predict


# --------------------------- parameter init -----------------------------------
def init_params(key):
    keys = iter(jax.random.split(key, 16))

    def nrm(shape):
        return jax.random.normal(next(keys), shape, jnp.float32) * 0.02

    p = {}
    # return_embedding: Linear(1, E) + Tanh
    p["w_ret"] = nrm((1, EMBED_DIM))
    p["b_ret"] = jnp.zeros((EMBED_DIM,), jnp.float32)
    # state_embedding (1-D obs): Linear(OBS_DIM, E) + Tanh
    p["w_state_emb"] = nrm((OBS_DIM, EMBED_DIM))
    p["b_state_emb"] = jnp.zeros((EMBED_DIM,), jnp.float32)
    # embedding tables
    p["action_table"] = nrm((NUM_ACTIONS, EMBED_DIM))
    p["time_table"] = nrm((MAX_TIMESTEPS, EMBED_DIM))
    # embed / out layer norms
    p["eln_w"] = jnp.ones((EMBED_DIM,), jnp.float32)
    p["eln_b"] = jnp.zeros((EMBED_DIM,), jnp.float32)
    p["oln_w"] = jnp.ones((EMBED_DIM,), jnp.float32)
    p["oln_b"] = jnp.zeros((EMBED_DIM,), jnp.float32)
    # GPT blocks (stacked along a leading block axis)
    p["ln1_w"] = jnp.ones((NUM_BLOCKS, EMBED_DIM), jnp.float32)
    p["ln1_b"] = jnp.zeros((NUM_BLOCKS, EMBED_DIM), jnp.float32)
    p["wqkv"] = nrm((NUM_BLOCKS, EMBED_DIM, 3 * EMBED_DIM))
    p["bqkv"] = jnp.zeros((NUM_BLOCKS, 3 * EMBED_DIM), jnp.float32)
    p["wproj"] = nrm((NUM_BLOCKS, EMBED_DIM, EMBED_DIM))
    p["bproj"] = jnp.zeros((NUM_BLOCKS, EMBED_DIM), jnp.float32)
    p["ln2_w"] = jnp.ones((NUM_BLOCKS, EMBED_DIM), jnp.float32)
    p["ln2_b"] = jnp.zeros((NUM_BLOCKS, EMBED_DIM), jnp.float32)
    p["wfc1"] = nrm((NUM_BLOCKS, EMBED_DIM, FF))
    p["bfc1"] = jnp.zeros((NUM_BLOCKS, FF), jnp.float32)
    p["wfc2"] = nrm((NUM_BLOCKS, FF, EMBED_DIM))
    p["bfc2"] = jnp.zeros((NUM_BLOCKS, EMBED_DIM), jnp.float32)
    # prediction heads
    p["w_rtg"] = nrm((EMBED_DIM, 1))
    p["b_rtg"] = jnp.zeros((1,), jnp.float32)
    p["w_st"] = nrm((EMBED_DIM, OBS_DIM))
    p["b_st"] = jnp.zeros((OBS_DIM,), jnp.float32)
    p["w_ac"] = nrm((EMBED_DIM, NUM_ACTIONS))
    p["b_ac"] = jnp.zeros((NUM_ACTIONS,), jnp.float32)
    return p


# ------------------------------- main ------------------------------------------
if __name__ == "__main__":
    key = jax.random.PRNGKey(0)
    kp, kr, ks, ka, kt = jax.random.split(key, 5)

    params = init_params(kp)
    returns_to_go = jax.random.normal(kr, (B, L, 1), jnp.float32)
    states = jax.random.normal(ks, (B, L, OBS_DIM), jnp.float32)
    actions = jax.random.randint(ka, (B, L, 1), 0, NUM_ACTIONS)
    timestep = jax.random.randint(kt, (B, 1, 1), 0, MAX_TIMESTEPS)

    fwd = jax.jit(decision_transformer_forward)
    rtg_p, st_p, ac_p = fwd(params, returns_to_go, states, actions, timestep)
    jax.block_until_ready((rtg_p, st_p, ac_p))

    assert rtg_p.shape == (B, L, 1)
    assert st_p.shape == (B, L, OBS_DIM)
    assert ac_p.shape == (B, L, NUM_ACTIONS)
    # TODO(synk): StateEmbedding / GPTBlocks are undefined in the source file;
    # assumed Linear+Tanh state embedding and pre-LN GPT blocks (standard DT).
    print("KERNEL_OK")
</pallas_src>

<mosaic_0001>
module attributes {stable_mosaic.version = 11 : i64} {
  func.func @dt_kernel(%arg0: i32, %arg1: memref<48x32xf32, #tpu.memory_space<vmem>>, %arg2: memref<96x96xf32, #tpu.memory_space<vmem>>, %arg3: memref<16x32xf32, #tpu.memory_space<vmem>>, %arg4: memref<3x128xf32, #tpu.memory_space<vmem>>, %arg5: memref<12x32x16xbf16, #tpu.memory_space<vmem>>, %arg6: memref<6x96x16xf32, #tpu.memory_space<vmem>>, %arg7: memref<4x16x32xbf16, #tpu.memory_space<vmem>>, %arg8: memref<2x32x128xbf16, #tpu.memory_space<vmem>>, %arg9: memref<2x128x32xbf16, #tpu.memory_space<vmem>>, %arg10: memref<32x128xbf16, #tpu.memory_space<vmem>>, %arg11: memref<48x128xf32, #tpu.memory_space<vmem>>) attributes {dimension_semantics = [#tpu.dimension_semantics<arbitrary>], iteration_bounds = array<i64: 1>, scalar_prefetch = 0 : i64, scratch_operands = 0 : i64, tpu.core_type = #tpu.core_type<tc>, window_params = [{pipeline_mode = #tpu.pipeline_mode<synchronous>, transform_indices = @transform_0, window_bounds = array<i64: 48, 32>}, {pipeline_mode = #tpu.pipeline_mode<synchronous>, transform_indices = @transform_1, window_bounds = array<i64: 96, 96>}, {pipeline_mode = #tpu.pipeline_mode<synchronous>, transform_indices = @transform_2, window_bounds = array<i64: 16, 32>}, {pipeline_mode = #tpu.pipeline_mode<synchronous>, transform_indices = @transform_3, window_bounds = array<i64: 3, 128>}, {pipeline_mode = #tpu.pipeline_mode<synchronous>, transform_indices = @transform_4, window_bounds = array<i64: 12, 32, 16>}, {pipeline_mode = #tpu.pipeline_mode<synchronous>, transform_indices = @transform_5, window_bounds = array<i64: 6, 96, 16>}, {pipeline_mode = #tpu.pipeline_mode<synchronous>, transform_indices = @transform_6, window_bounds = array<i64: 4, 16, 32>}, {pipeline_mode = #tpu.pipeline_mode<synchronous>, transform_indices = @transform_7, window_bounds = array<i64: 2, 32, 128>}, {pipeline_mode = #tpu.pipeline_mode<synchronous>, transform_indices = @transform_8, window_bounds = array<i64: 2, 128, 32>}, {pipeline_mode = #tpu.pipeline_mode<synchronous>, transform_indices = @transform_9, window_bounds = array<i64: 32, 128>}, {pipeline_mode = #tpu.pipeline_mode<synchronous>, transform_indices = @transform_10, window_bounds = array<i64: 48, 128>}]} {
    %c0 = arith.constant 0 : index
    %c0_0 = arith.constant 0 : index
    %0 = vector.load %arg1[%c0, %c0_0] : memref<48x32xf32, #tpu.memory_space<vmem>>, vector<48x32xf32>
    %c0_1 = arith.constant 0 : index
    %c0_2 = arith.constant 0 : index
    %1 = vector.load %arg2[%c0_1, %c0_2] : memref<96x96xf32, #tpu.memory_space<vmem>>, vector<96x96xf32>
    %c0_3 = arith.constant 0 : index
    %c0_4 = arith.constant 0 : index
    %2 = vector.load %arg3[%c0_3, %c0_4] : memref<16x32xf32, #tpu.memory_space<vmem>>, vector<1x32xf32>
    %3 = vector.shape_cast %2 : vector<1x32xf32> to vector<32xf32>
    %c1 = arith.constant 1 : index
    %c0_5 = arith.constant 0 : index
    %4 = vector.load %arg3[%c1, %c0_5] : memref<16x32xf32, #tpu.memory_space<vmem>>, vector<1x32xf32>
    %5 = vector.shape_cast %4 : vector<1x32xf32> to vector<32xf32>
    %cst = arith.constant dense<0.000000e+00> : vector<48xf32>
    %6 = vector.multi_reduction <add>, %0, %cst [1] : vector<48x32xf32> to vector<48xf32>
    %7 = vector.shape_cast %6 : vector<48xf32> to vector<48x1xf32>
    %cst_6 = arith.constant 3.200000e+01 : f32
    %8 = vector.broadcast %cst_6 : f32 to vector<48x1xf32>
    %9 = arith.divf %7, %8 : vector<48x1xf32>
    %10 = vector.broadcast %9 : vector<48x1xf32> to vector<48x32xf32>
    %11 = arith.subf %0, %10 : vector<48x32xf32>
    %12 = arith.mulf %11, %11 : vector<48x32xf32>
    %cst_7 = arith.constant dense<0.000000e+00> : vector<48xf32>
    %13 = vector.multi_reduction <add>, %12, %cst_7 [1] : vector<48x32xf32> to vector<48xf32>
    %14 = vector.shape_cast %13 : vector<48xf32> to vector<48x1xf32>
    %cst_8 = arith.constant 3.200000e+01 : f32
    %15 = vector.broadcast %cst_8 : f32 to vector<48x1xf32>
    %16 = arith.divf %14, %15 : vector<48x1xf32>
    %17 = vector.broadcast %9 : vector<48x1xf32> to vector<48x32xf32>
    %18 = arith.subf %0, %17 : vector<48x32xf32>
    %cst_9 = arith.constant 9.99999974E-6 : f32
    %19 = vector.broadcast %cst_9 : f32 to vector<48x1xf32>
    %20 = arith.addf %16, %19 : vector<48x1xf32>
    %21 = math.rsqrt %20 : vector<48x1xf32>
    %22 = vector.broadcast %21 : vector<48x1xf32> to vector<48x32xf32>
    %23 = arith.mulf %18, %22 : vector<48x32xf32>
    %24 = vector.shape_cast %3 : vector<32xf32> to vector<1x32xf32>
    %25 = vector.broadcast %24 : vector<1x32xf32> to vector<48x32xf32>
    %26 = arith.mulf %23, %25 : vector<48x32xf32>
    %27 = vector.shape_cast %5 : vector<32xf32> to vector<1x32xf32>
    %28 = vector.broadcast %27 : vector<1x32xf32> to vector<48x32xf32>
    %29 = arith.addf %26, %28 : vector<48x32xf32>
    %c4 = arith.constant 4 : index
    %c0_10 = arith.constant 0 : index
    %30 = vector.load %arg3[%c4, %c0_10] : memref<16x32xf32, #tpu.memory_space<vmem>>, vector<1x32xf32>
    %31 = vector.shape_cast %30 : vector<1x32xf32> to vector<32xf32>
    %c5 = arith.constant 5 : index
    %c0_11 = arith.constant 0 : index
    %32 = vector.load %arg3[%c5, %c0_11] : memref<16x32xf32, #tpu.memory_space<vmem>>, vector<1x32xf32>
    %33 = vector.shape_cast %32 : vector<1x32xf32> to vector<32xf32>
    %cst_12 = arith.constant dense<0.000000e+00> : vector<48xf32>
    %34 = vector.multi_reduction <add>, %29, %cst_12 [1] : vector<48x32xf32> to vector<48xf32>
    %35 = vector.shape_cast %34 : vector<48xf32> to vector<48x1xf32>
    %cst_13 = arith.constant 3.200000e+01 : f32
    %36 = vector.broadcast %cst_13 : f32 to vector<48x1xf32>
    %37 = arith.divf %35, %36 : vector<48x1xf32>
    %38 = vector.broadcast %37 : vector<48x1xf32> to vector<48x32xf32>
    %39 = arith.subf %29, %38 : vector<48x32xf32>
    %40 = arith.mulf %39, %39 : vector<48x32xf32>
    %cst_14 = arith.constant dense<0.000000e+00> : vector<48xf32>
    %41 = vector.multi_reduction <add>, %40, %cst_14 [1] : vector<48x32xf32> to vector<48xf32>
    %42 = vector.shape_cast %41 : vector<48xf32> to vector<48x1xf32>
    %cst_15 = arith.constant 3.200000e+01 : f32
    %43 = vector.broadcast %cst_15 : f32 to vector<48x1xf32>
    %44 = arith.divf %42, %43 : vector<48x1xf32>
    %45 = vector.broadcast %37 : vector<48x1xf32> to vector<48x32xf32>
    %46 = arith.subf %29, %45 : vector<48x32xf32>
    %cst_16 = arith.constant 9.99999974E-6 : f32
    %47 = vector.broadcast %cst_16 : f32 to vector<48x1xf32>
    %48 = arith.addf %44, %47 : vector<48x1xf32>
    %49 = math.rsqrt %48 : vector<48x1xf32>
    %50 = vector.broadcast %49 : vector<48x1xf32> to vector<48x32xf32>
    %51 = arith.mulf %46, %50 : vector<48x32xf32>
    %52 = vector.shape_cast %31 : vector<32xf32> to vector<1x32xf32>
    %53 = vector.broadcast %52 : vector<1x32xf32> to vector<48x32xf32>
    %54 = arith.mulf %51, %53 : vector<48x32xf32>
    %55 = vector.shape_cast %33 : vector<32xf32> to vector<1x32xf32>
    %56 = vector.broadcast %55 : vector<1x32xf32> to vector<48x32xf32>
    %57 = arith.addf %54, %56 : vector<48x32xf32>
    %58 = arith.truncf %57 : vector<48x32xf32> to vector<48x32xbf16>
    %c0_17 = arith.constant 0 : index
    %c0_18 = arith.constant 0 : index
    %c0_19 = arith.constant 0 : index
    %59 = vector.load %arg5[%c0_17, %c0_18, %c0_19] : memref<12x32x16xbf16, #tpu.memory_space<vmem>>, vector<1x32x16xbf16>
    %60 = vector.shape_cast %59 : vector<1x32x16xbf16> to vector<32x16xbf16>
    %cst_20 = arith.constant dense<0.000000e+00> : vector<48x16xf32>
    %61 = tpu.matmul %58, %60, %cst_20 {dimension_numbers = #tpu.dot_dimension_numbers<[1], [0], [0], [1], [0, 0, 1, 1], [], []>} : vector<48x32xbf16>, vector<32x16xbf16>, vector<48x16xf32> -> vector<48x16xf32>
    %c1_21 = arith.constant 1 : index
    %c0_22 = arith.constant 0 : index
    %c0_23 = arith.constant 0 : index
    %62 = vector.load %arg5[%c1_21, %c0_22, %c0_23] : memref<12x32x16xbf16, #tpu.memory_space<vmem>>, vector<1x32x16xbf16>
    %63 = vector.shape_cast %62 : vector<1x32x16xbf16> to vector<32x16xbf16>
    %cst_24 = arith.constant dense<0.000000e+00> : vector<48x16xf32>
    %64 = tpu.matmul %58, %63, %cst_24 {dimension_numbers = #tpu.dot_dimension_numbers<[1], [0], [0], [1], [0, 0, 1, 1], [], []>} : vector<48x32xbf16>, vector<32x16xbf16>, vector<48x16xf32> -> vector<48x16xf32>
    %65 = tpu.concatenate %61, %64 in 0 : vector<48x16xf32>, vector<48x16xf32> -> vector<96x16xf32>
    %c0_25 = arith.constant 0 : index
    %c0_26 = arith.constant 0 : index
    %c0_27 = arith.constant 0 : index
    %66 = vector.load %arg6[%c0_25, %c0_26, %c0_27] : memref<6x96x16xf32, #tpu.memory_space<vmem>>, vector<1x96x16xf32>
    %67 = vector.shape_cast %66 : vector<1x96x16xf32> to vector<96x16xf32>
    %68 = arith.addf %65, %67 : vector<96x16xf32>
    %cst_28 = arith.constant 2.500000e-01 : f32
    %69 = vector.broadcast %cst_28 : f32 to vector<96x16xf32>
    %70 = arith.mulf %68, %69 : vector<96x16xf32>
    %c2 = arith.constant 2 : index
    %c0_29 = arith.constant 0 : index
    %c0_30 = arith.constant 0 : index
    %71 = vector.load %arg5[%c2, %c0_29, %c0_30] : memref<12x32x16xbf16, #tpu.memory_space<vmem>>, vector<1x32x16xbf16>
    %72 = vector.shape_cast %71 : vector<1x32x16xbf16> to vector<32x16xbf16>
    %cst_31 = arith.constant dense<0.000000e+00> : vector<48x16xf32>
    %73 = tpu.matmul %58, %72, %cst_31 {dimension_numbers = #tpu.dot_dimension_numbers<[1], [0], [0], [1], [0, 0, 1, 1], [], []>} : vector<48x32xbf16>, vector<32x16xbf16>, vector<48x16xf32> -> vector<48x16xf32>
    %c3 = arith.constant 3 : index
    %c0_32 = arith.constant 0 : index
    %c0_33 = arith.constant 0 : index
    %74 = vector.load %arg5[%c3, %c0_32, %c0_33] : memref<12x32x16xbf16, #tpu.memory_space<vmem>>, vector<1x32x16xbf16>
    %75 = vector.shape_cast %74 : vector<1x32x16xbf16> to vector<32x16xbf16>
    %cst_34 = arith.constant dense<0.000000e+00> : vector<48x16xf32>
    %76 = tpu.matmul %58, %75, %cst_34 {dimension_numbers = #tpu.dot_dimension_numbers<[1], [0], [0], [1], [0, 0, 1, 1], [], []>} : vector<48x32xbf16>, vector<32x16xbf16>, vector<48x16xf32> -> vector<48x16xf32>
    %77 = tpu.concatenate %73, %76 in 0 : vector<48x16xf32>, vector<48x16xf32> -> vector<96x16xf32>
    %c1_35 = arith.constant 1 : index
    %c0_36 = arith.constant 0 : index
    %c0_37 = arith.constant 0 : index
    %78 = vector.load %arg6[%c1_35, %c0_36, %c0_37] : memref<6x96x16xf32, #tpu.memory_space<vmem>>, vector<1x96x16xf32>
    %79 = vector.shape_cast %78 : vector<1x96x16xf32> to vector<96x16xf32>
    %80 = arith.addf %77, %79 : vector<96x16xf32>
    %c4_38 = arith.constant 4 : index
    %c0_39 = arith.constant 0 : index
    %c0_40 = arith.constant 0 : index
    %81 = vector.load %arg5[%c4_38, %c0_39, %c0_40] : memref<12x32x16xbf16, #tpu.memory_space<vmem>>, vector<1x32x16xbf16>
    %82 = vector.shape_cast %81 : vector<1x32x16xbf16> to vector<32x16xbf16>
    %cst_41 = arith.constant dense<0.000000e+00> : vector<48x16xf32>
    %83 = tpu.matmul %58, %82, %cst_41 {dimension_numbers = #tpu.dot_dimension_numbers<[1], [0], [0], [1], [0, 0, 1, 1], [], []>} : vector<48x32xbf16>, vector<32x16xbf16>, vector<48x16xf32> -> vector<48x16xf32>
    %c5_42 = arith.constant 5 : index
    %c0_43 = arith.constant 0 : index
    %c0_44 = arith.constant 0 : index
    %84 = vector.load %arg5[%c5_42, %c0_43, %c0_44] : memref<12x32x16xbf16, #tpu.memory_space<vmem>>, vector<1x32x16xbf16>
    %85 = vector.shape_cast %84 : vector<1x32x16xbf16> to vector<32x16xbf16>
    %cst_45 = arith.constant dense<0.000000e+00> : vector<48x16xf32>
    %86 = tpu.matmul %58, %85, %cst_45 {dimension_numbers = #tpu.dot_dimension_numbers<[1], [0], [0], [1], [0, 0, 1, 1], [], []>} : vector<48x32xbf16>, vector<32x16xbf16>, vector<48x16xf32> -> vector<48x16xf32>
    %87 = tpu.concatenate %83, %86 in 0 : vector<48x16xf32>, vector<48x16xf32> -> vector<96x16xf32>
    %c2_46 = arith.constant 2 : index
    %c0_47 = arith.constant 0 : index
    %c0_48 = arith.constant 0 : index
    %88 = vector.load %arg6[%c2_46, %c0_47, %c0_48] : memref<6x96x16xf32, #tpu.memory_space<vmem>>, vector<1x96x16xf32>
    %89 = vector.shape_cast %88 : vector<1x96x16xf32> to vector<96x16xf32>
    %90 = arith.addf %87, %89 : vector<96x16xf32>
    %91 = arith.truncf %90 : vector<96x16xf32> to vector<96x16xbf16>
    %92 = arith.truncf %70 : vector<96x16xf32> to vector<96x16xbf16>
    %93 = arith.truncf %80 : vector<96x16xf32> to vector<96x16xbf16>
    %cst_49 = arith.constant dense<0.000000e+00> : vector<96x96xf32>
    %94 = tpu.matmul %92, %93, %cst_49 {dimension_numbers = #tpu.dot_dimension_numbers<[1], [1], [0], [0], [0, 0, 1, 0], [], []>} : vector<96x16xbf16>, vector<96x16xbf16>, vector<96x96xf32> -> vector<96x96xf32>
    %95 = arith.addf %94, %1 : vector<96x96xf32>
    %cst_50 = arith.constant dense<0xFF800000> : vector<96xf32>
    %96 = vector.multi_reduction <maximumf>, %95, %cst_50 [1] : vector<96x96xf32> to vector<96xf32>
    %97 = vector.shape_cast %96 : vector<96xf32> to vector<96x1xf32>
    %98 = vector.broadcast %97 : vector<96x1xf32> to vector<96x96xf32>
    %99 = arith.subf %95, %98 : vector<96x96xf32>
    %100 = math.exp %99 : vector<96x96xf32>
    %cst_51 = arith.constant dense<0.000000e+00> : vector<96xf32>
    %101 = vector.multi_reduction <add>, %100, %cst_51 [1] : vector<96x96xf32> to vector<96xf32>
    %102 = vector.shape_cast %101 : vector<96xf32> to vector<96x1xf32>
    %103 = tpu.reciprocal %102 {approx = true} : vector<96x1xf32> -> vector<96x1xf32>
    %104 = vector.broadcast %103 : vector<96x1xf32> to vector<96x96xf32>
    %105 = arith.mulf %100, %104 : vector<96x96xf32>
    %106 = arith.truncf %105 : vector<96x96xf32> to vector<96x96xbf16>
    %cst_52 = arith.constant dense<0.000000e+00> : vector<96x16xf32>
    %107 = tpu.matmul %106, %91, %cst_52 {dimension_numbers = #tpu.dot_dimension_numbers<[1], [0], [0], [1], [0, 0, 1, 1], [], []>} : vector<96x96xbf16>, vector<96x16xbf16>, vector<96x16xf32> -> vector<96x16xf32>
    %108 = arith.truncf %107 : vector<96x16xf32> to vector<96x16xbf16>
    %cst_53 = arith.constant 0.000000e+00 : f32
    %109 = vector.broadcast %cst_53 : f32 to vector<48x32xf32>
    %110 = vector.extract_strided_slice %108 {offsets = [0, 0], sizes = [48, 16], strides = [1, 1]} : vector<96x16xbf16> to vector<48x16xbf16>
    %c0_54 = arith.constant 0 : index
    %c0_55 = arith.constant 0 : index
    %c0_56 = arith.constant 0 : index
    %111 = vector.load %arg7[%c0_54, %c0_55, %c0_56] : memref<4x16x32xbf16, #tpu.memory_space<vmem>>, vector<1x16x32xbf16>
    %112 = vector.shape_cast %111 : vector<1x16x32xbf16> to vector<16x32xbf16>
    %cst_57 = arith.constant dense<0.000000e+00> : vector<48x32xf32>
    %113 = tpu.matmul %110, %112, %cst_57 {dimension_numbers = #tpu.dot_dimension_numbers<[1], [0], [0], [1], [0, 0, 1, 1], [], []>} : vector<48x16xbf16>, vector<16x32xbf16>, vector<48x32xf32> -> vector<48x32xf32>
    %114 = arith.addf %109, %113 : vector<48x32xf32>
    %115 = vector.extract_strided_slice %108 {offsets = [48, 0], sizes = [48, 16], strides = [1, 1]} : vector<96x16xbf16> to vector<48x16xbf16>
    %c1_58 = arith.constant 1 : index
    %c0_59 = arith.constant 0 : index
    %c0_60 = arith.constant 0 : index
    %116 = vector.load %arg7[%c1_58, %c0_59, %c0_60] : memref<4x16x32xbf16, #tpu.memory_space<vmem>>, vector<1x16x32xbf16>
    %117 = vector.shape_cast %116 : vector<1x16x32xbf16> to vector<16x32xbf16>
    %cst_61 = arith.constant dense<0.000000e+00> : vector<48x32xf32>
    %118 = tpu.matmul %115, %117, %cst_61 {dimension_numbers = #tpu.dot_dimension_numbers<[1], [0], [0], [1], [0, 0, 1, 1], [], []>} : vector<48x16xbf16>, vector<16x32xbf16>, vector<48x32xf32> -> vector<48x32xf32>
    %119 = arith.addf %114, %118 : vector<48x32xf32>
    %c8 = arith.constant 8 : index
    %c0_62 = arith.constant 0 : index
    %120 = vector.load %arg3[%c8, %c0_62] : memref<16x32xf32, #tpu.memory_space<vmem>>, vector<1x32xf32>
    %121 = vector.shape_cast %120 : vector<1x32xf32> to vector<32xf32>
    %122 = vector.shape_cast %121 : vector<32xf32> to vector<1x32xf32>
    %123 = vector.broadcast %122 : vector<1x32xf32> to vector<48x32xf32>
    %124 = arith.addf %119, %123 : vector<48x32xf32>
    %125 = arith.addf %29, %124 : vector<48x32xf32>
    %c6 = arith.constant 6 : index
    %c0_63 = arith.constant 0 : index
    %126 = vector.load %arg3[%c6, %c0_63] : memref<16x32xf32, #tpu.memory_space<vmem>>, vector<1x32xf32>
    %127 = vector.shape_cast %126 : vector<1x32xf32> to vector<32xf32>
    %c7 = arith.constant 7 : index
    %c0_64 = arith.constant 0 : index
    %128 = vector.load %arg3[%c7, %c0_64] : memref<16x32xf32, #tpu.memory_space<vmem>>, vector<1x32xf32>
    %129 = vector.shape_cast %128 : vector<1x32xf32> to vector<32xf32>
    %cst_65 = arith.constant dense<0.000000e+00> : vector<48xf32>
    %130 = vector.multi_reduction <add>, %125, %cst_65 [1] : vector<48x32xf32> to vector<48xf32>
    %131 = vector.shape_cast %130 : vector<48xf32> to vector<48x1xf32>
    %cst_66 = arith.constant 3.200000e+01 : f32
    %132 = vector.broadcast %cst_66 : f32 to vector<48x1xf32>
    %133 = arith.divf %131, %132 : vector<48x1xf32>
    %134 = vector.broadcast %133 : vector<48x1xf32> to vector<48x32xf32>
    %135 = arith.subf %125, %134 : vector<48x32xf32>
    %136 = arith.mulf %135, %135 : vector<48x32xf32>
    %cst_67 = arith.constant dense<0.000000e+00> : vector<48xf32>
    %137 = vector.multi_reduction <add>, %136, %cst_67 [1] : vector<48x32xf32> to vector<48xf32>
    %138 = vector.shape_cast %137 : vector<48xf32> to vector<48x1xf32>
    %cst_68 = arith.constant 3.200000e+01 : f32
    %139 = vector.broadcast %cst_68 : f32 to vector<48x1xf32>
    %140 = arith.divf %138, %139 : vector<48x1xf32>
    %141 = vector.broadcast %133 : vector<48x1xf32> to vector<48x32xf32>
    %142 = arith.subf %125, %141 : vector<48x32xf32>
    %cst_69 = arith.constant 9.99999974E-6 : f32
    %143 = vector.broadcast %cst_69 : f32 to vector<48x1xf32>
    %144 = arith.addf %140, %143 : vector<48x1xf32>
    %145 = math.rsqrt %144 : vector<48x1xf32>
    %146 = vector.broadcast %145 : vector<48x1xf32> to vector<48x32xf32>
    %147 = arith.mulf %142, %146 : vector<48x32xf32>
    %148 = vector.shape_cast %127 : vector<32xf32> to vector<1x32xf32>
    %149 = vector.broadcast %148 : vector<1x32xf32> to vector<48x32xf32>
    %150 = arith.mulf %147, %149 : vector<48x32xf32>
    %151 = vector.shape_cast %129 : vector<32xf32> to vector<1x32xf32>
    %152 = vector.broadcast %151 : vector<1x32xf32> to vector<48x32xf32>
    %153 = arith.addf %150, %152 : vector<48x32xf32>
    %154 = arith.truncf %153 : vector<48x32xf32> to vector<48x32xbf16>
    %c0_70 = arith.constant 0 : index
    %c0_71 = arith.constant 0 : index
    %c0_72 = arith.constant 0 : index
    %155 = vector.load %arg8[%c0_70, %c0_71, %c0_72] : memref<2x32x128xbf16, #tpu.memory_space<vmem>>, vector<1x32x128xbf16>
    %156 = vector.shape_cast %155 : vector<1x32x128xbf16> to vector<32x128xbf16>
    %cst_73 = arith.constant dense<0.000000e+00> : vector<48x128xf32>
    %157 = tpu.matmul %154, %156, %cst_73 {dimension_numbers = #tpu.dot_dimension_numbers<[1], [0], [0], [1], [0, 0, 1, 1], [], []>} : vector<48x32xbf16>, vector<32x128xbf16>, vector<48x128xf32> -> vector<48x128xf32>
    %c0_74 = arith.constant 0 : index
    %c0_75 = arith.constant 0 : index
    %158 = vector.load %arg4[%c0_74, %c0_75] : memref<3x128xf32, #tpu.memory_space<vmem>>, vector<1x128xf32>
    %159 = vector.shape_cast %158 : vector<1x128xf32> to vector<128xf32>
    %160 = vector.shape_cast %159 : vector<128xf32> to vector<1x128xf32>
    %161 = vector.broadcast %160 : vector<1x128xf32> to vector<48x128xf32>
    %162 = arith.addf %157, %161 : vector<48x128xf32>
    %163 = arith.mulf %162, %162 : vector<48x128xf32>
    %164 = arith.mulf %162, %163 : vector<48x128xf32>
    %cst_76 = arith.constant 4.471500e-02 : f32
    %165 = vector.broadcast %cst_76 : f32 to vector<48x128xf32>
    %166 = arith.mulf %165, %164 : vector<48x128xf32>
    %167 = arith.addf %162, %166 : vector<48x128xf32>
    %cst_77 = arith.constant 0.797884583 : f32
    %168 = vector.broadcast %cst_77 : f32 to vector<48x128xf32>
    %169 = arith.mulf %168, %167 : vector<48x128xf32>
    %170 = math.tanh %169 : vector<48x128xf32>
    %cst_78 = arith.constant 1.000000e+00 : f32
    %171 = vector.broadcast %cst_78 : f32 to vector<48x128xf32>
    %172 = arith.addf %171, %170 : vector<48x128xf32>
    %cst_79 = arith.constant 5.000000e-01 : f32
    %173 = vector.broadcast %cst_79 : f32 to vector<48x128xf32>
    %174 = arith.mulf %173, %172 : vector<48x128xf32>
    %175 = arith.mulf %162, %174 : vector<48x128xf32>
    %176 = arith.truncf %175 : vector<48x128xf32> to vector<48x128xbf16>
    %c0_80 = arith.constant 0 : index
    %c0_81 = arith.constant 0 : index
    %c0_82 = arith.constant 0 : index
    %177 = vector.load %arg9[%c0_80, %c0_81, %c0_82] : memref<2x128x32xbf16, #tpu.memory_space<vmem>>, vector<1x128x32xbf16>
    %178 = vector.shape_cast %177 : vector<1x128x32xbf16> to vector<128x32xbf16>
    %cst_83 = arith.constant dense<0.000000e+00> : vector<48x32xf32>
    %179 = tpu.matmul %176, %178, %cst_83 {dimension_numbers = #tpu.dot_dimension_numbers<[1], [0], [0], [1], [0, 0, 1, 1], [], []>} : vector<48x128xbf16>, vector<128x32xbf16>, vector<48x32xf32> -> vector<48x32xf32>
    %c9 = arith.constant 9 : index
    %c0_84 = arith.constant 0 : index
    %180 = vector.load %arg3[%c9, %c0_84] : memref<16x32xf32, #tpu.memory_space<vmem>>, vector<1x32xf32>
    %181 = vector.shape_cast %180 : vector<1x32xf32> to vector<32xf32>
    %182 = vector.shape_cast %181 : vector<32xf32> to vector<1x32xf32>
    %183 = vector.broadcast %182 : vector<1x32xf32> to vector<48x32xf32>
    %184 = arith.addf %179, %183 : vector<48x32xf32>
    %185 = arith.addf %125, %184 : vector<48x32xf32>
    %c10 = arith.constant 10 : index
    %c0_85 = arith.constant 0 : index
    %186 = vector.load %arg3[%c10, %c0_85] : memref<16x32xf32, #tpu.memory_space<vmem>>, vector<1x32xf32>
    %187 = vector.shape_cast %186 : vector<1x32xf32> to vector<32xf32>
    %c11 = arith.constant 11 : index
    %c0_86 = arith.constant 0 : index
    %188 = vector.load %arg3[%c11, %c0_86] : memref<16x32xf32, #tpu.memory_space<vmem>>, vector<1x32xf32>
    %189 = vector.shape_cast %188 : vector<1x32xf32> to vector<32xf32>
    %cst_87 = arith.constant dense<0.000000e+00> : vector<48xf32>
    %190 = vector.multi_reduction <add>, %185, %cst_87 [1] : vector<48x32xf32> to vector<48xf32>
    %191 = vector.shape_cast %190 : vector<48xf32> to vector<48x1xf32>
    %cst_88 = arith.constant 3.200000e+01 : f32
    %192 = vector.broadcast %cst_88 : f32 to vector<48x1xf32>
    %193 = arith.divf %191, %192 : vector<48x1xf32>
    %194 = vector.broadcast %193 : vector<48x1xf32> to vector<48x32xf32>
    %195 = arith.subf %185, %194 : vector<48x32xf32>
    %196 = arith.mulf %195, %195 : vector<48x32xf32>
    %cst_89 = arith.constant dense<0.000000e+00> : vector<48xf32>
    %197 = vector.multi_reduction <add>, %196, %cst_89 [1] : vector<48x32xf32> to vector<48xf32>
    %198 = vector.shape_cast %197 : vector<48xf32> to vector<48x1xf32>
    %cst_90 = arith.constant 3.200000e+01 : f32
    %199 = vector.broadcast %cst_90 : f32 to vector<48x1xf32>
    %200 = arith.divf %198, %199 : vector<48x1xf32>
    %201 = vector.broadcast %193 : vector<48x1xf32> to vector<48x32xf32>
    %202 = arith.subf %185, %201 : vector<48x32xf32>
    %cst_91 = arith.constant 9.99999974E-6 : f32
    %203 = vector.broadcast %cst_91 : f32 to vector<48x1xf32>
    %204 = arith.addf %200, %203 : vector<48x1xf32>
    %205 = math.rsqrt %204 : vector<48x1xf32>
    %206 = vector.broadcast %205 : vector<48x1xf32> to vector<48x32xf32>
    %207 = arith.mulf %202, %206 : vector<48x32xf32>
    %208 = vector.shape_cast %187 : vector<32xf32> to vector<1x32xf32>
    %209 = vector.broadcast %208 : vector<1x32xf32> to vector<48x32xf32>
    %210 = arith.mulf %207, %209 : vector<48x32xf32>
    %211 = vector.shape_cast %189 : vector<32xf32> to vector<1x32xf32>
    %212 = vector.broadcast %211 : vector<1x32xf32> to vector<48x32xf32>
    %213 = arith.addf %210, %212 : vector<48x32xf32>
    %214 = arith.truncf %213 : vector<48x32xf32> to vector<48x32xbf16>
    %c6_92 = arith.constant 6 : index
    %c0_93 = arith.constant 0 : index
    %c0_94 = arith.constant 0 : index
    %215 = vector.load %arg5[%c6_92, %c0_93, %c0_94] : memref<12x32x16xbf16, #tpu.memory_space<vmem>>, vector<1x32x16xbf16>
    %216 = vector.shape_cast %215 : vector<1x32x16xbf16> to vector<32x16xbf16>
    %cst_95 = arith.constant dense<0.000000e+00> : vector<48x16xf32>
    %217 = tpu.matmul %214, %216, %cst_95 {dimension_numbers = #tpu.dot_dimension_numbers<[1], [0], [0], [1], [0, 0, 1, 1], [], []>} : vector<48x32xbf16>, vector<32x16xbf16>, vector<48x16xf32> -> vector<48x16xf32>
    %c7_96 = arith.constant 7 : index
    %c0_97 = arith.constant 0 : index
    %c0_98 = arith.constant 0 : index
    %218 = vector.load %arg5[%c7_96, %c0_97, %c0_98] : memref<12x32x16xbf16, #tpu.memory_space<vmem>>, vector<1x32x16xbf16>
    %219 = vector.shape_cast %218 : vector<1x32x16xbf16> to vector<32x16xbf16>
    %cst_99 = arith.constant dense<0.000000e+00> : vector<48x16xf32>
    %220 = tpu.matmul %214, %219, %cst_99 {dimension_numbers = #tpu.dot_dimension_numbers<[1], [0], [0], [1], [0, 0, 1, 1], [], []>} : vector<48x32xbf16>, vector<32x16xbf16>, vector<48x16xf32> -> vector<48x16xf32>
    %221 = tpu.concatenate %217, %220 in 0 : vector<48x16xf32>, vector<48x16xf32> -> vector<96x16xf32>
    %c3_100 = arith.constant 3 : index
    %c0_101 = arith.constant 0 : index
    %c0_102 = arith.constant 0 : index
    %222 = vector.load %arg6[%c3_100, %c0_101, %c0_102] : memref<6x96x16xf32, #tpu.memory_space<vmem>>, vector<1x96x16xf32>
    %223 = vector.shape_cast %222 : vector<1x96x16xf32> to vector<96x16xf32>
    %224 = arith.addf %221, %223 : vector<96x16xf32>
    %cst_103 = arith.constant 2.500000e-01 : f32
    %225 = vector.broadcast %cst_103 : f32 to vector<96x16xf32>
    %226 = arith.mulf %224, %225 : vector<96x16xf32>
    %c8_104 = arith.constant 8 : index
    %c0_105 = arith.constant 0 : index
    %c0_106 = arith.constant 0 : index
    %227 = vector.load %arg5[%c8_104, %c0_105, %c0_106] : memref<12x32x16xbf16, #tpu.memory_space<vmem>>, vector<1x32x16xbf16>
    %228 = vector.shape_cast %227 : vector<1x32x16xbf16> to vector<32x16xbf16>
    %cst_107 = arith.constant dense<0.000000e+00> : vector<48x16xf32>
    %229 = tpu.matmul %214, %228, %cst_107 {dimension_numbers = #tpu.dot_dimension_numbers<[1], [0], [0], [1], [0, 0, 1, 1], [], []>} : vector<48x32xbf16>, vector<32x16xbf16>, vector<48x16xf32> -> vector<48x16xf32>
    %c9_108 = arith.constant 9 : index
    %c0_109 = arith.constant 0 : index
    %c0_110 = arith.constant 0 : index
    %230 = vector.load %arg5[%c9_108, %c0_109, %c0_110] : memref<12x32x16xbf16, #tpu.memory_space<vmem>>, vector<1x32x16xbf16>
    %231 = vector.shape_cast %230 : vector<1x32x16xbf16> to vector<32x16xbf16>
    %cst_111 = arith.constant dense<0.000000e+00> : vector<48x16xf32>
    %232 = tpu.matmul %214, %231, %cst_111 {dimension_numbers = #tpu.dot_dimension_numbers<[1], [0], [0], [1], [0, 0, 1, 1], [], []>} : vector<48x32xbf16>, vector<32x16xbf16>, vector<48x16xf32> -> vector<48x16xf32>
    %233 = tpu.concatenate %229, %232 in 0 : vector<48x16xf32>, vector<48x16xf32> -> vector<96x16xf32>
    %c4_112 = arith.constant 4 : index
    %c0_113 = arith.constant 0 : index
    %c0_114 = arith.constant 0 : index
    %234 = vector.load %arg6[%c4_112, %c0_113, %c0_114] : memref<6x96x16xf32, #tpu.memory_space<vmem>>, vector<1x96x16xf32>
    %235 = vector.shape_cast %234 : vector<1x96x16xf32> to vector<96x16xf32>
    %236 = arith.addf %233, %235 : vector<96x16xf32>
    %c10_115 = arith.constant 10 : index
    %c0_116 = arith.constant 0 : index
    %c0_117 = arith.constant 0 : index
    %237 = vector.load %arg5[%c10_115, %c0_116, %c0_117] : memref<12x32x16xbf16, #tpu.memory_space<vmem>>, vector<1x32x16xbf16>
    %238 = vector.shape_cast %237 : vector<1x32x16xbf16> to vector<32x16xbf16>
    %cst_118 = arith.constant dense<0.000000e+00> : vector<48x16xf32>
    %239 = tpu.matmul %214, %238, %cst_118 {dimension_numbers = #tpu.dot_dimension_numbers<[1], [0], [0], [1], [0, 0, 1, 1], [], []>} : vector<48x32xbf16>, vector<32x16xbf16>, vector<48x16xf32> -> vector<48x16xf32>
    %c11_119 = arith.constant 11 : index
    %c0_120 = arith.constant 0 : index
    %c0_121 = arith.constant 0 : index
    %240 = vector.load %arg5[%c11_119, %c0_120, %c0_121] : memref<12x32x16xbf16, #tpu.memory_space<vmem>>, vector<1x32x16xbf16>
    %241 = vector.shape_cast %240 : vector<1x32x16xbf16> to vector<32x16xbf16>
    %cst_122 = arith.constant dense<0.000000e+00> : vector<48x16xf32>
    %242 = tpu.matmul %214, %241, %cst_122 {dimension_numbers = #tpu.dot_dimension_numbers<[1], [0], [0], [1], [0, 0, 1, 1], [], []>} : vector<48x32xbf16>, vector<32x16xbf16>, vector<48x16xf32> -> vector<48x16xf32>
    %243 = tpu.concatenate %239, %242 in 0 : vector<48x16xf32>, vector<48x16xf32> -> vector<96x16xf32>
    %c5_123 = arith.constant 5 : index
    %c0_124 = arith.constant 0 : index
    %c0_125 = arith.constant 0 : index
    %244 = vector.load %arg6[%c5_123, %c0_124, %c0_125] : memref<6x96x16xf32, #tpu.memory_space<vmem>>, vector<1x96x16xf32>
    %245 = vector.shape_cast %244 : vector<1x96x16xf32> to vector<96x16xf32>
    %246 = arith.addf %243, %245 : vector<96x16xf32>
    %247 = arith.truncf %246 : vector<96x16xf32> to vector<96x16xbf16>
    %248 = arith.truncf %226 : vector<96x16xf32> to vector<96x16xbf16>
    %249 = arith.truncf %236 : vector<96x16xf32> to vector<96x16xbf16>
    %cst_126 = arith.constant dense<0.000000e+00> : vector<96x96xf32>
    %250 = tpu.matmul %248, %249, %cst_126 {dimension_numbers = #tpu.dot_dimension_numbers<[1], [1], [0], [0], [0, 0, 1, 0], [], []>} : vector<96x16xbf16>, vector<96x16xbf16>, vector<96x96xf32> -> vector<96x96xf32>
    %251 = arith.addf %250, %1 : vector<96x96xf32>
    %cst_127 = arith.constant dense<0xFF800000> : vector<96xf32>
    %252 = vector.multi_reduction <maximumf>, %251, %cst_127 [1] : vector<96x96xf32> to vector<96xf32>
    %253 = vector.shape_cast %252 : vector<96xf32> to vector<96x1xf32>
    %254 = vector.broadcast %253 : vector<96x1xf32> to vector<96x96xf32>
    %255 = arith.subf %251, %254 : vector<96x96xf32>
    %256 = math.exp %255 : vector<96x96xf32>
    %cst_128 = arith.constant dense<0.000000e+00> : vector<96xf32>
    %257 = vector.multi_reduction <add>, %256, %cst_128 [1] : vector<96x96xf32> to vector<96xf32>
    %258 = vector.shape_cast %257 : vector<96xf32> to vector<96x1xf32>
    %259 = tpu.reciprocal %258 {approx = true} : vector<96x1xf32> -> vector<96x1xf32>
    %260 = vector.broadcast %259 : vector<96x1xf32> to vector<96x96xf32>
    %261 = arith.mulf %256, %260 : vector<96x96xf32>
    %262 = arith.truncf %261 : vector<96x96xf32> to vector<96x96xbf16>
    %cst_129 = arith.constant dense<0.000000e+00> : vector<96x16xf32>
    %263 = tpu.matmul %262, %247, %cst_129 {dimension_numbers = #tpu.dot_dimension_numbers<[1], [0], [0], [1], [0, 0, 1, 1], [], []>} : vector<96x96xbf16>, vector<96x16xbf16>, vector<96x16xf32> -> vector<96x16xf32>
    %264 = arith.truncf %263 : vector<96x16xf32> to vector<96x16xbf16>
    %cst_130 = arith.constant 0.000000e+00 : f32
    %265 = vector.broadcast %cst_130 : f32 to vector<48x32xf32>
    %266 = vector.extract_strided_slice %264 {offsets = [0, 0], sizes = [48, 16], strides = [1, 1]} : vector<96x16xbf16> to vector<48x16xbf16>
    %c2_131 = arith.constant 2 : index
    %c0_132 = arith.constant 0 : index
    %c0_133 = arith.constant 0 : index
    %267 = vector.load %arg7[%c2_131, %c0_132, %c0_133] : memref<4x16x32xbf16, #tpu.memory_space<vmem>>, vector<1x16x32xbf16>
    %268 = vector.shape_cast %267 : vector<1x16x32xbf16> to vector<16x32xbf16>
    %cst_134 = arith.constant dense<0.000000e+00> : vector<48x32xf32>
    %269 = tpu.matmul %266, %268, %cst_134 {dimension_numbers = #tpu.dot_dimension_numbers<[1], [0], [0], [1], [0, 0, 1, 1], [], []>} : vector<48x16xbf16>, vector<16x32xbf16>, vector<48x32xf32> -> vector<48x32xf32>
    %270 = arith.addf %265, %269 : vector<48x32xf32>
    %271 = vector.extract_strided_slice %264 {offsets = [48, 0], sizes = [48, 16], strides = [1, 1]} : vector<96x16xbf16> to vector<48x16xbf16>
    %c3_135 = arith.constant 3 : index
    %c0_136 = arith.constant 0 : index
    %c0_137 = arith.constant 0 : index
    %272 = vector.load %arg7[%c3_135, %c0_136, %c0_137] : memref<4x16x32xbf16, #tpu.memory_space<vmem>>, vector<1x16x32xbf16>
    %273 = vector.shape_cast %272 : vector<1x16x32xbf16> to vector<16x32xbf16>
    %cst_138 = arith.constant dense<0.000000e+00> : vector<48x32xf32>
    %274 = tpu.matmul %271, %273, %cst_138 {dimension_numbers = #tpu.dot_dimension_numbers<[1], [0], [0], [1], [0, 0, 1, 1], [], []>} : vector<48x16xbf16>, vector<16x32xbf16>, vector<48x32xf32> -> vector<48x32xf32>
    %275 = arith.addf %270, %274 : vector<48x32xf32>
    %c14 = arith.constant 14 : index
    %c0_139 = arith.constant 0 : index
    %276 = vector.load %arg3[%c14, %c0_139] : memref<16x32xf32, #tpu.memory_space<vmem>>, vector<1x32xf32>
    %277 = vector.shape_cast %276 : vector<1x32xf32> to vector<32xf32>
    %278 = vector.shape_cast %277 : vector<32xf32> to vector<1x32xf32>
    %279 = vector.broadcast %278 : vector<1x32xf32> to vector<48x32xf32>
    %280 = arith.addf %275, %279 : vector<48x32xf32>
    %281 = arith.addf %185, %280 : vector<48x32xf32>
    %c12 = arith.constant 12 : index
    %c0_140 = arith.constant 0 : index
    %282 = vector.load %arg3[%c12, %c0_140] : memref<16x32xf32, #tpu.memory_space<vmem>>, vector<1x32xf32>
    %283 = vector.shape_cast %282 : vector<1x32xf32> to vector<32xf32>
    %c13 = arith.constant 13 : index
    %c0_141 = arith.constant 0 : index
    %284 = vector.load %arg3[%c13, %c0_141] : memref<16x32xf32, #tpu.memory_space<vmem>>, vector<1x32xf32>
    %285 = vector.shape_cast %284 : vector<1x32xf32> to vector<32xf32>
    %cst_142 = arith.constant dense<0.000000e+00> : vector<48xf32>
    %286 = vector.multi_reduction <add>, %281, %cst_142 [1] : vector<48x32xf32> to vector<48xf32>
    %287 = vector.shape_cast %286 : vector<48xf32> to vector<48x1xf32>
    %cst_143 = arith.constant 3.200000e+01 : f32
    %288 = vector.broadcast %cst_143 : f32 to vector<48x1xf32>
    %289 = arith.divf %287, %288 : vector<48x1xf32>
    %290 = vector.broadcast %289 : vector<48x1xf32> to vector<48x32xf32>
    %291 = arith.subf %281, %290 : vector<48x32xf32>
    %292 = arith.mulf %291, %291 : vector<48x32xf32>
    %cst_144 = arith.constant dense<0.000000e+00> : vector<48xf32>
    %293 = vector.multi_reduction <add>, %292, %cst_144 [1] : vector<48x32xf32> to vector<48xf32>
    %294 = vector.shape_cast %293 : vector<48xf32> to vector<48x1xf32>
    %cst_145 = arith.constant 3.200000e+01 : f32
    %295 = vector.broadcast %cst_145 : f32 to vector<48x1xf32>
    %296 = arith.divf %294, %295 : vector<48x1xf32>
    %297 = vector.broadcast %289 : vector<48x1xf32> to vector<48x32xf32>
    %298 = arith.subf %281, %297 : vector<48x32xf32>
    %cst_146 = arith.constant 9.99999974E-6 : f32
    %299 = vector.broadcast %cst_146 : f32 to vector<48x1xf32>
    %300 = arith.addf %296, %299 : vector<48x1xf32>
    %301 = math.rsqrt %300 : vector<48x1xf32>
    %302 = vector.broadcast %301 : vector<48x1xf32> to vector<48x32xf32>
    %303 = arith.mulf %298, %302 : vector<48x32xf32>
    %304 = vector.shape_cast %283 : vector<32xf32> to vector<1x32xf32>
    %305 = vector.broadcast %304 : vector<1x32xf32> to vector<48x32xf32>
    %306 = arith.mulf %303, %305 : vector<48x32xf32>
    %307 = vector.shape_cast %285 : vector<32xf32> to vector<1x32xf32>
    %308 = vector.broadcast %307 : vector<1x32xf32> to vector<48x32xf32>
    %309 = arith.addf %306, %308 : vector<48x32xf32>
    %310 = arith.truncf %309 : vector<48x32xf32> to vector<48x32xbf16>
    %c1_147 = arith.constant 1 : index
    %c0_148 = arith.constant 0 : index
    %c0_149 = arith.constant 0 : index
    %311 = vector.load %arg8[%c1_147, %c0_148, %c0_149] : memref<2x32x128xbf16, #tpu.memory_space<vmem>>, vector<1x32x128xbf16>
    %312 = vector.shape_cast %311 : vector<1x32x128xbf16> to vector<32x128xbf16>
    %cst_150 = arith.constant dense<0.000000e+00> : vector<48x128xf32>
    %313 = tpu.matmul %310, %312, %cst_150 {dimension_numbers = #tpu.dot_dimension_numbers<[1], [0], [0], [1], [0, 0, 1, 1], [], []>} : vector<48x32xbf16>, vector<32x128xbf16>, vector<48x128xf32> -> vector<48x128xf32>
    %c1_151 = arith.constant 1 : index
    %c0_152 = arith.constant 0 : index
    %314 = vector.load %arg4[%c1_151, %c0_152] : memref<3x128xf32, #tpu.memory_space<vmem>>, vector<1x128xf32>
    %315 = vector.shape_cast %314 : vector<1x128xf32> to vector<128xf32>
    %316 = vector.shape_cast %315 : vector<128xf32> to vector<1x128xf32>
    %317 = vector.broadcast %316 : vector<1x128xf32> to vector<48x128xf32>
    %318 = arith.addf %313, %317 : vector<48x128xf32>
    %319 = arith.mulf %318, %318 : vector<48x128xf32>
    %320 = arith.mulf %318, %319 : vector<48x128xf32>
    %cst_153 = arith.constant 4.471500e-02 : f32
    %321 = vector.broadcast %cst_153 : f32 to vector<48x128xf32>
    %322 = arith.mulf %321, %320 : vector<48x128xf32>
    %323 = arith.addf %318, %322 : vector<48x128xf32>
    %cst_154 = arith.constant 0.797884583 : f32
    %324 = vector.broadcast %cst_154 : f32 to vector<48x128xf32>
    %325 = arith.mulf %324, %323 : vector<48x128xf32>
    %326 = math.tanh %325 : vector<48x128xf32>
    %cst_155 = arith.constant 1.000000e+00 : f32
    %327 = vector.broadcast %cst_155 : f32 to vector<48x128xf32>
    %328 = arith.addf %327, %326 : vector<48x128xf32>
    %cst_156 = arith.constant 5.000000e-01 : f32
    %329 = vector.broadcast %cst_156 : f32 to vector<48x128xf32>
    %330 = arith.mulf %329, %328 : vector<48x128xf32>
    %331 = arith.mulf %318, %330 : vector<48x128xf32>
    %332 = arith.truncf %331 : vector<48x128xf32> to vector<48x128xbf16>
    %c1_157 = arith.constant 1 : index
    %c0_158 = arith.constant 0 : index
    %c0_159 = arith.constant 0 : index
    %333 = vector.load %arg9[%c1_157, %c0_158, %c0_159] : memref<2x128x32xbf16, #tpu.memory_space<vmem>>, vector<1x128x32xbf16>
    %334 = vector.shape_cast %333 : vector<1x128x32xbf16> to vector<128x32xbf16>
    %cst_160 = arith.constant dense<0.000000e+00> : vector<48x32xf32>
    %335 = tpu.matmul %332, %334, %cst_160 {dimension_numbers = #tpu.dot_dimension_numbers<[1], [0], [0], [1], [0, 0, 1, 1], [], []>} : vector<48x128xbf16>, vector<128x32xbf16>, vector<48x32xf32> -> vector<48x32xf32>
    %c15 = arith.constant 15 : index
    %c0_161 = arith.constant 0 : index
    %336 = vector.load %arg3[%c15, %c0_161] : memref<16x32xf32, #tpu.memory_space<vmem>>, vector<1x32xf32>
    %337 = vector.shape_cast %336 : vector<1x32xf32> to vector<32xf32>
    %338 = vector.shape_cast %337 : vector<32xf32> to vector<1x32xf32>
    %339 = vector.broadcast %338 : vector<1x32xf32> to vector<48x32xf32>
    %340 = arith.addf %335, %339 : vector<48x32xf32>
    %341 = arith.addf %281, %340 : vector<48x32xf32>
    %c2_162 = arith.constant 2 : index
    %c0_163 = arith.constant 0 : index
    %342 = vector.load %arg3[%c2_162, %c0_163] : memref<16x32xf32, #tpu.memory_space<vmem>>, vector<1x32xf32>
    %343 = vector.shape_cast %342 : vector<1x32xf32> to vector<32xf32>
    %c3_164 = arith.constant 3 : index
    %c0_165 = arith.constant 0 : index
    %344 = vector.load %arg3[%c3_164, %c0_165] : memref<16x32xf32, #tpu.memory_space<vmem>>, vector<1x32xf32>
    %345 = vector.shape_cast %344 : vector<1x32xf32> to vector<32xf32>
    %cst_166 = arith.constant dense<0.000000e+00> : vector<48xf32>
    %346 = vector.multi_reduction <add>, %341, %cst_166 [1] : vector<48x32xf32> to vector<48xf32>
    %347 = vector.shape_cast %346 : vector<48xf32> to vector<48x1xf32>
    %cst_167 = arith.constant 3.200000e+01 : f32
    %348 = vector.broadcast %cst_167 : f32 to vector<48x1xf32>
    %349 = arith.divf %347, %348 : vector<48x1xf32>
    %350 = vector.broadcast %349 : vector<48x1xf32> to vector<48x32xf32>
    %351 = arith.subf %341, %350 : vector<48x32xf32>
    %352 = arith.mulf %351, %351 : vector<48x32xf32>
    %cst_168 = arith.constant dense<0.000000e+00> : vector<48xf32>
    %353 = vector.multi_reduction <add>, %352, %cst_168 [1] : vector<48x32xf32> to vector<48xf32>
    %354 = vector.shape_cast %353 : vector<48xf32> to vector<48x1xf32>
    %cst_169 = arith.constant 3.200000e+01 : f32
    %355 = vector.broadcast %cst_169 : f32 to vector<48x1xf32>
    %356 = arith.divf %354, %355 : vector<48x1xf32>
    %357 = vector.broadcast %349 : vector<48x1xf32> to vector<48x32xf32>
    %358 = arith.subf %341, %357 : vector<48x32xf32>
    %cst_170 = arith.constant 9.99999974E-6 : f32
    %359 = vector.broadcast %cst_170 : f32 to vector<48x1xf32>
    %360 = arith.addf %356, %359 : vector<48x1xf32>
    %361 = math.rsqrt %360 : vector<48x1xf32>
    %362 = vector.broadcast %361 : vector<48x1xf32> to vector<48x32xf32>
    %363 = arith.mulf %358, %362 : vector<48x32xf32>
    %364 = vector.shape_cast %343 : vector<32xf32> to vector<1x32xf32>
    %365 = vector.broadcast %364 : vector<1x32xf32> to vector<48x32xf32>
    %366 = arith.mulf %363, %365 : vector<48x32xf32>
    %367 = vector.shape_cast %345 : vector<32xf32> to vector<1x32xf32>
    %368 = vector.broadcast %367 : vector<1x32xf32> to vector<48x32xf32>
    %369 = arith.addf %366, %368 : vector<48x32xf32>
    %370 = arith.truncf %369 : vector<48x32xf32> to vector<48x32xbf16>
    %c0_171 = arith.constant 0 : index
    %c0_172 = arith.constant 0 : index
    %371 = vector.load %arg10[%c0_171, %c0_172] : memref<32x128xbf16, #tpu.memory_space<vmem>>, vector<32x128xbf16>
    %cst_173 = arith.constant dense<0.000000e+00> : vector<48x128xf32>
    %372 = tpu.matmul %370, %371, %cst_173 {dimension_numbers = #tpu.dot_dimension_numbers<[1], [0], [0], [1], [0, 0, 1, 1], [], []>} : vector<48x32xbf16>, vector<32x128xbf16>, vector<48x128xf32> -> vector<48x128xf32>
    %c2_174 = arith.constant 2 : index
    %c0_175 = arith.constant 0 : index
    %373 = vector.load %arg4[%c2_174, %c0_175] : memref<3x128xf32, #tpu.memory_space<vmem>>, vector<1x128xf32>
    %374 = vector.shape_cast %373 : vector<1x128xf32> to vector<128xf32>
    %375 = vector.shape_cast %374 : vector<128xf32> to vector<1x128xf32>
    %376 = vector.broadcast %375 : vector<1x128xf32> to vector<48x128xf32>
    %377 = arith.addf %372, %376 : vector<48x128xf32>
    %c0_176 = arith.constant 0 : index
    %c0_177 = arith.constant 0 : index
    %378 = vector.load %arg11[%c0_176, %c0_177] : memref<48x128xf32, #tpu.memory_space<vmem>>, vector<48x128xf32>
    tpu.vector_store %arg11[%c0_176, %c0_177], %377 {strides = array<i32>} : memref<48x128xf32, #tpu.memory_space<vmem>>, vector<48x128xf32>,
    return
  }
  func.func @transform_0(%arg0: i32) -> (i32, i32) {
    %c0_i32 = arith.constant 0 : i32
    %c0_i32_0 = arith.constant 0 : i32
    %c0_i32_1 = arith.constant 0 : i32
    return %c0_i32, %c0_i32_0 : i32, i32
  }
  func.func @transform_1(%arg0: i32) -> (i32, i32) {
    %c0_i32 = arith.constant 0 : i32
    %c0_i32_0 = arith.constant 0 : i32
    %c0_i32_1 = arith.constant 0 : i32
    return %c0_i32, %c0_i32_0 : i32, i32
  }
  func.func @transform_2(%arg0: i32) -> (i32, i32) {
    %c0_i32 = arith.constant 0 : i32
    %c0_i32_0 = arith.constant 0 : i32
    %c0_i32_1 = arith.constant 0 : i32
    return %c0_i32, %c0_i32_0 : i32, i32
  }
  func.func @transform_3(%arg0: i32) -> (i32, i32) {
    %c0_i32 = arith.constant 0 : i32
    %c0_i32_0 = arith.constant 0 : i32
    %c0_i32_1 = arith.constant 0 : i32
    return %c0_i32, %c0_i32_0 : i32, i32
  }
  func.func @transform_4(%arg0: i32) -> (i32, i32, i32) {
    %c0_i32 = arith.constant 0 : i32
    %c0_i32_0 = arith.constant 0 : i32
    %c0_i32_1 = arith.constant 0 : i32
    %c0_i32_2 = arith.constant 0 : i32
    return %c0_i32, %c0_i32_0, %c0_i32_1 : i32, i32, i32
  }
  func.func @transform_5(%arg0: i32) -> (i32, i32, i32) {
    %c0_i32 = arith.constant 0 : i32
    %c0_i32_0 = arith.constant 0 : i32
    %c0_i32_1 = arith.constant 0 : i32
    %c0_i32_2 = arith.constant 0 : i32
    return %c0_i32, %c0_i32_0, %c0_i32_1 : i32, i32, i32
  }
  func.func @transform_6(%arg0: i32) -> (i32, i32, i32) {
    %c0_i32 = arith.constant 0 : i32
    %c0_i32_0 = arith.constant 0 : i32
    %c0_i32_1 = arith.constant 0 : i32
    %c0_i32_2 = arith.constant 0 : i32
    return %c0_i32, %c0_i32_0, %c0_i32_1 : i32, i32, i32
  }
  func.func @transform_7(%arg0: i32) -> (i32, i32, i32) {
    %c0_i32 = arith.constant 0 : i32
    %c0_i32_0 = arith.constant 0 : i32
    %c0_i32_1 = arith.constant 0 : i32
    %c0_i32_2 = arith.constant 0 : i32
    return %c0_i32, %c0_i32_0, %c0_i32_1 : i32, i32, i32
  }
  func.func @transform_8(%arg0: i32) -> (i32, i32, i32) {
    %c0_i32 = arith.constant 0 : i32
    %c0_i32_0 = arith.constant 0 : i32
    %c0_i32_1 = arith.constant 0 : i32
    %c0_i32_2 = arith.constant 0 : i32
    return %c0_i32, %c0_i32_0, %c0_i32_1 : i32, i32, i32
  }
  func.func @transform_9(%arg0: i32) -> (i32, i32) {
    %c0_i32 = arith.constant 0 : i32
    %c0_i32_0 = arith.constant 0 : i32
    %c0_i32_1 = arith.constant 0 : i32
    return %c0_i32, %c0_i32_0 : i32, i32
  }
  func.func @transform_10(%arg0: i32) -> (i32, i32) {
    %c0_i32 = arith.constant 0 : i32
    %c0_i32_0 = arith.constant 0 : i32
    %c0_i32_1 = arith.constant 0 : i32
    return %c0_i32, %c0_i32_0 : i32, i32
  }
}

</mosaic_0001>

<bundles_post_ra>
// kernel: decision_transformer_forward.1
= control target key start
LH: loop header
LB: loop body
LE: loop exit
PB: predicated region body
PF: predicated region fallthrough
CT: control target
= control target key end

     0   :  { %vm56_vm0 = vcmask 261120   ;;  %vm4649_vm1 = vmmov 0   ;;  %vm815_vm2 = vcmask 130048   ;;  %vm933_vm3 = vcmask 785408   ;;  %s6088_s0 = inlined_call_operand.vmem [shape: f32[48,32], index: 0, kind: input, shape index: {}]   ;;  %s6089_s2 = inlined_call_operand.vmem [shape: f32[16,32], index: 2, kind: input, shape index: {}]   ;;  %s6090_s4 = inlined_call_operand.vmem [shape: bf16[12,32,16], index: 4, kind: input, shape index: {}]   ;;  %s6091_s5 = inlined_call_operand.vmem [shape: f32[6,96,16], index: 5, kind: input, shape index: {}]   ;;  %s6092_s1 = inlined_call_operand.vmem [shape: f32[96,96], index: 1, kind: input, shape index: {}]   ;;  %s6093_s6 = inlined_call_operand.vmem [shape: bf16[4,16,32], index: 6, kind: input, shape index: {}]   ;;  %s6094_s7 = inlined_call_operand.vmem [shape: bf16[2,32,128], index: 7, kind: input, shape index: {}]   ;;  %s6095_s8 = inlined_call_operand.vmem [shape: bf16[2,128,32], index: 8, kind: input, shape index: {}]   ;;  %s6096_s3 = inlined_call_operand.vmem [shape: f32[3,128], index: 3, kind: input, shape index: {}]   ;;  %s6097_s9 = inlined_call_operand.vmem [shape: bf16[32,128], index: 9, kind: input, shape index: {}]   ;;  %s6098_s10 = inlined_call_operand.vmem [shape: f32[48,128], index: 10, kind: output, shape index: {}]  }
   0x1   :  { %v36_v0 = vld [vmem:[%s6088_s0] sm:$0xff]  ;;  %v38_v1 = vld [vmem:[%s6088_s0 + $0x10] sm:$0xff]  ;;  %v37_v2 = vld [vmem:[%s6088_s0 + $0x8] sm:$0xff] }
   0x2   :  { %v57_v3 = vsel %vm56_vm0, %v36_v0, 0.0  ;;  %v63_v4 = vsel %vm56_vm0, %v38_v1, 0.0  ;;  %v39_v5 = vld [vmem:[%s6088_s0 + $0x18] sm:$0xff]  ;;  %v60_v6 = vsel %vm56_vm0, %v37_v2, 0.0  ;;  %v40_v8 = vld [vmem:[%s6088_s0 + $0x20] sm:$0xff]  ;;  %v41_v9 = vld [vmem:[%s6088_s0 + $0x28] sm:$0xff] }
   0x3   :  { %58 = vadd.xlane.f32.xlu0 %v57_v3  ;;  %64 = vadd.xlane.f32.xlu1 %v63_v4  ;;  %v66_v7 = vsel %vm56_vm0, %v39_v5, 0.0  ;;  %v69_v10 = vsel %vm56_vm0, %v40_v8, 0.0  ;;  %v72_v11 = vsel %vm56_vm0, %v41_v9, 0.0  ;;  %v3491_v61 = vld [vmem:[%s6089_s2] ss:$0 sm:$0xff] }
   0x4   :  { %v3492_v63 = vld [vmem:[%s6089_s2 + $0x1] ss:$0 sm:$0xff] }
   0x7   :  { %61 = vadd.xlane.f32.xlu0 %v60_v6  ;;  %67 = vadd.xlane.f32.xlu1 %v66_v7 }
   0xb   :  { %70 = vadd.xlane.f32.xlu0 %v69_v10  ;;  %73 = vadd.xlane.f32.xlu1 %v72_v11 }
  0x90   :  { %v59_v12 = vpop.xlane.xlu0 %58  ;;  %v65_v13 = vpop.xlane.xlu1 %64 }
  0x91   :  { %v76_v14 = vmul.f32 0.03125, %v59_v12  ;;  %v78_v15 = vmul.f32 0.03125, %v65_v13 }
  0x93   :  { %v82_v16 = vsub.f32 %v36_v0, %v76_v14  ;;  %v4729_v17 = vsub.f32 %v38_v1, %v78_v15 }
  0x94   :  { %v62_v18 = vpop.xlane.xlu0 %61  ;;  %v68_v19 = vpop.xlane.xlu1 %67 }
  0x95   :  { %v77_v20 = vmul.f32 0.03125, %v62_v18  ;;  %v79_v21 = vmul.f32 0.03125, %v68_v19  ;;  %v88_v22 = vmul.f32 %v82_v16, %v82_v16  ;;  %v90_v23 = vmul.f32 %v4729_v17, %v4729_v17 }
  0x97   :  { %v83_v24 = vsub.f32 %v37_v2, %v77_v20  ;;  %v4733_v25 = vsub.f32 %v39_v5, %v79_v21  ;;  %v94_v26 = vsel %vm56_vm0, %v88_v22, 0.0  ;;  %v100_v29 = vsel %vm56_vm0, %v90_v23, 0.0 }
  0x98   :  { %95 = vadd.xlane.f32.xlu0 %v94_v26  ;;  %v71_v27 = vpop.xlane.xlu0 %70  ;;  %v74_v28 = vpop.xlane.xlu1 %73 }
  0x99   :  { %v80_v30 = vmul.f32 0.03125, %v71_v27  ;;  %v81_v31 = vmul.f32 0.03125, %v74_v28  ;;  %v89_v32 = vmul.f32 %v83_v24, %v83_v24  ;;  %v91_v33 = vmul.f32 %v4733_v25, %v4733_v25 }
  0x9b   :  { %v86_v34 = vsub.f32 %v40_v8, %v80_v30  ;;  %v4739_v35 = vsub.f32 %v41_v9, %v81_v31  ;;  %v97_v36 = vsel %vm56_vm0, %v89_v32, 0.0  ;;  %v103_v37 = vsel %vm56_vm0, %v91_v33, 0.0 }
  0x9c   :  { %101 = vadd.xlane.f32.xlu0 %v100_v29  ;;  %98 = vadd.xlane.f32.xlu1 %v97_v36 }
  0x9d   :  { %v92_v38 = vmul.f32 %v86_v34, %v86_v34  ;;  %v93_v39 = vmul.f32 %v4739_v35, %v4739_v35 }
  0x9f   :  { %v106_v40 = vsel %vm56_vm0, %v92_v38, 0.0  ;;  %v109_v41 = vsel %vm56_vm0, %v93_v39, 0.0 }
  0xa0   :  { %104 = vadd.xlane.f32.xlu1 %v103_v37  ;;  %107 = vadd.xlane.f32.xlu0 %v106_v40 }
  0xa4   :  { %110 = vadd.xlane.f32.xlu1 %v109_v41 }
 0x125   :  { %v96_v42 = vpop.xlane.xlu0 %95 }
 0x126   :  { %v112_v43 = vmul.f32 0.03125, %v96_v42 }
 0x128   :  { %v118_v44 = vadd.f32 1e-05, %v112_v43 }
 0x129   :  { %v99_v45 = vpop.xlane.xlu1 %98  ;;  %v102_v46 = vpop.xlane.xlu0 %101 }
 0x12a   :  { %4444 = vrsqrt.f32 %v118_v44  ;;  %v113_v47 = vmul.f32 0.03125, %v99_v45  ;;  %v114_v48 = vmul.f32 0.03125, %v102_v46 }
 0x12c   :  { %v119_v49 = vadd.f32 1e-05, %v113_v47  ;;  %v120_v50 = vadd.f32 1e-05, %v114_v48 }
 0x12d   :  { %v105_v51 = vpop.xlane.xlu1 %104  ;;  %v108_v52 = vpop.xlane.xlu0 %107 }
 0x12e   :  { %4446 = vrsqrt.f32 %v119_v49  ;;  %v115_v53 = vmul.f32 0.03125, %v105_v51  ;;  %v116_v54 = vmul.f32 0.03125, %v108_v52 }
 0x12f   :  { %4448 = vrsqrt.f32 %v120_v50 }
 0x130   :  { %v121_v55 = vadd.f32 1e-05, %v115_v53  ;;  %v122_v56 = vadd.f32 1e-05, %v116_v54 }
 0x131   :  { %v111_v57 = vpop.xlane.xlu1 %110 }
 0x132   :  { %4450 = vrsqrt.f32 %v121_v55  ;;  %v117_v58 = vmul.f32 0.03125, %v111_v57 }
 0x133   :  { %4452 = vrsqrt.f32 %v122_v56 }
 0x134   :  { %v4445_v59 = vpop.eup %4444  ;;  %v123_v60 = vadd.f32 1e-05, %v117_v58  ;;  %v4394_v58 = vld [vmem:[%s6090_s4] sm:$0xff]  }
 0x135   :  { %v130_v62 = vmul.f32 %v4445_v59, %v82_v16  ;;  %v4648_v59 = vmov 0.0  }
 0x136   :  { %4454 = vrsqrt.f32 %v123_v60  ;;  %3932 = vmatprep.subr.bf16.mxu0 %v4648_v59  ;;  %3948 = vmatprep.subr.bf16.mxu1 %v4648_v59  ;;  %v4395_v60 = vld [vmem:[%s6090_s4 + $0x10] sm:$0xff]  }
 0x137   :  { %v140_v0 = vmul.f32 %v3491_v61, %v130_v62  ;;  %3933 = vmatpush3.bf16.msra.mxu0 %v4394_v58  ;;  %3949 = vmatpush3.bf16.msra.mxu1 %v4395_v60  ;;  %v4397_v62 = vld [vmem:[%s6090_s4 + $0x18] sm:$0xff]   ;;  %v4404_v58 = vld [vmem:[%s6090_s4 + $0x48] sm:$0xff]  }
 0x138   :  { %v4447_v1 = vpop.eup %4446  ;;  %3934 = vmatprep.subr.bf16.mxu0 %v4648_v59  ;;  %3950 = vmatprep.subr.bf16.mxu1 %v4648_v59  ;;  %v4405_v60 = vld [vmem:[%s6090_s4 + $0x58] sm:$0xff]  }
 0x139   :  { %v4449_v2 = vpop.eup %4448  ;;  %v4753_v3 = vadd.f32 %v3492_v63, %v140_v0  ;;  %v131_v4 = vmul.f32 %v4447_v1, %v83_v24  ;;  %3936 = vmatprep.mubr.msk.bf16.mxu0 %vm4649_vm1, %v4648_v59  ;;  %3952 = vmatprep.mubr.msk.bf16.mxu1 %vm4649_vm1, %v4648_v59 }
 0x13a   :  { %v132_v5 = vmul.f32 %v4449_v2, %v4729_v17 }
 0x13b   :  { %v158_v6 = vsel %vm56_vm0, %v4753_v3, 0.0  ;;  %v141_v7 = vmul.f32 %v3491_v61, %v131_v4  ;;  %3951 = vmatpush3.bf16.msra.mxu1 %v4397_v62  ;;  %v421_v62 = vld [vmem:[%s6091_s5 + $0x30] sm:$0xff] }
 0x13c   :  { %v4451_v8 = vpop.eup %4450  ;;  %159 = vadd.xlane.f32.xlu0 %v158_v6  ;;  %v142_v9 = vmul.f32 %v3491_v61, %v132_v5  ;;  %3980 = vmatprep.subr.bf16.mxu1 %v4648_v59 }
 0x13d   :  { %v4453_v10 = vpop.eup %4452  ;;  %v4758_v11 = vadd.f32 %v3492_v63, %v141_v7  ;;  %v133_v12 = vmul.f32 %v4451_v8, %v4733_v25 }
 0x13e   :  { %v4761_v13 = vadd.f32 %v3492_v63, %v142_v9  ;;  %v134_v14 = vmul.f32 %v4453_v10, %v86_v34 }
 0x13f   :  { %v161_v15 = vsel %vm56_vm0, %v4758_v11, 0.0  ;;  %v143_v16 = vmul.f32 %v3491_v61, %v133_v12 }
 0x140   :  { %v4455_v17 = vpop.eup %4454  ;;  %162 = vadd.xlane.f32.xlu1 %v161_v15  ;;  %v164_v18 = vsel %vm56_vm0, %v4761_v13, 0.0  ;;  %v144_v19 = vmul.f32 %v3491_v61, %v134_v14 }
 0x141   :  { %165 = vadd.xlane.f32.xlu0 %v164_v18  ;;  %v4767_v20 = vadd.f32 %v3492_v63, %v143_v16  ;;  %v135_v21 = vmul.f32 %v4455_v17, %v4739_v35 }
 0x142   :  { %v4770_v22 = vadd.f32 %v3492_v63, %v144_v19 }
 0x143   :  { %v167_v23 = vsel %vm56_vm0, %v4767_v20, 0.0  ;;  %v145_v24 = vmul.f32 %v3491_v61, %v135_v21  ;;  %v4396_v61 = vld [vmem:[%s6090_s4 + $0x8] sm:$0xff]  }
 0x144   :  { %168 = vadd.xlane.f32.xlu1 %v167_v23  ;;  %v170_v25 = vsel %vm56_vm0, %v4770_v22, 0.0  ;;  %3935 = vmatpush3.bf16.msra.mxu0 %v4396_v61  ;;  %v415_v61 = vld [vmem:[%s6091_s5] sm:$0xff] }
 0x145   :  { %171 = vadd.xlane.f32.xlu0 %v170_v25  ;;  %v4776_v26 = vadd.f32 %v3492_v63, %v145_v24  ;;  %3964 = vmatprep.subr.bf16.mxu0 %v4648_v59  ;;  %v3493_v24 = vld [vmem:[%s6089_s2 + $0x4] ss:$0 sm:$0xff] }
 0x147   :  { %v173_v27 = vsel %vm56_vm0, %v4776_v26, 0.0 }
 0x148   :  { %174 = vadd.xlane.f32.xlu1 %v173_v27 }
 0x1c9   :  { %v160_v28 = vpop.xlane.xlu0 %159 }
 0x1ca   :  { %v176_v29 = vmul.f32 0.03125, %v160_v28 }
 0x1cc   :  { %v4781_v30 = vsub.f32 %v4753_v3, %v176_v29 }
 0x1cd   :  { %v163_v31 = vpop.xlane.xlu1 %162 }
 0x1ce   :  { %v177_v32 = vmul.f32 0.03125, %v163_v31  ;;  %v166_v33 = vpop.xlane.xlu0 %165  ;;  %v188_v34 = vmul.f32 %v4781_v30, %v4781_v30  ;;  %v3494_v31 = vld [vmem:[%s6089_s2 + $0x5] ss:$0 sm:$0xff] }
 0x1cf   :  { %v178_v35 = vmul.f32 0.03125, %v166_v33 }
 0x1d0   :  { %v4786_v36 = vsub.f32 %v4758_v11, %v177_v32  ;;  %v194_v37 = vsel %vm56_vm0, %v188_v34, 0.0 }
 0x1d1   :  { %v4790_v38 = vsub.f32 %v4761_v13, %v178_v35  ;;  %v169_v39 = vpop.xlane.xlu1 %168  ;;  %195 = vadd.xlane.f32.xlu0 %v194_v37 }
 0x1d2   :  { %v179_v40 = vmul.f32 0.03125, %v169_v39  ;;  %v172_v41 = vpop.xlane.xlu0 %171  ;;  %v189_v42 = vmul.f32 %v4786_v36, %v4786_v36  ;;  %v4398_v39 = vld [vmem:[%s6090_s4 + $0x20] sm:$0xff]  }
 0x1d3   :  { %v180_v43 = vmul.f32 0.03125, %v172_v41  ;;  %v190_v44 = vmul.f32 %v4790_v38, %v4790_v38 }
 0x1d4   :  { %v4797_v45 = vsub.f32 %v4767_v20, %v179_v40  ;;  %v197_v46 = vsel %vm56_vm0, %v189_v42, 0.0  ;;  %v4400_v42 = vld [vmem:[%s6090_s4 + $0x30] sm:$0xff]  }
 0x1d5   :  { %v4801_v47 = vsub.f32 %v4770_v22, %v180_v43  ;;  %198 = vadd.xlane.f32.xlu1 %v197_v46  ;;  %v175_v48 = vpop.xlane.xlu1 %174  ;;  %v200_v49 = vsel %vm56_vm0, %v190_v44, 0.0 }
 0x1d6   :  { %v181_v50 = vmul.f32 0.03125, %v175_v48  ;;  %201 = vadd.xlane.f32.xlu0 %v200_v49  ;;  %v191_v51 = vmul.f32 %v4797_v45, %v4797_v45  ;;  %v4401_v48 = vld [vmem:[%s6090_s4 + $0x38] sm:$0xff]  }
 0x1d7   :  { %v192_v52 = vmul.f32 %v4801_v47, %v4801_v47 }
 0x1d8   :  { %v4809_v53 = vsub.f32 %v4776_v26, %v181_v50  ;;  %v203_v54 = vsel %vm56_vm0, %v191_v51, 0.0 }
 0x1d9   :  { %204 = vadd.xlane.f32.xlu1 %v203_v54  ;;  %v206_v55 = vsel %vm56_vm0, %v192_v52, 0.0 }
 0x1da   :  { %207 = vadd.xlane.f32.xlu0 %v206_v55  ;;  %v193_v56 = vmul.f32 %v4809_v53, %v4809_v53 }
 0x1dc   :  { %v209_v57 = vsel %vm56_vm0, %v193_v56, 0.0  ;;  %v4402_v56 = vld [vmem:[%s6090_s4 + $0x40] sm:$0xff]  }
 0x1dd   :  { %210 = vadd.xlane.f32.xlu1 %v209_v57  ;;  %v4403_v57 = vld [vmem:[%s6090_s4 + $0x50] sm:$0xff]  }
 0x25e   :  { %v196_v63 = vpop.xlane.xlu0 %195 }
 0x25f   :  { %v212_v0 = vmul.f32 0.03125, %v196_v63 }
 0x261   :  { %v218_v1 = vadd.f32 1e-05, %v212_v0 }
 0x262   :  { %v199_v2 = vpop.xlane.xlu1 %198 }
 0x263   :  { %4456 = vrsqrt.f32 %v218_v1  ;;  %v213_v4 = vmul.f32 0.03125, %v199_v2  ;;  %v202_v5 = vpop.xlane.xlu0 %201  ;;  %v416_v1 = vld [vmem:[%s6091_s5 + $0x8] sm:$0xff]  ;;  %v422_v2 = vld [vmem:[%s6091_s5 + $0x38] sm:$0xff] }
 0x264   :  { %v214_v6 = vmul.f32 0.03125, %v202_v5 }
 0x265   :  { %v219_v7 = vadd.f32 1e-05, %v213_v4 }
 0x266   :  { %v220_v8 = vadd.f32 1e-05, %v214_v6  ;;  %v205_v9 = vpop.xlane.xlu1 %204 }
 0x267   :  { %4458 = vrsqrt.f32 %v219_v7  ;;  %v215_v10 = vmul.f32 0.03125, %v205_v9  ;;  %v208_v12 = vpop.xlane.xlu0 %207 }
 0x268   :  { %4460 = vrsqrt.f32 %v220_v8  ;;  %v216_v15 = vmul.f32 0.03125, %v208_v12 }
 0x269   :  { %v221_v14 = vadd.f32 1e-05, %v215_v10 }
 0x26a   :  { %v211_v16 = vpop.xlane.xlu1 %210  ;;  %v222_v19 = vadd.f32 1e-05, %v216_v15 }
 0x26b   :  { %4462 = vrsqrt.f32 %v221_v14  ;;  %v217_v17 = vmul.f32 0.03125, %v211_v16 }
 0x26d   :  { %v4457_v18 = vpop.eup %4456  ;;  %v223_v21 = vadd.f32 1e-05, %v217_v17 }
 0x26e   :  { %v230_v23 = vmul.f32 %v4457_v18, %v4781_v30 }
 0x26f   :  { %4464 = vrsqrt.f32 %v223_v21  ;;  %v417_v21 = vld [vmem:[%s6091_s5 + $0x10] sm:$0xff] }
 0x270   :  { %4466 = vrsqrt.f32 %v222_v19  ;;  %v240_v27 = vmul.f32 %v3493_v24, %v230_v23  ;;  %v423_v23 = vld [vmem:[%s6091_s5 + $0x40] sm:$0xff] }
 0x271   :  { %v4459_v25 = vpop.eup %4458 }
 0x272   :  { %v231_v28 = vmul.f32 %v4459_v25, %v4786_v36  ;;  %v4461_v29 = vpop.eup %4460  ;;  %v250_v34 = vadd.f32 %v3494_v31, %v240_v27 }
 0x273   :  { %v232_v30 = vmul.f32 %v4461_v29, %v4790_v38  ;;  %v4399_v38 = vld [vmem:[%s6090_s4 + $0x28] sm:$0xff]   ;;  %v418_v29 = vld [vmem:[%s6091_s5 + $0x18] sm:$0xff] }
 0x274   :  { %v241_v32 = vmul.f32 %v3493_v24, %v231_v28 }
 0x275   :  { %v4463_v33 = vpop.eup %4462  ;;  %v242_v43 = vmul.f32 %v3493_v24, %v232_v30 }
 0x276   :  { %v251_v35 = vadd.f32 %v3494_v31, %v241_v32  ;;  %v233_v37 = vmul.f32 %v4463_v33, %v4797_v45 }
 0x277   :  { %v252_v49 = vadd.f32 %v3494_v31, %v242_v43 }
 0x278   :  { %v243_v40 = vmul.f32 %v3493_v24, %v233_v37  ;;  %v256_v41 = vpack.c.bf16 %v251_v35, %v250_v34 }
 0x279   :  { %v4465_v36 = vpop.eup %4464 }
 0x27a   :  { %3937 = vmatmul.mubr.msk.bf16.vlgmr.msra.gmra.mrb[0].mxu0 %vm56_vm0, %v256_v41  ;;  %3953 = vmatmul.mubr.msk.bf16.vlgmr.msra.gmra.mrb[0].mxu1 %vm56_vm0, %v256_v41  ;;  %v4467_v44 = vpop.eup %4466  ;;  %v253_v45 = vadd.f32 %v3494_v31, %v243_v40  ;;  %v235_v46 = vmul.f32 %v4465_v36, %v4809_v53 }
 0x27b   :  { %3965 = vmatpush3.bf16.msra.mxu0 %v4398_v39  ;;  %3940 = vmatprep.mubr.msk.bf16.mxu0 %vm4649_vm1, %v4648_v59  ;;  %v234_v50 = vmul.f32 %v4467_v44, %v4801_v47 }
 0x27c   :  { %3956 = vmatprep.mubr.msk.bf16.mxu1 %vm4649_vm1, %v4648_v59  ;;  %3966 = vmatprep.subr.bf16.mxu0 %v4648_v59  ;;  %v245_v51 = vmul.f32 %v3493_v24, %v235_v46  ;;  %v257_v52 = vpack.c.bf16 %v253_v45, %v252_v49  ;;  %v419_v45 = vld [vmem:[%s6091_s5 + $0x20] sm:$0xff]  ;;  %v425_v46 = vld [vmem:[%s6091_s5 + $0x50] sm:$0xff] }
 0x27d   :  { %3981 = vmatpush3.bf16.msra.mxu1 %v4400_v42  ;;  %v244_v53 = vmul.f32 %v3493_v24, %v234_v50 }
 0x27e   :  { %3982 = vmatprep.subr.bf16.mxu1 %v4648_v59  ;;  %v255_v47 = vadd.f32 %v3494_v31, %v245_v51 }
 0x27f   :  { %3967 = vmatpush3.bf16.msra.mxu0 %v4399_v38  ;;  %v254_v54 = vadd.f32 %v3494_v31, %v244_v53  ;;  %v424_v31 = vld [vmem:[%s6091_s5 + $0x48] sm:$0xff]  ;;  %v426_v53 = vld [vmem:[%s6091_s5 + $0x58] sm:$0xff] }
 0x280   :  { %3996 = vmatprep.subr.bf16.mxu0 %v4648_v59 }
 0x281   :  { %3983 = vmatpush3.bf16.msra.mxu1 %v4401_v48  ;;  %v258_v55 = vpack.c.bf16 %v255_v47, %v254_v54 }
 0x282   :  { %3941 = vmatmul.mubr.msk.bf16.gmra.mrb[4].mxu0 %vm56_vm0, %v257_v52  ;;  %3957 = vmatmul.mubr.msk.bf16.gmra.mrb[4].mxu1 %vm56_vm0, %v257_v52 }
 0x283   :  { %3944 = vmatprep.mubr.msk.bf16.mxu0 %vm4649_vm1, %v4648_v59  ;;  %3960 = vmatprep.mubr.msk.bf16.mxu1 %vm4649_vm1, %v4648_v59 }
 0x284   :  { %4012 = vmatprep.subr.bf16.mxu1 %v4648_v59 }
 0x28a   :  { %3945 = vmatmul.mubr.msk.bf16.gmra.mrb[8].mxu0 %vm56_vm0, %v258_v55  ;;  %3961 = vmatmul.mubr.msk.bf16.gmra.mrb[8].mxu1 %vm56_vm0, %v258_v55 }
 0x28b   :  { %3968 = vmatprep.mubr.msk.bf16.mxu0 %vm4649_vm1, %v4648_v59  ;;  %3984 = vmatprep.mubr.msk.bf16.mxu1 %vm4649_vm1, %v4648_v59 }
 0x292   :  { %3969 = vmatmul.mubr.msk.bf16.vlgmr.msra.gmra.mrb[12].mxu0 %vm56_vm0, %v256_v41  ;;  %3985 = vmatmul.mubr.msk.bf16.vlgmr.msra.gmra.mrb[12].mxu1 %vm56_vm0, %v256_v41 }
 0x293   :  { %3972 = vmatprep.mubr.msk.bf16.mxu0 %vm4649_vm1, %v4648_v59  ;;  %3988 = vmatprep.mubr.msk.bf16.mxu1 %vm4649_vm1, %v4648_v59 }
 0x294   :  { %3997 = vmatpush3.bf16.msra.mxu0 %v4402_v56  ;;  %4013 = vmatpush3.bf16.msra.mxu1 %v4403_v57 }
 0x295   :  { %3998 = vmatprep.subr.bf16.mxu0 %v4648_v59  ;;  %4014 = vmatprep.subr.bf16.mxu1 %v4648_v59 }
 0x298   :  { %3999 = vmatpush3.bf16.msra.mxu0 %v4404_v58  ;;  %4015 = vmatpush3.bf16.msra.mxu1 %v4405_v60 }
 0x29a   :  { %3973 = vmatmul.mubr.msk.bf16.gmra.mrb[16].mxu0 %vm56_vm0, %v257_v52  ;;  %3989 = vmatmul.mubr.msk.bf16.gmra.mrb[16].mxu1 %vm56_vm0, %v257_v52 }
 0x29b   :  { %3976 = vmatprep.mubr.msk.bf16.mxu0 %vm4649_vm1, %v4648_v59  ;;  %3992 = vmatprep.mubr.msk.bf16.mxu1 %vm4649_vm1, %v4648_v59 }
 0x2a2   :  { %3977 = vmatmul.mubr.msk.bf16.gmra.mrb[20].mxu0 %vm56_vm0, %v258_v55  ;;  %3993 = vmatmul.mubr.msk.bf16.gmra.mrb[20].mxu1 %vm56_vm0, %v258_v55 }
 0x2a3   :  { %4000 = vmatprep.mubr.msk.bf16.mxu0 %vm4649_vm1, %v4648_v59  ;;  %4016 = vmatprep.mubr.msk.bf16.mxu1 %vm4649_vm1, %v4648_v59 }
 0x2aa   :  { %4001 = vmatmul.mubr.msk.bf16.vlgmr.msra.gmra.mrb[24].mxu0 %vm56_vm0, %v256_v41  ;;  %4017 = vmatmul.mubr.msk.bf16.vlgmr.msra.gmra.mrb[24].mxu1 %vm56_vm0, %v256_v41 }
 0x2ab   :  { %4004 = vmatprep.mubr.msk.bf16.mxu0 %vm4649_vm1, %v4648_v59  ;;  %4020 = vmatprep.mubr.msk.bf16.mxu1 %vm4649_vm1, %v4648_v59 }
 0x2b2   :  { %4005 = vmatmul.mubr.msk.bf16.gmra.mrb[28].mxu0 %vm56_vm0, %v257_v52  ;;  %4021 = vmatmul.mubr.msk.bf16.gmra.mrb[28].mxu1 %vm56_vm0, %v257_v52  ;;  %v420_v52 = vld [vmem:[%s6091_s5 + $0x28] sm:$0xff] }
 0x2b3   :  { %4008 = vmatprep.mubr.msk.bf16.mxu0 %vm4649_vm1, %v4648_v59  ;;  %4024 = vmatprep.mubr.msk.bf16.mxu1 %vm4649_vm1, %v4648_v59 }
 0x2ba   :  { %4009 = vmatmul.mubr.msk.bf16.gmra.mrb[32].mxu0 %vm56_vm0, %v258_v55  ;;  %4025 = vmatmul.mubr.msk.bf16.gmra.mrb[32].mxu1 %vm56_vm0, %v258_v55 }
 0x34d   :  { %v318_v63 = vpop.f32.mrb[0].mxu0  ;;  %v392_v0 = vpop.f32.mrb[0].mxu1 }
 0x34e   :  { %v427_v4 = vadd.f32 %v415_v61, %v318_v63  ;;  %v433_v5 = vadd.f32 %v421_v62, %v392_v0  ;;  %v3938_v6 = vpop.f32.mrb[1].mxu0  ;;  %v3954_v7 = vpop.f32.mrb[1].mxu1 }
 0x34f   :  { %v321_v8 = vpop.f32.mrb[2].mxu0  ;;  %v395_v9 = vpop.f32.mrb[2].mxu1  ;;  %v3527_v7 = vld [vmem:[%s6091_s5 + $0x60] sm:$0xff] }
 0x350   :  { %v428_v10 = vadd.f32 %v416_v1, %v321_v8  ;;  %v434_v12 = vadd.f32 %v422_v2, %v395_v9  ;;  %v3939_v14 = vpop.f32.mrb[3].mxu0  ;;  %v3955_v15 = vpop.f32.mrb[3].mxu1  ;;  %v439_v16 = vmul.f32 0.25, %v427_v4  ;;  %v4942_v17 = vmul.f32 0.25, %v433_v5 }
 0x351   :  { %v3534_v14 = vld [vmem:[%s6091_s5 + $0x98] sm:$0xff] }
 0x352   :  { %v440_v18 = vmul.f32 0.25, %v428_v10  ;;  %v4944_v19 = vmul.f32 0.25, %v434_v12  ;;  %v3533_v10 = vld [vmem:[%s6091_s5 + $0x90] sm:$0xff]  ;;  %v3528_v12 = vld [vmem:[%s6091_s5 + $0x68] sm:$0xff] }
 0x354   :  { %v803_v24 = vpack.c.bf16 %v440_v18, %v439_v16  ;;  %v806_v25 = vpack.c.bf16 %v4944_v19, %v4942_v17  ;;  %v44_v19 = vld [vmem:[%s6092_s1 + $0x10] sm:$0xff] }
 0x355   :  { %v326_v27 = vpop.f32.mrb[4].mxu0  ;;  %v400_v28 = vpop.f32.mrb[4].mxu1 }
 0x356   :  { %v429_v32 = vadd.f32 %v417_v21, %v326_v27  ;;  %v435_v33 = vadd.f32 %v423_v23, %v400_v28  ;;  %v3942_v34 = vpop.f32.mrb[5].mxu0  ;;  %v3958_v35 = vpop.f32.mrb[5].mxu1  ;;  %4040 = vmatprep.mubr.msk.bf16.mxu0 %vm815_vm2, %v803_v24 }
 0x357   :  { %v329_v30 = vpop.f32.mrb[6].mxu0  ;;  %v403_v37 = vpop.f32.mrb[6].mxu1  ;;  %v3529_v34 = vld [vmem:[%s6091_s5 + $0x70] sm:$0xff] }
 0x358   :  { %v430_v39 = vadd.f32 %v418_v29, %v329_v30  ;;  %v436_v40 = vadd.f32 %v424_v31, %v403_v37  ;;  %v3943_v41 = vpop.f32.mrb[7].mxu0  ;;  %v3959_v36 = vpop.f32.mrb[7].mxu1  ;;  %v4961_v42 = vmul.f32 0.25, %v429_v32  ;;  %v4963_v43 = vmul.f32 0.25, %v435_v33 }
 0x359   :  { %v3536_v41 = vld [vmem:[%s6091_s5 + $0xa8] sm:$0xff] }
 0x35a   :  { %v4965_v44 = vmul.f32 0.25, %v430_v39  ;;  %v4967_v38 = vmul.f32 0.25, %v436_v40  ;;  %v3535_v39 = vld [vmem:[%s6091_s5 + $0xa0] sm:$0xff]  ;;  %v3530_v40 = vld [vmem:[%s6091_s5 + $0x78] sm:$0xff] }
 0x35c   :  { %v804_v48 = vpack.c.bf16 %v4965_v44, %v4961_v42  ;;  %v807_v49 = vpack.c.bf16 %v4967_v38, %v4963_v43  ;;  %v42_v42 = vld [vmem:[%s6092_s1] sm:$0xff]  ;;  %v43_v43 = vld [vmem:[%s6092_s1 + $0x8] sm:$0xff] }
 0x35d   :  { %v334_v50 = vpop.f32.mrb[8].mxu0  ;;  %v408_v51 = vpop.f32.mrb[8].mxu1 }
 0x35e   :  { %v431_v47 = vadd.f32 %v419_v45, %v334_v50  ;;  %v437_v54 = vadd.f32 %v425_v46, %v408_v51  ;;  %v3946_v55 = vpop.f32.mrb[9].mxu0  ;;  %v3962_v56 = vpop.f32.mrb[9].mxu1 }
 0x35f   :  { %v337_v57 = vpop.f32.mrb[10].mxu0  ;;  %v411_v58 = vpop.f32.mrb[10].mxu1 }
 0x360   :  { %v432_v60 = vadd.f32 %v420_v52, %v337_v57  ;;  %v438_v61 = vadd.f32 %v426_v53, %v411_v58  ;;  %v3947_v62 = vpop.f32.mrb[11].mxu0  ;;  %v3963_v63 = vpop.f32.mrb[11].mxu1  ;;  %v4985_v0 = vmul.f32 0.25, %v431_v47  ;;  %v4987_v1 = vmul.f32 0.25, %v437_v54  ;;  %v3531_v58 = vld [vmem:[%s6091_s5 + $0x80] sm:$0xff] }
 0x361   :  { %v3537_v63 = vld [vmem:[%s6091_s5 + $0xb0] sm:$0xff] }
 0x362   :  { %v4989_v2 = vmul.f32 0.25, %v432_v60  ;;  %v4991_v4 = vmul.f32 0.25, %v438_v61 }
 0x364   :  { %v805_v5 = vpack.c.bf16 %v4989_v2, %v4985_v0  ;;  %v808_v6 = vpack.c.bf16 %v4991_v4, %v4987_v1 }
 0x365   :  { %v502_v8 = vpop.f32.mrb[12].mxu0  ;;  %v576_v9 = vpop.f32.mrb[12].mxu1 }
 0x366   :  { %v3970_v15 = vpop.f32.mrb[13].mxu0  ;;  %v3986_v16 = vpop.f32.mrb[13].mxu1  ;;  %v612_v23 = vadd.f32 %v3527_v7, %v502_v8  ;;  %v618_v24 = vadd.f32 %v3533_v10, %v576_v9  ;;  %v3532_v7 = vld [vmem:[%s6091_s5 + $0x88] sm:$0xff]  ;;  %v3538_v8 = vld [vmem:[%s6091_s5 + $0xb8] sm:$0xff] }
 0x367   :  { %v505_v18 = vpop.f32.mrb[14].mxu0  ;;  %v579_v21 = vpop.f32.mrb[14].mxu1 }
 0x368   :  { %v613_v27 = vadd.f32 %v3528_v12, %v505_v18  ;;  %v619_v28 = vadd.f32 %v3534_v14, %v579_v21  ;;  %v3971_v29 = vpop.f32.mrb[15].mxu0  ;;  %v3987_v31 = vpop.f32.mrb[15].mxu1 }
 0x369   :  { %v3557_v29 = vld [vmem:[%s6091_s5 + $0xc0] sm:$0xff] }
 0x36a   :  { %v809_v32 = vpack.c.bf16 %v613_v27, %v612_v23  ;;  %v5009_v33 = vpack.c.bf16 %v619_v28, %v618_v24 }
 0x36c   :  { %4380 = vmatprep.subr.msk.bf16.mxu0 %vm815_vm2, %v809_v32  ;;  %v835_v35 = vsel %vm815_vm2, %v809_v32, 0 }
 0x36d   :  { %v510_v30 = vpop.f32.mrb[16].mxu0  ;;  %v584_v37 = vpop.f32.mrb[16].mxu1  ;;  %4029 = vmatpush3.bf16.xpose.msra.mxu0 %v835_v35  ;;  %v3563_v35 = vld [vmem:[%s6091_s5 + $0xf0] sm:$0xff] }
 0x36e   :  { %v3974_v36 = vpop.f32.mrb[17].mxu0  ;;  %v3990_v45 = vpop.f32.mrb[17].mxu1  ;;  %v614_v51 = vadd.f32 %v3529_v34, %v510_v30  ;;  %v620_v52 = vadd.f32 %v3535_v39, %v584_v37  ;;  %v3558_v30 = vld [vmem:[%s6091_s5 + $0xc8] sm:$0xff]  ;;  %v3564_v37 = vld [vmem:[%s6091_s5 + $0xf8] sm:$0xff] }
 0x36f   :  { %v513_v46 = vpop.f32.mrb[18].mxu0  ;;  %v587_v50 = vpop.f32.mrb[18].mxu1 }
 0x370   :  { %v615_v53 = vadd.f32 %v3530_v40, %v513_v46  ;;  %v621_v47 = vadd.f32 %v3536_v41, %v587_v50  ;;  %v3975_v54 = vpop.f32.mrb[19].mxu0  ;;  %v3991_v55 = vpop.f32.mrb[19].mxu1 }
 0x371   :  { %v3559_v55 = vld [vmem:[%s6091_s5 + $0xd0] sm:$0xff] }
 0x372   :  { %v810_v56 = vpack.c.bf16 %v615_v53, %v614_v51  ;;  %v5025_v57 = vpack.c.bf16 %v621_v47, %v620_v52 }
 0x374   :  { %4381 = vmatprep.subr.msk.bf16.mxu0 %vm815_vm2, %v810_v56  ;;  %v838_v60 = vsel %vm815_vm2, %v810_v56, 0  ;;  %v844_v56 = vsel %vm815_vm2, %v5009_v33, 0 }
 0x375   :  { %v518_v61 = vpop.f32.mrb[20].mxu0  ;;  %v592_v62 = vpop.f32.mrb[20].mxu1  ;;  %4031 = vmatpush3.bf16.xpose.msra.mxu0 %v838_v60 }
 0x376   :  { %v3978_v9 = vpop.f32.mrb[21].mxu0  ;;  %v3994_v10 = vpop.f32.mrb[21].mxu1  ;;  %v616_v15 = vadd.f32 %v3531_v58, %v518_v61  ;;  %v622_v16 = vadd.f32 %v3537_v63, %v592_v62  ;;  %v3565_v61 = vld [vmem:[%s6091_s5 + $0x100] sm:$0xff]  ;;  %v3560_v62 = vld [vmem:[%s6091_s5 + $0xd8] sm:$0xff]  ;;  %v3566_v63 = vld [vmem:[%s6091_s5 + $0x108] sm:$0xff] }
 0x377   :  { %v521_v12 = vpop.f32.mrb[22].mxu0  ;;  %v595_v14 = vpop.f32.mrb[22].mxu1 }
 0x378   :  { %v617_v18 = vadd.f32 %v3532_v7, %v521_v12  ;;  %v623_v21 = vadd.f32 %v3538_v8, %v595_v14  ;;  %v3979_v23 = vpop.f32.mrb[23].mxu0  ;;  %v3995_v24 = vpop.f32.mrb[23].mxu1 }
 0x379   :  { %v3561_v24 = vld [vmem:[%s6091_s5 + $0xe0] sm:$0xff] }
 0x37a   :  { %v811_v27 = vpack.c.bf16 %v617_v18, %v616_v15  ;;  %v5041_v28 = vpack.c.bf16 %v623_v21, %v622_v16 }
 0x37c   :  { %4382 = vmatprep.subr.msk.bf16.mxu0 %vm815_vm2, %v811_v27  ;;  %v841_v31 = vsel %vm815_vm2, %v811_v27, 0  ;;  %v847_v27 = vsel %vm815_vm2, %v5025_v57, 0 }
 0x37d   :  { %v675_v32 = vpop.f32.mrb[24].mxu0  ;;  %v749_v34 = vpop.f32.mrb[24].mxu1  ;;  %4033 = vmatpush3.bf16.xpose.msra.mxu0 %v841_v31 }
 0x37e   :  { %v4002_v39 = vpop.f32.mrb[25].mxu0  ;;  %v4018_v40 = vpop.f32.mrb[25].mxu1  ;;  %4383 = vmatprep.subr.msk.bf16.mxu0 %vm815_vm2, %v5009_v33  ;;  %v785_v45 = vadd.f32 %v3557_v29, %v675_v32  ;;  %v791_v46 = vadd.f32 %v3563_v35, %v749_v34  ;;  %v3567_v32 = vld [vmem:[%s6091_s5 + $0x110] sm:$0xff]  ;;  %v3562_v34 = vld [vmem:[%s6091_s5 + $0xe8] sm:$0xff]  ;;  %v3568_v35 = vld [vmem:[%s6091_s5 + $0x118] sm:$0xff] }
 0x37f   :  { %v678_v41 = vpop.f32.mrb[26].mxu0  ;;  %v752_v36 = vpop.f32.mrb[26].mxu1 }
 0x380   :  { %v786_v50 = vadd.f32 %v3558_v30, %v678_v41  ;;  %v792_v51 = vadd.f32 %v3564_v37, %v752_v36  ;;  %v4003_v52 = vpop.f32.mrb[27].mxu0  ;;  %v4019_v53 = vpop.f32.mrb[27].mxu1 }
 0x381   :  { %v850_v53 = vsel %vm815_vm2, %v5041_v28, 0 }
 0x382   :  { %v797_v47 = vpack.c.bf16 %v786_v50, %v785_v45  ;;  %v800_v54 = vpack.c.bf16 %v792_v51, %v791_v46 }
 0x384   :  { %4052 = vmatprep.subr.bf16.mxu1 %v797_v47 }
 0x385   :  { %v683_v58 = vpop.f32.mrb[28].mxu0  ;;  %v757_v60 = vpop.f32.mrb[28].mxu1  ;;  %4035 = vmatpush3.bf16.xpose.msra.mxu0 %v844_v56  ;;  %4053 = vmatpush3.bf16.msra.mxu1 %v797_v47  ;;  %v47_v56 = vld [vmem:[%s6092_s1 + $0x28] sm:$0xff] }
 0x386   :  { %v4006_v7 = vpop.f32.mrb[29].mxu0  ;;  %v4022_v8 = vpop.f32.mrb[29].mxu1  ;;  %4384 = vmatprep.subr.msk.bf16.mxu0 %vm815_vm2, %v5025_v57  ;;  %v787_v10 = vadd.f32 %v3559_v55, %v683_v58  ;;  %v793_v12 = vadd.f32 %v3565_v61, %v757_v60 }
 0x387   :  { %v686_v33 = vpop.f32.mrb[30].mxu0  ;;  %v760_v9 = vpop.f32.mrb[30].mxu1 }
 0x388   :  { %v788_v14 = vadd.f32 %v3560_v62, %v686_v33  ;;  %v794_v15 = vadd.f32 %v3566_v63, %v760_v9  ;;  %v4007_v16 = vpop.f32.mrb[31].mxu0  ;;  %v4023_v18 = vpop.f32.mrb[31].mxu1  ;;  %v49_v62 = vld [vmem:[%s6092_s1 + $0x38] sm:$0xff] }
 0x389   :  { %v52_v16 = vld [vmem:[%s6092_s1 + $0x50] sm:$0xff] }
 0x38a   :  { %v798_v21 = vpack.c.bf16 %v788_v14, %v787_v10  ;;  %v801_v23 = vpack.c.bf16 %v794_v15, %v793_v12  ;;  %v50_v12 = vld [vmem:[%s6092_s1 + $0x40] sm:$0xff] }
 0x38c   :  { %4054 = vmatprep.subr.bf16.mxu1 %v798_v21 }
 0x38d   :  { %v691_v29 = vpop.f32.mrb[32].mxu0  ;;  %v765_v31 = vpop.f32.mrb[32].mxu1  ;;  %4037 = vmatpush3.bf16.xpose.msra.mxu0 %v847_v27  ;;  %4055 = vmatpush3.bf16.msra.mxu1 %v798_v21  ;;  %v51_v21 = vld [vmem:[%s6092_s1 + $0x48] sm:$0xff] }
 0x38e   :  { %v4010_v30 = vpop.f32.mrb[33].mxu0  ;;  %v4026_v37 = vpop.f32.mrb[33].mxu1  ;;  %4385 = vmatprep.subr.msk.bf16.mxu0 %vm815_vm2, %v5041_v28  ;;  %v789_v40 = vadd.f32 %v3561_v24, %v691_v29  ;;  %v795_v41 = vadd.f32 %v3567_v32, %v765_v31  ;;  %v53_v29 = vld [vmem:[%s6092_s1 + $0x58] sm:$0xff] }
 0x38f   :  { %v694_v57 = vpop.f32.mrb[34].mxu0  ;;  %v768_v39 = vpop.f32.mrb[34].mxu1 }
 0x390   :  { %v790_v36 = vadd.f32 %v3562_v34, %v694_v57  ;;  %v796_v45 = vadd.f32 %v3568_v35, %v768_v39  ;;  %v4011_v46 = vpop.f32.mrb[35].mxu0  ;;  %v4027_v50 = vpop.f32.mrb[35].mxu1 }
 0x392   :  { %v799_v51 = vpack.c.bf16 %v790_v36, %v789_v40  ;;  %v802_v52 = vpack.c.bf16 %v796_v45, %v795_v41 }
 0x394   :  { %4056 = vmatprep.subr.bf16.mxu1 %v799_v51 }
 0x395   :  { %4039 = vmatpush3.bf16.xpose.msra.mxu0 %v850_v53  ;;  %4057 = vmatpush3.bf16.msra.mxu1 %v799_v51 }
 0x396   :  { %4058 = vmatprep.subr.bf16.mxu1 %v800_v54  ;;  %4090 = vmatprep.subr.bf16.mxu0 %v4648_v59 }
 0x399   :  { %4059 = vmatpush3.bf16.msra.mxu1 %v800_v54  ;;  %v48_v54 = vld [vmem:[%s6092_s1 + $0x30] sm:$0xff] }
 0x39a   :  { %4060 = vmatprep.subr.bf16.mxu1 %v801_v23 }
 0x39c   :  { %4041 = vmatmul.mubr.msk.bf16.vlgmr.msra.gmra.mrb[36].mxu0 %vm815_vm2, %v804_v48  ;;  %v45_v48 = vld [vmem:[%s6092_s1 + $0x18] sm:$0xff] }
 0x39d   :  { %4044 = vmatprep.mubr.msk.bf16.mxu0 %vm815_vm2, %v805_v5  ;;  %4061 = vmatpush3.bf16.msra.mxu1 %v801_v23 }
 0x39e   :  { %4062 = vmatprep.subr.bf16.mxu1 %v802_v52 }
 0x3a1   :  { %4063 = vmatpush3.bf16.msra.mxu1 %v802_v52 }
 0x3a2   :  { %4076 = vmatprep.subr.bf16.mxu1 %v4648_v59 }
 0x3a4   :  { %4045 = vmatmul.mubr.msk.bf16.gmra.mrb[40].mxu0 %vm815_vm2, %v806_v25 }
 0x3a5   :  { %4048 = vmatprep.mubr.msk.bf16.mxu0 %vm815_vm2, %v807_v49 }
 0x3ac   :  { %4049 = vmatmul.mubr.msk.bf16.gmra.mrb[44].mxu0 %vm815_vm2, %v808_v6  ;;  %v46_v6 = vld [vmem:[%s6092_s1 + $0x20] sm:$0xff] }
 0x3ad   :  { %4092 = vmatprep.mubr.msk.bf16.mxu0 %vm4649_vm1, %v4648_v59 }
 0x46f   :  { %v4042_v17 = vpop.f32.mrb[36].mxu0 }
 0x470   :  { %v886_v25 = vpop.f32.mrb[37].mxu0  ;;  %v895_v0 = vadd.f32 %v4042_v17, %v44_v19 }
 0x471   :  { %v887_v44 = vadd.f32 %v886_v25, %v42_v42  ;;  %v4043_v38 = vpop.f32.mrb[38].mxu0 }
 0x472   :  { %v889_v49 = vpop.f32.mrb[39].mxu0  ;;  %v898_v4 = vadd.f32 %v4043_v38, %v45_v48  ;;  %v940_v47 = vsel %vm933_vm3, %v895_v0, -inf }
 0x473   :  { %v890_v1 = vadd.f32 %v889_v49, %v43_v43  ;;  %v934_v2 = vsel %vm933_vm3, %v887_v44, -inf }
 0x474   :  { %935 = vmax.xlane.f32.xlu0 %v934_v2  ;;  %v943_v61 = vsel %vm933_vm3, %v898_v4, -inf }
 0x475   :  { %v937_v5 = vsel %vm933_vm3, %v890_v1, -inf }
 0x476   :  { %938 = vmax.xlane.f32.xlu1 %v937_v5 }
 0x477   :  { %v4046_v28 = vpop.f32.mrb[40].mxu0 }
 0x478   :  { %v902_v55 = vpop.f32.mrb[41].mxu0  ;;  %941 = vmax.xlane.f32.xlu0 %v940_v47  ;;  %v911_v7 = vadd.f32 %v4046_v28, %v48_v54 }
 0x479   :  { %v903_v58 = vadd.f32 %v902_v55, %v46_v6  ;;  %v4047_v60 = vpop.f32.mrb[42].mxu0 }
 0x47a   :  { %v905_v63 = vpop.f32.mrb[43].mxu0  ;;  %944 = vmax.xlane.f32.xlu1 %v943_v61  ;;  %v914_v9 = vadd.f32 %v4047_v60, %v49_v62  ;;  %v952_v15 = vsel %vm933_vm3, %v911_v7, -inf }
 0x47b   :  { %v906_v8 = vadd.f32 %v905_v63, %v47_v56  ;;  %v946_v33 = vsel %vm933_vm3, %v903_v58, -inf }
 0x47c   :  { %947 = vmax.xlane.f32.xlu0 %v946_v33  ;;  %v955_v27 = vsel %vm933_vm3, %v914_v9, -inf }
 0x47d   :  { %v949_v10 = vsel %vm933_vm3, %v906_v8, -inf }
 0x47e   :  { %950 = vmax.xlane.f32.xlu1 %v949_v10 }
 0x47f   :  { %v4050_v14 = vpop.f32.mrb[44].mxu0 }
 0x480   :  { %v918_v18 = vpop.f32.mrb[45].mxu0  ;;  %953 = vmax.xlane.f32.xlu0 %v952_v15  ;;  %v5161_v32 = vadd.f32 %v4050_v14, %v52_v16 }
 0x481   :  { %v919_v23 = vadd.f32 %v918_v18, %v50_v12  ;;  %v4051_v24 = vpop.f32.mrb[46].mxu0 }
 0x482   :  { %v921_v31 = vpop.f32.mrb[47].mxu0  ;;  %956 = vmax.xlane.f32.xlu1 %v955_v27  ;;  %v5164_v30 = vadd.f32 %v4051_v24, %v53_v29  ;;  %v964_v57 = vsel %vm933_vm3, %v5161_v32, -inf }
 0x483   :  { %v922_v34 = vadd.f32 %v921_v31, %v51_v21  ;;  %v958_v35 = vsel %vm933_vm3, %v919_v23, -inf }
 0x484   :  { %959 = vmax.xlane.f32.xlu0 %v958_v35  ;;  %v967_v39 = vsel %vm933_vm3, %v5164_v30, -inf }
 0x485   :  { %v961_v37 = vsel %vm933_vm3, %v922_v34, -inf }
 0x486   :  { %962 = vmax.xlane.f32.xlu1 %v961_v37 }
 0x488   :  { %965 = vmax.xlane.f32.xlu0 %v964_v57 }
 0x48a   :  { %968 = vmax.xlane.f32.xlu1 %v967_v39 }
 0x501   :  { %v936_v40 = vpop.xlane.xlu0 %935 }
 0x502   :  { %v970_v41 = vsub.f32 %v887_v44, %v936_v40 }
 0x503   :  { %v939_v36 = vpop.xlane.xlu1 %938 }
 0x504   :  { %v982_v45 = vmul.f32 1.442695, %v970_v41  ;;  %v971_v46 = vsub.f32 %v890_v1, %v939_v36 }
 0x505   :  { %v942_v50 = vpop.xlane.xlu0 %941 }
 0x506   :  { %4468 = vpow2.f32 %v982_v45  ;;  %v984_v51 = vmul.f32 1.442695, %v971_v46  ;;  %v972_v52 = vsub.f32 %v895_v0, %v942_v50  ;;  %v4407_v45 = vld [vmem:[%s6093_s6] sm:$0xff]  }
 0x507   :  { %v945_v53 = vpop.xlane.xlu1 %944  ;;  %4091 = vmatpush3.bf16.msra.mxu0 %v4407_v45 }
 0x508   :  { %4470 = vpow2.f32 %v984_v51  ;;  %v986_v42 = vmul.f32 1.442695, %v972_v52  ;;  %v973_v17 = vsub.f32 %v898_v4, %v945_v53  ;;  %4120 = vmatprep.subr.bf16.mxu0 %v4648_v59 }
 0x509   :  { %v948_v19 = vpop.xlane.xlu0 %947 }
 0x50a   :  { %4472 = vpow2.f32 %v986_v42  ;;  %v988_v25 = vmul.f32 1.442695, %v973_v17  ;;  %v974_v43 = vsub.f32 %v903_v58, %v948_v19 }
 0x50b   :  { %v951_v38 = vpop.xlane.xlu1 %950 }
 0x50c   :  { %4474 = vpow2.f32 %v988_v25  ;;  %v990_v48 = vmul.f32 1.442695, %v974_v43  ;;  %v975_v49 = vsub.f32 %v906_v8, %v951_v38 }
 0x50d   :  { %v954_v44 = vpop.xlane.xlu0 %953 }
 0x50e   :  { %4476 = vpow2.f32 %v990_v48  ;;  %v992_v2 = vmul.f32 1.442695, %v975_v49  ;;  %v976_v1 = vsub.f32 %v911_v7, %v954_v44 }
 0x50f   :  { %v957_v5 = vpop.xlane.xlu1 %956 }
 0x510   :  { %v5171_v6 = vpop.eup %4468  ;;  %4478 = vpow2.f32 %v992_v2  ;;  %v994_v0 = vmul.f32 1.442695, %v976_v1  ;;  %v977_v28 = vsub.f32 %v914_v9, %v957_v5 }
 0x511   :  { %v960_v47 = vpop.xlane.xlu0 %959  ;;  %v1006_v4 = vsel %vm933_vm3, %v5171_v6, 0.0 }
 0x512   :  { %v5175_v54 = vpop.eup %4470  ;;  %4480 = vpow2.f32 %v994_v0  ;;  %v996_v55 = vmul.f32 1.442695, %v977_v28  ;;  %v978_v56 = vsub.f32 %v919_v23, %v960_v47  ;;  %1007 = vadd.xlane.f32.xlu0 %v1006_v4 }
 0x513   :  { %v963_v58 = vpop.xlane.xlu1 %962  ;;  %v1009_v60 = vsel %vm933_vm3, %v5175_v54, 0.0 }
 0x514   :  { %v5179_v61 = vpop.eup %4472  ;;  %4482 = vpow2.f32 %v996_v55  ;;  %v998_v62 = vmul.f32 1.442695, %v978_v56  ;;  %v979_v63 = vsub.f32 %v922_v34, %v963_v58  ;;  %1010 = vadd.xlane.f32.xlu1 %v1009_v60 }
 0x515   :  { %v966_v7 = vpop.xlane.xlu0 %965  ;;  %v1012_v8 = vsel %vm933_vm3, %v5179_v61, 0.0 }
 0x516   :  { %v5183_v33 = vpop.eup %4474  ;;  %4484 = vpow2.f32 %v998_v62  ;;  %v1000_v9 = vmul.f32 1.442695, %v979_v63  ;;  %v980_v10 = vsub.f32 %v5161_v32, %v966_v7  ;;  %1013 = vadd.xlane.f32.xlu0 %v1012_v8 }
 0x517   :  { %v969_v12 = vpop.xlane.xlu1 %968  ;;  %v1015_v14 = vsel %vm933_vm3, %v5183_v33, 0.0 }
 0x518   :  { %v5188_v15 = vpop.eup %4476  ;;  %4486 = vpow2.f32 %v1000_v9  ;;  %v1002_v16 = vmul.f32 1.442695, %v980_v10  ;;  %v981_v18 = vsub.f32 %v5164_v30, %v969_v12  ;;  %1016 = vadd.xlane.f32.xlu1 %v1015_v14 }
 0x519   :  { %v1018_v21 = vsel %vm933_vm3, %v5188_v15, 0.0 }
 0x51a   :  { %v5193_v23 = vpop.eup %4478  ;;  %4488 = vpow2.f32 %v1002_v16  ;;  %v1004_v24 = vmul.f32 1.442695, %v981_v18  ;;  %1019 = vadd.xlane.f32.xlu0 %v1018_v21 }
 0x51b   :  { %v1021_v27 = vsel %vm933_vm3, %v5193_v23, 0.0 }
 0x51c   :  { %v5197_v29 = vpop.eup %4480  ;;  %4490 = vpow2.f32 %v1004_v24  ;;  %1022 = vadd.xlane.f32.xlu1 %v1021_v27 }
 0x51d   :  { %v1024_v31 = vsel %vm933_vm3, %v5197_v29, 0.0 }
 0x51e   :  { %v5201_v32 = vpop.eup %4482  ;;  %1025 = vadd.xlane.f32.xlu0 %v1024_v31 }
 0x51f   :  { %v1027_v34 = vsel %vm933_vm3, %v5201_v32, 0.0 }
 0x520   :  { %v5205_v35 = vpop.eup %4484  ;;  %1028 = vadd.xlane.f32.xlu1 %v1027_v34 }
 0x521   :  { %v1030_v30 = vsel %vm933_vm3, %v5205_v35, 0.0 }
 0x522   :  { %v5209_v37 = vpop.eup %4486  ;;  %1031 = vadd.xlane.f32.xlu0 %v1030_v30 }
 0x523   :  { %v1033_v57 = vsel %vm933_vm3, %v5209_v37, 0.0 }
 0x524   :  { %v5213_v39 = vpop.eup %4488  ;;  %1034 = vadd.xlane.f32.xlu1 %v1033_v57 }
 0x525   :  { %v1036_v40 = vsel %vm933_vm3, %v5213_v39, 0.0 }
 0x526   :  { %v5217_v41 = vpop.eup %4490  ;;  %1037 = vadd.xlane.f32.xlu0 %v1036_v40 }
 0x527   :  { %v1039_v36 = vsel %vm933_vm3, %v5217_v41, 0.0 }
 0x528   :  { %1040 = vadd.xlane.f32.xlu1 %v1039_v36 }
 0x59f   :  { %v1008_v46 = vpop.xlane.xlu0 %1007 }
 0x5a0   :  { %4492 = vrcp.f32 %v1008_v46 }
 0x5a1   :  { %v1011_v50 = vpop.xlane.xlu1 %1010 }
 0x5a2   :  { %4494 = vrcp.f32 %v1011_v50 }
 0x5a3   :  { %v1014_v51 = vpop.xlane.xlu0 %1013 }
 0x5a4   :  { %4496 = vrcp.f32 %v1014_v51 }
 0x5a5   :  { %v1017_v52 = vpop.xlane.xlu1 %1016 }
 0x5a6   :  { %4498 = vrcp.f32 %v1017_v52 }
 0x5a7   :  { %v1020_v53 = vpop.xlane.xlu0 %1019 }
 0x5a8   :  { %4500 = vrcp.f32 %v1020_v53 }
 0x5a9   :  { %v1023_v42 = vpop.xlane.xlu1 %1022 }
 0x5aa   :  { %v4493_v17 = vpop.eup %4492  ;;  %4502 = vrcp.f32 %v1023_v42 }
 0x5ab   :  { %v1026_v19 = vpop.xlane.xlu0 %1025  ;;  %v1054_v38 = vmul.f32 %v4493_v17, %v5171_v6  ;;  %v4406_v6 = vld [vmem:[%s6093_s6 + $0x8] sm:$0xff]  }
 0x5ac   :  { %v4495_v25 = vpop.eup %4494  ;;  %4504 = vrcp.f32 %v1026_v19 }
 0x5ad   :  { %v1029_v43 = vpop.xlane.xlu1 %1028  ;;  %v1055_v48 = vmul.f32 %v4495_v25, %v5175_v54 }
 0x5ae   :  { %v4497_v49 = vpop.eup %4496  ;;  %4506 = vrcp.f32 %v1029_v43  ;;  %v3591_v43 = vld [vmem:[%s6089_s2 + $0x8] ss:$0 sm:$0xff] }
 0x5af   :  { %v1032_v44 = vpop.xlane.xlu0 %1031  ;;  %v1066_v2 = vpack.c.bf16 %v1055_v48, %v1054_v38  ;;  %v1056_v5 = vmul.f32 %v4497_v49, %v5179_v61 }
 0x5b0   :  { %v4499_v1 = vpop.eup %4498  ;;  %4508 = vrcp.f32 %v1032_v44 }
 0x5b1   :  { %v1057_v0 = vmul.f32 %v4499_v1, %v5183_v33  ;;  %v1035_v28 = vpop.xlane.xlu1 %1034  ;;  %4064 = vmatprep.mubr.msk.bf16.mxu1 %vm933_vm3, %v1066_v2 }
 0x5b2   :  { %v4501_v47 = vpop.eup %4500  ;;  %4510 = vrcp.f32 %v1035_v28 }
 0x5b3   :  { %v1067_v4 = vpack.c.bf16 %v1057_v0, %v1056_v5  ;;  %v1038_v54 = vpop.xlane.xlu0 %1037  ;;  %v1058_v58 = vmul.f32 %v4501_v47, %v5188_v15 }
 0x5b4   :  { %v4503_v55 = vpop.eup %4502  ;;  %4512 = vrcp.f32 %v1038_v54 }
 0x5b5   :  { %v1041_v56 = vpop.xlane.xlu1 %1040  ;;  %4065 = vmatmul.mubr.msk.bf16.vlgmr.msra.gmra.mrb[36].mxu1 %vm933_vm3, %v1067_v4  ;;  %v1059_v60 = vmul.f32 %v4503_v55, %v5193_v23 }
 0x5b6   :  { %v4505_v61 = vpop.eup %4504  ;;  %4514 = vrcp.f32 %v1041_v56  ;;  %4077 = vmatpush3.bf16.msra.mxu1 %v4406_v6 }
 0x5b7   :  { %v1068_v62 = vpack.c.bf16 %v1059_v60, %v1058_v58  ;;  %4104 = vmatprep.subr.bf16.mxu1 %v4648_v59  ;;  %v1060_v7 = vmul.f32 %v4505_v61, %v5197_v29 }
 0x5b8   :  { %v4507_v63 = vpop.eup %4506 }
 0x5b9   :  { %4068 = vmatprep.mubr.msk.bf16.mxu1 %vm933_vm3, %v1068_v62  ;;  %v1061_v8 = vmul.f32 %v4507_v63, %v5201_v32 }
 0x5ba   :  { %v4509_v33 = vpop.eup %4508 }
 0x5bb   :  { %v1069_v9 = vpack.c.bf16 %v1061_v8, %v1060_v7  ;;  %v1062_v12 = vmul.f32 %v4509_v33, %v5205_v35 }
 0x5bc   :  { %v4511_v10 = vpop.eup %4510 }
 0x5bd   :  { %4069 = vmatmul.mubr.msk.bf16.gmra.mrb[40].mxu1 %vm933_vm3, %v1069_v9  ;;  %v1063_v14 = vmul.f32 %v4511_v10, %v5209_v37 }
 0x5be   :  { %v4513_v15 = vpop.eup %4512 }
 0x5bf   :  { %v1070_v16 = vpack.c.bf16 %v1063_v14, %v1062_v12  ;;  %v1064_v21 = vmul.f32 %v4513_v15, %v5213_v39 }
 0x5c0   :  { %v4515_v18 = vpop.eup %4514 }
 0x5c1   :  { %4072 = vmatprep.mubr.msk.bf16.mxu1 %vm933_vm3, %v1070_v16  ;;  %v1065_v23 = vmul.f32 %v4515_v18, %v5217_v41 }
 0x5c3   :  { %v1071_v24 = vpack.c.bf16 %v1065_v23, %v1064_v21 }
 0x5c5   :  { %4073 = vmatmul.mubr.msk.bf16.gmra.mrb[44].mxu1 %vm933_vm3, %v1071_v24 }
 0x5c6   :  { %4078 = vmatprep.mubr.msk.bf16.mxu1 %vm4649_vm1, %v4648_v59 }
 0x688   :  { %v4066_v27 = vpop.f32.mrb[36].mxu1 }
 0x689   :  { %v1124_v29 = vpop.f32.mrb[37].mxu1 }
 0x68a   :  { %v4067_v31 = vpop.f32.mrb[38].mxu1 }
 0x68b   :  { %v1172_v32 = vpack.c.bf16 %v4067_v31, %v4066_v27  ;;  %v1127_v34 = vpop.f32.mrb[39].mxu1 }
 0x68c   :  { %v1171_v35 = vpack.c.bf16 %v1127_v34, %v1124_v29 }
 0x68e   :  { %4093 = vmatmul.mubr.msk.bf16.vlgmr.msra.gmra.mrb[48].mxu0 %vm815_vm2, %v1171_v35 }
 0x68f   :  { %4096 = vmatprep.mubr.msk.bf16.mxu0 %vm4649_vm1, %v4648_v59 }
 0x690   :  { %v4070_v30 = vpop.f32.mrb[40].mxu1 }
 0x691   :  { %v1140_v37 = vpop.f32.mrb[41].mxu1 }
 0x692   :  { %v4071_v57 = vpop.f32.mrb[42].mxu1 }
 0x693   :  { %v1174_v39 = vpack.c.bf16 %v4071_v57, %v4070_v30  ;;  %v1143_v40 = vpop.f32.mrb[43].mxu1 }
 0x694   :  { %v1173_v41 = vpack.c.bf16 %v1143_v40, %v1140_v37 }
 0x695   :  { %4079 = vmatmul.mubr.msk.bf16.vlgmr.msra.gmra.mrb[48].mxu1 %vm815_vm2, %v1174_v39 }
 0x696   :  { %4097 = vmatmul.mubr.msk.bf16.gmra.mrb[52].mxu0 %vm815_vm2, %v1172_v32  ;;  %4082 = vmatprep.mubr.msk.bf16.mxu1 %vm4649_vm1, %v4648_v59 }
 0x697   :  { %4100 = vmatprep.mubr.msk.bf16.mxu0 %vm4649_vm1, %v4648_v59 }
 0x698   :  { %v4074_v36 = vpop.f32.mrb[44].mxu1 }
 0x699   :  { %v1156_v45 = vpop.f32.mrb[45].mxu1 }
 0x69a   :  { %v4075_v46 = vpop.f32.mrb[46].mxu1 }
 0x69b   :  { %v1176_v50 = vpack.c.bf16 %v4075_v46, %v4074_v36  ;;  %v1159_v51 = vpop.f32.mrb[47].mxu1 }
 0x69c   :  { %v1175_v52 = vpack.c.bf16 %v1159_v51, %v1156_v45 }
 0x69e   :  { %4083 = vmatmul.mubr.msk.bf16.gmra.mrb[52].mxu1 %vm815_vm2, %v1175_v52  ;;  %4101 = vmatmul.mubr.msk.bf16.gmra.mrb[56].mxu0 %vm815_vm2, %v1173_v41 }
 0x69f   :  { %4086 = vmatprep.mubr.msk.bf16.mxu1 %vm4649_vm1, %v4648_v59  ;;  %4136 = vmatprep.mubr.msk.bf16.mxu0 %vm4649_vm1, %v4648_v59 }
 0x6a6   :  { %4087 = vmatmul.mubr.msk.bf16.gmra.mrb[56].mxu1 %vm815_vm2, %v1176_v50 }
 0x6a7   :  { %4108 = vmatprep.mubr.msk.bf16.mxu1 %vm4649_vm1, %v4648_v59 }
 0x761   :  { %v1303_v53 = vpop.f32.mrb[48].mxu0 }
 0x762   :  { %v4094_v42 = vpop.f32.mrb[49].mxu0 }
 0x763   :  { %v1306_v17 = vpop.f32.mrb[50].mxu0 }
 0x764   :  { %v4095_v19 = vpop.f32.mrb[51].mxu0 }
 0x768   :  { %v1231_v25 = vpop.f32.mrb[48].mxu1 }
 0x769   :  { %v1304_v38 = vadd.f32 %v1303_v53, %v1231_v25  ;;  %v4080_v48 = vpop.f32.mrb[49].mxu1  ;;  %v1311_v49 = vpop.f32.mrb[52].mxu0 }
 0x76a   :  { %v1234_v44 = vpop.f32.mrb[50].mxu1  ;;  %v4098_v2 = vpop.f32.mrb[53].mxu0 }
 0x76b   :  { %v1331_v1 = vadd.f32 %v3591_v43, %v1304_v38  ;;  %v1307_v5 = vadd.f32 %v1306_v17, %v1234_v44  ;;  %v4081_v0 = vpop.f32.mrb[51].mxu1  ;;  %v1314_v28 = vpop.f32.mrb[54].mxu0 }
 0x76c   :  { %v4099_v47 = vpop.f32.mrb[55].mxu0 }
 0x76d   :  { %v5271_v6 = vadd.f32 %v1331_v1, %v4753_v3  ;;  %v1332_v4 = vadd.f32 %v3591_v43, %v1307_v5 }
 0x76f   :  { %v5274_v54 = vadd.f32 %v1332_v4, %v4758_v11  ;;  %v1345_v55 = vsel %vm56_vm0, %v5271_v6, 0.0  ;;  %v4408_v4 = vld [vmem:[%s6094_s7] sm:$0xff]  }
 0x770   :  { %1346 = vadd.xlane.f32.xlu0 %v1345_v55  ;;  %4105 = vmatpush3.bf16.msra.mxu1 %v4408_v4  ;;  %v4409_v55 = vld [vmem:[%s6094_s7 + $0x8] sm:$0xff]   ;;  %v3594_v4 = vld [vmem:[%s6096_s3] ss:$0 sm:$0xff] }
 0x771   :  { %v1239_v56 = vpop.f32.mrb[52].mxu1  ;;  %v1319_v58 = vpop.f32.mrb[56].mxu0  ;;  %v1348_v60 = vsel %vm56_vm0, %v5274_v54, 0.0  ;;  %4106 = vmatprep.subr.bf16.mxu1 %v4648_v59 }
 0x772   :  { %v1312_v61 = vadd.f32 %v1311_v49, %v1239_v56  ;;  %v4102_v62 = vpop.f32.mrb[57].mxu0  ;;  %1349 = vadd.xlane.f32.xlu1 %v1348_v60  ;;  %v4084_v63 = vpop.f32.mrb[53].mxu1 }
 0x773   :  { %v1242_v7 = vpop.f32.mrb[54].mxu1  ;;  %v1322_v3 = vpop.f32.mrb[58].mxu0 }
 0x774   :  { %v1333_v8 = vadd.f32 %v3591_v43, %v1312_v61  ;;  %v1315_v33 = vadd.f32 %v1314_v28, %v1242_v7  ;;  %v4085_v9 = vpop.f32.mrb[55].mxu1  ;;  %v4103_v11 = vpop.f32.mrb[59].mxu0  ;;  %4107 = vmatpush3.bf16.msra.mxu1 %v4409_v55 }
 0x775   :  { %4148 = vmatprep.subr.bf16.mxu1 %v4648_v59 }
 0x776   :  { %v5281_v10 = vadd.f32 %v1333_v8, %v4761_v13  ;;  %v1334_v12 = vadd.f32 %v3591_v43, %v1315_v33 }
 0x778   :  { %v5284_v14 = vadd.f32 %v1334_v12, %v4767_v20  ;;  %v1351_v15 = vsel %vm56_vm0, %v5281_v10, 0.0 }
 0x779   :  { %1352 = vadd.xlane.f32.xlu0 %v1351_v15  ;;  %v1247_v16 = vpop.f32.mrb[56].mxu1  ;;  %v3592_v15 = vld [vmem:[%s6089_s2 + $0x6] ss:$0 sm:$0xff] }
 0x77a   :  { %v1320_v18 = vadd.f32 %v1319_v58, %v1247_v16  ;;  %v4088_v21 = vpop.f32.mrb[57].mxu1  ;;  %v1354_v23 = vsel %vm56_vm0, %v5284_v14, 0.0 }
 0x77b   :  { %1355 = vadd.xlane.f32.xlu1 %v1354_v23  ;;  %v1250_v24 = vpop.f32.mrb[58].mxu1 }
 0x77c   :  { %v1335_v27 = vadd.f32 %v3591_v43, %v1320_v18  ;;  %v1323_v29 = vadd.f32 %v1322_v3, %v1250_v24  ;;  %v4089_v13 = vpop.f32.mrb[59].mxu1 }
 0x77e   :  { %v5291_v31 = vadd.f32 %v1335_v27, %v4770_v22  ;;  %v1336_v20 = vadd.f32 %v3591_v43, %v1323_v29  ;;  %v3593_v29 = vld [vmem:[%s6089_s2 + $0x7] ss:$0 sm:$0xff] }
 0x780   :  { %v5294_v32 = vadd.f32 %v1336_v20, %v4776_v26  ;;  %v1357_v34 = vsel %vm56_vm0, %v5291_v31, 0.0 }
 0x781   :  { %1358 = vadd.xlane.f32.xlu0 %v1357_v34 }
 0x782   :  { %v1360_v35 = vsel %vm56_vm0, %v5294_v32, 0.0 }
 0x783   :  { %1361 = vadd.xlane.f32.xlu1 %v1360_v35 }
 0x7fd   :  { %v1347_v30 = vpop.xlane.xlu0 %1346 }
 0x7fe   :  { %v1363_v37 = vmul.f32 0.03125, %v1347_v30 }
 0x7ff   :  { %v1350_v57 = vpop.xlane.xlu1 %1349 }
 0x800   :  { %v1369_v39 = vsub.f32 %v5271_v6, %v1363_v37  ;;  %v1364_v40 = vmul.f32 0.03125, %v1350_v57 }
 0x802   :  { %v1370_v22 = vsub.f32 %v5274_v54, %v1364_v40  ;;  %v1375_v41 = vmul.f32 %v1369_v39, %v1369_v39 }
 0x804   :  { %v1381_v26 = vsel %vm56_vm0, %v1375_v41, 0.0  ;;  %v1376_v36 = vmul.f32 %v1370_v22, %v1370_v22 }
 0x805   :  { %1382 = vadd.xlane.f32.xlu0 %v1381_v26 }
 0x806   :  { %v1353_v45 = vpop.xlane.xlu0 %1352  ;;  %v1384_v46 = vsel %vm56_vm0, %v1376_v36, 0.0 }
 0x807   :  { %v1365_v50 = vmul.f32 0.03125, %v1353_v45  ;;  %1385 = vadd.xlane.f32.xlu1 %v1384_v46 }
 0x808   :  { %v1356_v51 = vpop.xlane.xlu1 %1355 }
 0x809   :  { %v5305_v52 = vsub.f32 %v5281_v10, %v1365_v50  ;;  %v1366_v53 = vmul.f32 0.03125, %v1356_v51 }
 0x80b   :  { %v5308_v42 = vsub.f32 %v5284_v14, %v1366_v53  ;;  %v1377_v17 = vmul.f32 %v5305_v52, %v5305_v52 }
 0x80d   :  { %v1387_v19 = vsel %vm56_vm0, %v1377_v17, 0.0  ;;  %v1378_v25 = vmul.f32 %v5308_v42, %v5308_v42 }
 0x80e   :  { %1388 = vadd.xlane.f32.xlu0 %v1387_v19  ;;  %v1359_v43 = vpop.xlane.xlu0 %1358 }
 0x80f   :  { %v1367_v38 = vmul.f32 0.03125, %v1359_v43  ;;  %v1390_v48 = vsel %vm56_vm0, %v1378_v25, 0.0 }
 0x810   :  { %1391 = vadd.xlane.f32.xlu1 %v1390_v48  ;;  %v1362_v49 = vpop.xlane.xlu1 %1361 }
 0x811   :  { %v1373_v44 = vsub.f32 %v5291_v31, %v1367_v38  ;;  %v1368_v2 = vmul.f32 0.03125, %v1362_v49  ;;  %v4410_v49 = vld [vmem:[%s6095_s8] sm:$0xff]  }
 0x812   :  { %4121 = vmatpush3.bf16.msra.mxu0 %v4410_v49 }
 0x813   :  { %v5318_v1 = vsub.f32 %v5294_v32, %v1368_v2  ;;  %v1379_v5 = vmul.f32 %v1373_v44, %v1373_v44  ;;  %4122 = vmatprep.subr.bf16.mxu0 %v4648_v59  ;;  %v4412_v2 = vld [vmem:[%s6095_s8 + $0x10] sm:$0xff]  }
 0x815   :  { %v1393_v0 = vsel %vm56_vm0, %v1379_v5, 0.0  ;;  %v1380_v28 = vmul.f32 %v5318_v1, %v5318_v1  ;;  %v4414_v5 = vld [vmem:[%s6095_s8 + $0x20] sm:$0xff]  }
 0x816   :  { %1394 = vadd.xlane.f32.xlu0 %v1393_v0  ;;  %v4415_v0 = vld [vmem:[%s6095_s8 + $0x28] sm:$0xff]  }
 0x817   :  { %v1396_v47 = vsel %vm56_vm0, %v1380_v28, 0.0  ;;  %v4416_v28 = vld [vmem:[%s6095_s8 + $0x30] sm:$0xff]  }
 0x818   :  { %1397 = vadd.xlane.f32.xlu1 %v1396_v47  ;;  %v4417_v47 = vld [vmem:[%s6095_s8 + $0x38] sm:$0xff]  }
 0x892   :  { %v1383_v56 = vpop.xlane.xlu0 %1382 }
 0x893   :  { %v1399_v58 = vmul.f32 0.03125, %v1383_v56 }
 0x894   :  { %v1386_v60 = vpop.xlane.xlu1 %1385 }
 0x895   :  { %v1405_v61 = vadd.f32 1e-05, %v1399_v58  ;;  %v1400_v62 = vmul.f32 0.03125, %v1386_v60 }
 0x897   :  { %4516 = vrsqrt.f32 %v1405_v61  ;;  %v1406_v63 = vadd.f32 1e-05, %v1400_v62 }
 0x899   :  { %4518 = vrsqrt.f32 %v1406_v63 }
 0x89b   :  { %v1389_v7 = vpop.xlane.xlu0 %1388 }
 0x89c   :  { %v1401_v3 = vmul.f32 0.03125, %v1389_v7 }
 0x89d   :  { %v1392_v8 = vpop.xlane.xlu1 %1391 }
 0x89e   :  { %v1407_v33 = vadd.f32 1e-05, %v1401_v3  ;;  %v1402_v9 = vmul.f32 0.03125, %v1392_v8 }
 0x8a0   :  { %4520 = vrsqrt.f32 %v1407_v33  ;;  %v1408_v11 = vadd.f32 1e-05, %v1402_v9 }
 0x8a1   :  { %v4517_v12 = vpop.eup %4516 }
 0x8a2   :  { %v1417_v16 = vmul.f32 %v4517_v12, %v1369_v39  ;;  %4522 = vrsqrt.f32 %v1408_v11 }
 0x8a3   :  { %v4519_v18 = vpop.eup %4518  ;;  %v1395_v21 = vpop.xlane.xlu0 %1394 }
 0x8a4   :  { %v1427_v23 = vmul.f32 %v3592_v15, %v1417_v16  ;;  %v1418_v24 = vmul.f32 %v4519_v18, %v1370_v22  ;;  %v1403_v27 = vmul.f32 0.03125, %v1395_v21 }
 0x8a5   :  { %v1398_v13 = vpop.xlane.xlu1 %1397 }
 0x8a6   :  { %v1428_v20 = vmul.f32 %v3592_v15, %v1418_v24  ;;  %v1409_v34 = vadd.f32 1e-05, %v1403_v27  ;;  %v1404_v35 = vmul.f32 0.03125, %v1398_v13  ;;  %v1437_v30 = vadd.f32 %v3593_v29, %v1427_v23 }
 0x8a8   :  { %v1438_v37 = vadd.f32 %v3593_v29, %v1428_v20  ;;  %4524 = vrsqrt.f32 %v1409_v34  ;;  %v1410_v57 = vadd.f32 1e-05, %v1404_v35 }
 0x8aa   :  { %v4521_v40 = vpop.eup %4520  ;;  %4526 = vrsqrt.f32 %v1410_v57  ;;  %v1443_v39 = vpack.c.bf16 %v1438_v37, %v1437_v30 }
 0x8ab   :  { %v1419_v41 = vmul.f32 %v4521_v40, %v5305_v52 }
 0x8ac   :  { %v4523_v26 = vpop.eup %4522  ;;  %4109 = vmatmul.mubr.msk.bf16.vlgmr.msra.gmra.mrb[60].mxu1 %vm56_vm0, %v1443_v39 }
 0x8ad   :  { %v1420_v22 = vmul.f32 %v4523_v26, %v5308_v42  ;;  %4112 = vmatprep.mubr.msk.bf16.mxu1 %vm4649_vm1, %v4648_v59  ;;  %v1429_v36 = vmul.f32 %v3592_v15, %v1419_v41 }
 0x8af   :  { %v1430_v45 = vmul.f32 %v3592_v15, %v1420_v22  ;;  %v1439_v46 = vadd.f32 %v3593_v29, %v1429_v36 }
 0x8b1   :  { %v1440_v50 = vadd.f32 %v3593_v29, %v1430_v45 }
 0x8b2   :  { %v4525_v51 = vpop.eup %4524 }
 0x8b3   :  { %v1421_v53 = vmul.f32 %v4525_v51, %v1373_v44  ;;  %v1444_v17 = vpack.c.bf16 %v1440_v50, %v1439_v46  ;;  %v4411_v44 = vld [vmem:[%s6095_s8 + $0x8] sm:$0xff]  }
 0x8b4   :  { %v4527_v19 = vpop.eup %4526  ;;  %4123 = vmatpush3.bf16.msra.mxu0 %v4411_v44 }
 0x8b5   :  { %v1422_v25 = vmul.f32 %v4527_v19, %v5318_v1  ;;  %4113 = vmatmul.mubr.msk.bf16.gmra.mrb[64].mxu1 %vm56_vm0, %v1444_v17  ;;  %v1431_v52 = vmul.f32 %v3592_v15, %v1421_v53  ;;  %4124 = vmatprep.subr.bf16.mxu0 %v4648_v59  ;;  %v4413_v1 = vld [vmem:[%s6095_s8 + $0x18] sm:$0xff]  }
 0x8b6   :  { %4116 = vmatprep.mubr.msk.bf16.mxu1 %vm4649_vm1, %v4648_v59 }
 0x8b7   :  { %v1432_v42 = vmul.f32 %v3592_v15, %v1422_v25  ;;  %v1441_v43 = vadd.f32 %v3593_v29, %v1431_v52 }
 0x8b8   :  { %4125 = vmatpush3.bf16.msra.mxu0 %v4412_v2 }
 0x8b9   :  { %v1442_v38 = vadd.f32 %v3593_v29, %v1432_v42  ;;  %4126 = vmatprep.subr.bf16.mxu0 %v4648_v59 }
 0x8bb   :  { %v1445_v48 = vpack.c.bf16 %v1442_v38, %v1441_v43 }
 0x8bc   :  { %4127 = vmatpush3.bf16.msra.mxu0 %v4413_v1 }
 0x8bd   :  { %4117 = vmatmul.mubr.msk.bf16.gmra.mrb[68].mxu1 %vm56_vm0, %v1445_v48  ;;  %4128 = vmatprep.subr.bf16.mxu0 %v4648_v59 }
 0x8be   :  { %4152 = vmatprep.mubr.msk.bf16.mxu1 %vm4649_vm1, %v4648_v59 }
 0x8c0   :  { %4129 = vmatpush3.bf16.msra.mxu0 %v4414_v5 }
 0x8c1   :  { %4130 = vmatprep.subr.bf16.mxu0 %v4648_v59 }
 0x8c4   :  { %4131 = vmatpush3.bf16.msra.mxu0 %v4415_v0 }
 0x8c5   :  { %4132 = vmatprep.subr.bf16.mxu0 %v4648_v59 }
 0x8c8   :  { %4133 = vmatpush3.bf16.msra.mxu0 %v4416_v28 }
 0x8c9   :  { %4134 = vmatprep.subr.bf16.mxu0 %v4648_v59 }
 0x8cc   :  { %4135 = vmatpush3.bf16.msra.mxu0 %v4417_v47 }
 0x8cd   :  { %4180 = vmatprep.subr.bf16.mxu0 %v4648_v59 }
 0x97f   :  { %v1510_v55 = vpop.f32.mrb[60].mxu1 }
 0x980   :  { %v1511_v56 = vadd.f32 %v3594_v4, %v1510_v55  ;;  %v4110_v58 = vpop.f32.mrb[61].mxu1 }
 0x981   :  { %v1513_v60 = vpop.f32.mrb[62].mxu1 }
 0x982   :  { %v1533_v61 = vmul.f32 %v1511_v56, %v1511_v56  ;;  %v1514_v62 = vadd.f32 %v3594_v4, %v1513_v60  ;;  %v4111_v63 = vpop.f32.mrb[63].mxu1 }
 0x984   :  { %v1539_v7 = vmul.f32 %v1533_v61, %v1511_v56  ;;  %v1534_v3 = vmul.f32 %v1514_v62, %v1514_v62 }
 0x986   :  { %v1545_v8 = vmul.f32 0.044715, %v1539_v7  ;;  %v1540_v33 = vmul.f32 %v1534_v3, %v1514_v62 }
 0x988   :  { %v1551_v9 = vadd.f32 %v1545_v8, %v1511_v56  ;;  %v1546_v11 = vmul.f32 0.044715, %v1540_v33  ;;  %v1518_v12 = vpop.f32.mrb[64].mxu1 }
 0x989   :  { %v1519_v15 = vadd.f32 %v3594_v4, %v1518_v12  ;;  %v4114_v16 = vpop.f32.mrb[65].mxu1 }
 0x98a   :  { %v1557_v18 = vmul.f32 0.7978846, %v1551_v9  ;;  %v1552_v21 = vadd.f32 %v1546_v11, %v1514_v62  ;;  %v1521_v23 = vpop.f32.mrb[66].mxu1 }
 0x98b   :  { %v1535_v24 = vmul.f32 %v1519_v15, %v1519_v15  ;;  %v1522_v27 = vadd.f32 %v3594_v4, %v1521_v23  ;;  %v4115_v29 = vpop.f32.mrb[67].mxu1 }
 0x98c   :  { %4528 = vtanh.f32 %v1557_v18  ;;  %v1558_v13 = vmul.f32 0.7978846, %v1552_v21 }
 0x98d   :  { %v1541_v20 = vmul.f32 %v1535_v24, %v1519_v15  ;;  %v1536_v34 = vmul.f32 %v1522_v27, %v1522_v27 }
 0x98e   :  { %4530 = vtanh.f32 %v1558_v13 }
 0x98f   :  { %v1547_v35 = vmul.f32 0.044715, %v1541_v20  ;;  %v1542_v30 = vmul.f32 %v1536_v34, %v1522_v27 }
 0x990   :  { %v1526_v37 = vpop.f32.mrb[68].mxu1 }
 0x991   :  { %v1553_v57 = vadd.f32 %v1547_v35, %v1519_v15  ;;  %v1548_v40 = vmul.f32 0.044715, %v1542_v30  ;;  %v1527_v39 = vadd.f32 %v3594_v4, %v1526_v37  ;;  %v4118_v41 = vpop.f32.mrb[69].mxu1 }
 0x992   :  { %v1529_v26 = vpop.f32.mrb[70].mxu1 }
 0x993   :  { %v1559_v22 = vmul.f32 0.7978846, %v1553_v57  ;;  %v1554_v36 = vadd.f32 %v1548_v40, %v1522_v27  ;;  %v1537_v45 = vmul.f32 %v1527_v39, %v1527_v39  ;;  %v1530_v46 = vadd.f32 %v3594_v4, %v1529_v26  ;;  %v4119_v50 = vpop.f32.mrb[71].mxu1 }
 0x995   :  { %4532 = vtanh.f32 %v1559_v22  ;;  %v1560_v51 = vmul.f32 0.7978846, %v1554_v36  ;;  %v1543_v53 = vmul.f32 %v1537_v45, %v1527_v39  ;;  %v1538_v17 = vmul.f32 %v1530_v46, %v1530_v46 }
 0x996   :  { %v4529_v19 = vpop.eup %4528 }
 0x997   :  { %v1569_v25 = vadd.f32 1.0, %v4529_v19  ;;  %4534 = vtanh.f32 %v1560_v51  ;;  %v1549_v52 = vmul.f32 0.044715, %v1543_v53  ;;  %v1544_v42 = vmul.f32 %v1538_v17, %v1530_v46 }
 0x998   :  { %v4531_v43 = vpop.eup %4530 }
 0x999   :  { %v1575_v38 = vmul.f32 0.5, %v1569_v25  ;;  %v1570_v48 = vadd.f32 1.0, %v4531_v43  ;;  %v1555_v49 = vadd.f32 %v1549_v52, %v1527_v39  ;;  %v1550_v44 = vmul.f32 0.044715, %v1544_v42 }
 0x99b   :  { %v1576_v2 = vmul.f32 0.5, %v1570_v48  ;;  %v1561_v1 = vmul.f32 0.7978846, %v1555_v49  ;;  %v1556_v5 = vadd.f32 %v1550_v44, %v1530_v46  ;;  %v1581_v0 = vmul.f32 %v1575_v38, %v1511_v56 }
 0x99d   :  { %v1582_v28 = vmul.f32 %v1576_v2, %v1514_v62  ;;  %4536 = vtanh.f32 %v1561_v1  ;;  %v1562_v47 = vmul.f32 0.7978846, %v1556_v5 }
 0x99f   :  { %v4533_v4 = vpop.eup %4532  ;;  %v1587_v55 = vpack.c.bf16 %v1582_v28, %v1581_v0  ;;  %4538 = vtanh.f32 %v1562_v47 }
 0x9a0   :  { %v1571_v58 = vadd.f32 1.0, %v4533_v4 }
 0x9a1   :  { %v4535_v60 = vpop.eup %4534  ;;  %4137 = vmatmul.mubr.bf16.vlgmr.msra.gmra.mrb[60].mxu0 %v1587_v55 }
 0x9a2   :  { %4140 = vmatprep.mubr.msk.bf16.mxu0 %vm4649_vm1, %v4648_v59  ;;  %v1572_v61 = vadd.f32 1.0, %v4535_v60  ;;  %v1577_v63 = vmul.f32 0.5, %v1571_v58 }
 0x9a4   :  { %v1578_v7 = vmul.f32 0.5, %v1572_v61  ;;  %v1583_v3 = vmul.f32 %v1577_v63, %v1519_v15  ;;  %v3600_v15 = vld [vmem:[%s6089_s2 + $0x9] ss:$0 sm:$0xff] }
 0x9a6   :  { %v1584_v8 = vmul.f32 %v1578_v7, %v1522_v27 }
 0x9a7   :  { %v4537_v33 = vpop.eup %4536 }
 0x9a8   :  { %v1588_v9 = vpack.c.bf16 %v1584_v8, %v1583_v3  ;;  %v1573_v56 = vadd.f32 1.0, %v4537_v33 }
 0x9a9   :  { %v4539_v62 = vpop.eup %4538 }
 0x9aa   :  { %4141 = vmatmul.mubr.bf16.gmra.mrb[64].mxu0 %v1588_v9  ;;  %v1574_v11 = vadd.f32 1.0, %v4539_v62  ;;  %v1579_v12 = vmul.f32 0.5, %v1573_v56 }
 0x9ab   :  { %4144 = vmatprep.mubr.msk.bf16.mxu0 %vm4649_vm1, %v4648_v59 }
 0x9ac   :  { %v1580_v16 = vmul.f32 0.5, %v1574_v11  ;;  %v1585_v18 = vmul.f32 %v1579_v12, %v1527_v39 }
 0x9ae   :  { %v1586_v21 = vmul.f32 %v1580_v16, %v1530_v46 }
 0x9b0   :  { %v1589_v23 = vpack.c.bf16 %v1586_v21, %v1585_v18  ;;  %v4418_v21 = vld [vmem:[%s6090_s4 + $0x60] sm:$0xff]  }
 0x9b1   :  { %4149 = vmatpush3.bf16.msra.mxu1 %v4418_v21  ;;  %v4428_v21 = vld [vmem:[%s6090_s4 + $0xb0] sm:$0xff]  }
 0x9b2   :  { %4145 = vmatmul.mubr.bf16.gmra.mrb[68].mxu0 %v1589_v23  ;;  %v4420_v23 = vld [vmem:[%s6090_s4 + $0x80] sm:$0xff]   ;;  %4150 = vmatprep.subr.bf16.mxu1 %v4648_v59 }
 0x9b3   :  { %4184 = vmatprep.mubr.msk.bf16.mxu0 %vm4649_vm1, %v4648_v59  ;;  %4181 = vmatpush3.bf16.msra.mxu0 %v4420_v23  ;;  %v4429_v23 = vld [vmem:[%s6090_s4 + $0xb8] sm:$0xff]  }
 0x9b4   :  { %4182 = vmatprep.subr.bf16.mxu0 %v4648_v59 }
 0xa74   :  { %v1693_v24 = vpop.f32.mrb[60].mxu0 }
 0xa75   :  { %v1694_v27 = vadd.f32 %v3600_v15, %v1693_v24  ;;  %v4138_v29 = vpop.f32.mrb[61].mxu0  ;;  %v4421_v24 = vld [vmem:[%s6090_s4 + $0x88] sm:$0xff]  }
 0xa76   :  { %v1696_v13 = vpop.f32.mrb[62].mxu0  ;;  %4183 = vmatpush3.bf16.msra.mxu0 %v4421_v24 }
 0xa77   :  { %v5395_v20 = vadd.f32 %v1694_v27, %v5271_v6  ;;  %v1697_v34 = vadd.f32 %v3600_v15, %v1696_v13  ;;  %v4139_v35 = vpop.f32.mrb[63].mxu0  ;;  %4212 = vmatprep.subr.bf16.mxu0 %v4648_v59 }
 0xa79   :  { %v5398_v30 = vadd.f32 %v1697_v34, %v5274_v54  ;;  %v1724_v37 = vsel %vm56_vm0, %v5395_v20, 0.0 }
 0xa7a   :  { %1725 = vadd.xlane.f32.xlu0 %v1724_v37 }
 0xa7b   :  { %v1727_v57 = vsel %vm56_vm0, %v5398_v30, 0.0 }
 0xa7c   :  { %1728 = vadd.xlane.f32.xlu1 %v1727_v57 }
 0xa7d   :  { %v1701_v40 = vpop.f32.mrb[64].mxu0 }
 0xa7e   :  { %v1702_v39 = vadd.f32 %v3600_v15, %v1701_v40  ;;  %v4142_v41 = vpop.f32.mrb[65].mxu0 }
 0xa7f   :  { %v1704_v26 = vpop.f32.mrb[66].mxu0 }
 0xa80   :  { %v5405_v6 = vadd.f32 %v1702_v39, %v5281_v10  ;;  %v1705_v22 = vadd.f32 %v3600_v15, %v1704_v26  ;;  %v4143_v36 = vpop.f32.mrb[67].mxu0 }
 0xa82   :  { %v5408_v54 = vadd.f32 %v1705_v22, %v5284_v14  ;;  %v1730_v45 = vsel %vm56_vm0, %v5405_v6, 0.0 }
 0xa83   :  { %1731 = vadd.xlane.f32.xlu0 %v1730_v45  ;;  %v3609_v45 = vld [vmem:[%s6089_s2 + $0xa] ss:$0 sm:$0xff] }
 0xa84   :  { %v1733_v46 = vsel %vm56_vm0, %v5408_v54, 0.0 }
 0xa85   :  { %1734 = vadd.xlane.f32.xlu1 %v1733_v46  ;;  %v1709_v50 = vpop.f32.mrb[68].mxu0 }
 0xa86   :  { %v1710_v51 = vadd.f32 %v3600_v15, %v1709_v50  ;;  %v4146_v53 = vpop.f32.mrb[69].mxu0 }
 0xa87   :  { %v1712_v17 = vpop.f32.mrb[70].mxu0 }
 0xa88   :  { %v5415_v10 = vadd.f32 %v1710_v51, %v5291_v31  ;;  %v1713_v19 = vadd.f32 %v3600_v15, %v1712_v17  ;;  %v4147_v25 = vpop.f32.mrb[71].mxu0  ;;  %v4419_v15 = vld [vmem:[%s6090_s4 + $0x68] sm:$0xff]  }
 0xa89   :  { %4151 = vmatpush3.bf16.msra.mxu1 %v4419_v15  ;;  %v3610_v25 = vld [vmem:[%s6089_s2 + $0xb] ss:$0 sm:$0xff]  ;;  %v3629_v15 = vld [vmem:[%s6091_s5 + $0x120] sm:$0xff] }
 0xa8a   :  { %v5418_v14 = vadd.f32 %v1713_v19, %v5294_v32  ;;  %v1736_v52 = vsel %vm56_vm0, %v5415_v10, 0.0  ;;  %4164 = vmatprep.subr.bf16.mxu1 %v4648_v59 }
 0xa8b   :  { %1737 = vadd.xlane.f32.xlu0 %v1736_v52 }
 0xa8c   :  { %v1739_v42 = vsel %vm56_vm0, %v5418_v14, 0.0 }
 0xa8d   :  { %1740 = vadd.xlane.f32.xlu1 %v1739_v42 }
 0xb07   :  { %v1726_v43 = vpop.xlane.xlu0 %1725 }
 0xb08   :  { %v1742_v38 = vmul.f32 0.03125, %v1726_v43 }
 0xb09   :  { %v1729_v48 = vpop.xlane.xlu1 %1728 }
 0xb0a   :  { %v1748_v49 = vsub.f32 %v5395_v20, %v1742_v38  ;;  %v1743_v31 = vmul.f32 0.03125, %v1729_v48 }
 0xb0c   :  { %v5426_v44 = vsub.f32 %v5398_v30, %v1743_v31  ;;  %v1754_v2 = vmul.f32 %v1748_v49, %v1748_v49 }
 0xb0e   :  { %v1760_v32 = vsel %vm56_vm0, %v1754_v2, 0.0  ;;  %v1755_v1 = vmul.f32 %v5426_v44, %v5426_v44 }
 0xb0f   :  { %1761 = vadd.xlane.f32.xlu0 %v1760_v32 }
 0xb10   :  { %v1732_v5 = vpop.xlane.xlu0 %1731  ;;  %v1763_v0 = vsel %vm56_vm0, %v1755_v1, 0.0 }
 0xb11   :  { %v1744_v28 = vmul.f32 0.03125, %v1732_v5  ;;  %1764 = vadd.xlane.f32.xlu1 %v1763_v0  ;;  %v4424_v5 = vld [vmem:[%s6090_s4 + $0xa0] sm:$0xff]  }
 0xb12   :  { %v1735_v47 = vpop.xlane.xlu1 %1734 }
 0xb13   :  { %v5433_v4 = vsub.f32 %v5405_v6, %v1744_v28  ;;  %v1745_v55 = vmul.f32 0.03125, %v1735_v47 }
 0xb15   :  { %v5436_v58 = vsub.f32 %v5408_v54, %v1745_v55  ;;  %v1756_v60 = vmul.f32 %v5433_v4, %v5433_v4 }
 0xb17   :  { %v1766_v61 = vsel %vm56_vm0, %v1756_v60, 0.0  ;;  %v1757_v63 = vmul.f32 %v5436_v58, %v5436_v58  ;;  %v4425_v60 = vld [vmem:[%s6090_s4 + $0xa8] sm:$0xff]  }
 0xb18   :  { %1767 = vadd.xlane.f32.xlu0 %v1766_v61  ;;  %v1738_v7 = vpop.xlane.xlu0 %1737 }
 0xb19   :  { %v1746_v3 = vmul.f32 0.03125, %v1738_v7  ;;  %v1769_v8 = vsel %vm56_vm0, %v1757_v63, 0.0 }
 0xb1a   :  { %1770 = vadd.xlane.f32.xlu1 %v1769_v8  ;;  %v1741_v33 = vpop.xlane.xlu1 %1740 }
 0xb1b   :  { %v5445_v9 = vsub.f32 %v5415_v10, %v1746_v3  ;;  %v1747_v56 = vmul.f32 0.03125, %v1741_v33 }
 0xb1d   :  { %v5448_v62 = vsub.f32 %v5418_v14, %v1747_v56  ;;  %v1758_v11 = vmul.f32 %v5445_v9, %v5445_v9 }
 0xb1f   :  { %v1772_v12 = vsel %vm56_vm0, %v1758_v11, 0.0  ;;  %v1759_v16 = vmul.f32 %v5448_v62, %v5448_v62 }
 0xb20   :  { %1773 = vadd.xlane.f32.xlu0 %v1772_v12 }
 0xb21   :  { %v1775_v18 = vsel %vm56_vm0, %v1759_v16, 0.0 }
 0xb22   :  { %1776 = vadd.xlane.f32.xlu1 %v1775_v18  ;;  %v4427_v18 = vld [vmem:[%s6090_s4 + $0x98] sm:$0xff]  }
 0xb9c   :  { %v1762_v27 = vpop.xlane.xlu0 %1761 }
 0xb9d   :  { %v1778_v29 = vmul.f32 0.03125, %v1762_v27 }
 0xb9e   :  { %v1765_v13 = vpop.xlane.xlu1 %1764 }
 0xb9f   :  { %v1784_v34 = vadd.f32 1e-05, %v1778_v29  ;;  %v1779_v35 = vmul.f32 0.03125, %v1765_v13  ;;  %v3659_v29 = vld [vmem:[%s6091_s5 + $0x180] sm:$0xff]  ;;  %v3630_v13 = vld [vmem:[%s6091_s5 + $0x128] sm:$0xff] }
 0xba1   :  { %4540 = vrsqrt.f32 %v1784_v34  ;;  %v1785_v37 = vadd.f32 1e-05, %v1779_v35  ;;  %v3660_v34 = vld [vmem:[%s6091_s5 + $0x188] sm:$0xff] }
 0xba3   :  { %4542 = vrsqrt.f32 %v1785_v37 }
 0xba5   :  { %v1768_v57 = vpop.xlane.xlu0 %1767 }
 0xba6   :  { %v1780_v40 = vmul.f32 0.03125, %v1768_v57 }
 0xba7   :  { %v1771_v39 = vpop.xlane.xlu1 %1770 }
 0xba8   :  { %v1786_v41 = vadd.f32 1e-05, %v1780_v40  ;;  %v1781_v26 = vmul.f32 0.03125, %v1771_v39 }
 0xbaa   :  { %4544 = vrsqrt.f32 %v1786_v41  ;;  %v1787_v22 = vadd.f32 1e-05, %v1781_v26 }
 0xbab   :  { %v4541_v36 = vpop.eup %4540 }
 0xbac   :  { %v1796_v46 = vmul.f32 %v4541_v36, %v1748_v49  ;;  %4546 = vrsqrt.f32 %v1787_v22  ;;  %v4422_v49 = vld [vmem:[%s6090_s4 + $0x70] sm:$0xff]  }
 0xbad   :  { %v4543_v50 = vpop.eup %4542  ;;  %v1774_v51 = vpop.xlane.xlu0 %1773 }
 0xbae   :  { %v1806_v53 = vmul.f32 %v3609_v45, %v1796_v46  ;;  %v1797_v17 = vmul.f32 %v4543_v50, %v5426_v44  ;;  %v1782_v19 = vmul.f32 0.03125, %v1774_v51 }
 0xbaf   :  { %v1777_v52 = vpop.xlane.xlu1 %1776 }
 0xbb0   :  { %v1807_v42 = vmul.f32 %v3609_v45, %v1797_v17  ;;  %v1788_v43 = vadd.f32 1e-05, %v1782_v19  ;;  %v1783_v38 = vmul.f32 0.03125, %v1777_v52  ;;  %v1816_v48 = vadd.f32 %v3610_v25, %v1806_v53  ;;  %v3631_v19 = vld [vmem:[%s6091_s5 + $0x130] sm:$0xff] }
 0xbb2   :  { %v1817_v31 = vadd.f32 %v3610_v25, %v1807_v42  ;;  %4548 = vrsqrt.f32 %v1788_v43  ;;  %v1789_v2 = vadd.f32 1e-05, %v1783_v38  ;;  %v3661_v42 = vld [vmem:[%s6091_s5 + $0x190] sm:$0xff]  ;;  %v3632_v43 = vld [vmem:[%s6091_s5 + $0x138] sm:$0xff] }
 0xbb3   :  { %v3662_v38 = vld [vmem:[%s6091_s5 + $0x198] sm:$0xff] }
 0xbb4   :  { %v4545_v32 = vpop.eup %4544  ;;  %4550 = vrsqrt.f32 %v1789_v2  ;;  %v5482_v44 = vpack.c.bf16 %v1817_v31, %v1816_v48 }
 0xbb5   :  { %v1798_v1 = vmul.f32 %v4545_v32, %v5433_v4  ;;  %v4423_v4 = vld [vmem:[%s6090_s4 + $0x78] sm:$0xff]  }
 0xbb6   :  { %v4547_v0 = vpop.eup %4546  ;;  %4153 = vmatmul.mubr.msk.bf16.vlgmr.msra.gmra.mrb[72].mxu1 %vm56_vm0, %v5482_v44  ;;  %4185 = vmatmul.mubr.msk.bf16.vlgmr.msra.gmra.mrb[72].mxu0 %vm56_vm0, %v5482_v44 }
 0xbb7   :  { %v1808_v28 = vmul.f32 %v3609_v45, %v1798_v1  ;;  %v1799_v47 = vmul.f32 %v4547_v0, %v5436_v58  ;;  %4165 = vmatpush3.bf16.msra.mxu1 %v4422_v49  ;;  %4156 = vmatprep.mubr.msk.bf16.mxu1 %vm4649_vm1, %v4648_v59 }
 0xbb8   :  { %4188 = vmatprep.mubr.msk.bf16.mxu0 %vm4649_vm1, %v4648_v59  ;;  %4166 = vmatprep.subr.bf16.mxu1 %v4648_v59 }
 0xbb9   :  { %v1809_v55 = vmul.f32 %v3609_v45, %v1799_v47  ;;  %4213 = vmatpush3.bf16.msra.mxu0 %v4424_v5  ;;  %v1818_v58 = vadd.f32 %v3610_v25, %v1808_v28 }
 0xbba   :  { %4214 = vmatprep.subr.bf16.mxu0 %v4648_v59 }
 0xbbb   :  { %v1819_v61 = vadd.f32 %v3610_v25, %v1809_v55  ;;  %4167 = vmatpush3.bf16.msra.mxu1 %v4423_v4 }
 0xbbc   :  { %v4549_v63 = vpop.eup %4548  ;;  %4196 = vmatprep.subr.bf16.mxu1 %v4648_v59 }
 0xbbd   :  { %v1800_v7 = vmul.f32 %v4549_v63, %v5445_v9  ;;  %v1823_v3 = vpack.c.bf16 %v1819_v61, %v1818_v58  ;;  %4215 = vmatpush3.bf16.msra.mxu0 %v4425_v60  ;;  %v3633_v60 = vld [vmem:[%s6091_s5 + $0x140] sm:$0xff] }
 0xbbe   :  { %v4551_v8 = vpop.eup %4550 }
 0xbbf   :  { %v1810_v33 = vmul.f32 %v3609_v45, %v1800_v7  ;;  %v1801_v56 = vmul.f32 %v4551_v8, %v5448_v62  ;;  %4157 = vmatmul.mubr.msk.bf16.gmra.mrb[76].mxu1 %vm56_vm0, %v1823_v3  ;;  %4189 = vmatmul.mubr.msk.bf16.gmra.mrb[76].mxu0 %vm56_vm0, %v1823_v3  ;;  %v4426_v62 = vld [vmem:[%s6090_s4 + $0x90] sm:$0xff]   ;;  %v3634_v8 = vld [vmem:[%s6091_s5 + $0x148] sm:$0xff] }
 0xbc0   :  { %4160 = vmatprep.mubr.msk.bf16.mxu1 %vm4649_vm1, %v4648_v59  ;;  %4192 = vmatprep.mubr.msk.bf16.mxu0 %vm4649_vm1, %v4648_v59 }
 0xbc1   :  { %v1811_v11 = vmul.f32 %v3609_v45, %v1801_v56  ;;  %v1820_v12 = vadd.f32 %v3610_v25, %v1810_v33  ;;  %v3664_v33 = vld [vmem:[%s6091_s5 + $0x1a8] sm:$0xff] }
 0xbc3   :  { %v1821_v16 = vadd.f32 %v3610_v25, %v1811_v11 }
 0xbc5   :  { %v1824_v9 = vpack.c.bf16 %v1821_v16, %v1820_v12 }
 0xbc7   :  { %4161 = vmatmul.mubr.msk.bf16.gmra.mrb[80].mxu1 %vm56_vm0, %v1824_v9  ;;  %4193 = vmatmul.mubr.msk.bf16.gmra.mrb[80].mxu0 %vm56_vm0, %v1824_v9 }
 0xbc8   :  { %4168 = vmatprep.mubr.msk.bf16.mxu1 %vm4649_vm1, %v4648_v59  ;;  %4216 = vmatprep.mubr.msk.bf16.mxu0 %vm4649_vm1, %v4648_v59 }
 0xbcf   :  { %4169 = vmatmul.mubr.msk.bf16.vlgmr.msra.gmra.mrb[84].mxu1 %vm56_vm0, %v5482_v44  ;;  %4217 = vmatmul.mubr.msk.bf16.vlgmr.msra.gmra.mrb[84].mxu0 %vm56_vm0, %v5482_v44 }
 0xbd0   :  { %4197 = vmatpush3.bf16.msra.mxu1 %v4426_v62  ;;  %4172 = vmatprep.mubr.msk.bf16.mxu1 %vm4649_vm1, %v4648_v59 }
 0xbd1   :  { %4220 = vmatprep.mubr.msk.bf16.mxu0 %vm4649_vm1, %v4648_v59  ;;  %4198 = vmatprep.subr.bf16.mxu1 %v4648_v59 }
 0xbd4   :  { %4199 = vmatpush3.bf16.msra.mxu1 %v4427_v18 }
 0xbd5   :  { %4228 = vmatprep.subr.bf16.mxu1 %v4648_v59 }
 0xbd7   :  { %4173 = vmatmul.mubr.msk.bf16.gmra.mrb[88].mxu1 %vm56_vm0, %v1823_v3  ;;  %4221 = vmatmul.mubr.msk.bf16.gmra.mrb[88].mxu0 %vm56_vm0, %v1823_v3 }
 0xbd8   :  { %4176 = vmatprep.mubr.msk.bf16.mxu1 %vm4649_vm1, %v4648_v59  ;;  %4224 = vmatprep.mubr.msk.bf16.mxu0 %vm4649_vm1, %v4648_v59 }
 0xbdf   :  { %4177 = vmatmul.mubr.msk.bf16.gmra.mrb[92].mxu1 %vm56_vm0, %v1824_v9  ;;  %4225 = vmatmul.mubr.msk.bf16.gmra.mrb[92].mxu0 %vm56_vm0, %v1824_v9 }
 0xbe0   :  { %4200 = vmatprep.mubr.msk.bf16.mxu1 %vm4649_vm1, %v4648_v59 }
 0xbe7   :  { %4201 = vmatmul.mubr.msk.bf16.vlgmr.msra.gmra.mrb[96].mxu1 %vm56_vm0, %v5482_v44 }
 0xbe8   :  { %4204 = vmatprep.mubr.msk.bf16.mxu1 %vm4649_vm1, %v4648_v59  ;;  %4229 = vmatpush3.bf16.msra.mxu1 %v4428_v21 }
 0xbe9   :  { %4230 = vmatprep.subr.bf16.mxu1 %v4648_v59 }
 0xbec   :  { %4231 = vmatpush3.bf16.msra.mxu1 %v4429_v23 }
 0xbef   :  { %4205 = vmatmul.mubr.msk.bf16.gmra.mrb[100].mxu1 %vm56_vm0, %v1823_v3 }
 0xbf0   :  { %4208 = vmatprep.mubr.msk.bf16.mxu1 %vm4649_vm1, %v4648_v59 }
 0xbf7   :  { %4209 = vmatmul.mubr.msk.bf16.gmra.mrb[104].mxu1 %vm56_vm0, %v1824_v9 }
 0xbf8   :  { %4232 = vmatprep.mubr.msk.bf16.mxu1 %vm4649_vm1, %v4648_v59 }
 0xbff   :  { %4233 = vmatmul.mubr.msk.bf16.vlgmr.msra.gmra.mrb[108].mxu1 %vm56_vm0, %v5482_v44 }
 0xc00   :  { %4236 = vmatprep.mubr.msk.bf16.mxu1 %vm4649_vm1, %v4648_v59 }
 0xc07   :  { %4237 = vmatmul.mubr.msk.bf16.gmra.mrb[112].mxu1 %vm56_vm0, %v1823_v3  ;;  %v3663_v3 = vld [vmem:[%s6091_s5 + $0x1a0] sm:$0xff] }
 0xc08   :  { %4240 = vmatprep.mubr.msk.bf16.mxu1 %vm4649_vm1, %v4648_v59 }
 0xc0f   :  { %4241 = vmatmul.mubr.msk.bf16.gmra.mrb[116].mxu1 %vm56_vm0, %v1824_v9 }
 0xc89   :  { %v1885_v24 = vpop.f32.mrb[72].mxu1  ;;  %v2070_v27 = vpop.f32.mrb[72].mxu0 }
 0xc8a   :  { %v1995_v35 = vadd.f32 %v3629_v15, %v1885_v24  ;;  %v4154_v37 = vpop.f32.mrb[73].mxu1  ;;  %v4186_v57 = vpop.f32.mrb[73].mxu0  ;;  %v2180_v41 = vadd.f32 %v3659_v29, %v2070_v27 }
 0xc8b   :  { %v1888_v40 = vpop.f32.mrb[74].mxu1  ;;  %v2073_v39 = vpop.f32.mrb[74].mxu0 }
 0xc8c   :  { %v1996_v26 = vadd.f32 %v3630_v13, %v1888_v40  ;;  %v2181_v22 = vadd.f32 %v3660_v34, %v2073_v39  ;;  %v4155_v36 = vpop.f32.mrb[75].mxu1  ;;  %v4187_v45 = vpop.f32.mrb[75].mxu0  ;;  %v2007_v46 = vmul.f32 0.25, %v1995_v35  ;;  %v3635_v13 = vld [vmem:[%s6091_s5 + $0x150] sm:$0xff]  ;;  %v3689_v40 = vld [vmem:[%s6091_s5 + $0x1e0] sm:$0xff]  ;;  %v3636_v39 = vld [vmem:[%s6091_s5 + $0x158] sm:$0xff] }
 0xc8e   :  { %v2008_v50 = vmul.f32 0.25, %v1996_v26  ;;  %v2377_v51 = vpack.c.bf16 %v2181_v22, %v2180_v41  ;;  %v3690_v41 = vld [vmem:[%s6091_s5 + $0x1e8] sm:$0xff] }
 0xc90   :  { %v2371_v53 = vpack.c.bf16 %v2008_v50, %v2007_v46  ;;  %4386 = vmatprep.subr.msk.bf16.mxu0 %vm815_vm2, %v2377_v51  ;;  %v2402_v17 = vsel %vm815_vm2, %v2377_v51, 0 }
 0xc91   :  { %4245 = vmatpush3.bf16.xpose.msra.mxu0 %v2402_v17 }
 0xc92   :  { %v1893_v25 = vpop.f32.mrb[76].mxu1  ;;  %v2078_v52 = vpop.f32.mrb[76].mxu0  ;;  %4256 = vmatprep.mubr.msk.bf16.mxu0 %vm815_vm2, %v2371_v53 }
 0xc93   :  { %v1997_v48 = vadd.f32 %v3631_v19, %v1893_v25  ;;  %v4158_v31 = vpop.f32.mrb[77].mxu1  ;;  %v4190_v2 = vpop.f32.mrb[77].mxu0  ;;  %v2182_v44 = vadd.f32 %v3661_v42, %v2078_v52 }
 0xc94   :  { %v1896_v49 = vpop.f32.mrb[78].mxu1  ;;  %v2081_v32 = vpop.f32.mrb[78].mxu0  ;;  %v3691_v2 = vld [vmem:[%s6091_s5 + $0x1f0] sm:$0xff] }
 0xc95   :  { %v1998_v1 = vadd.f32 %v3632_v43, %v1896_v49  ;;  %v2183_v5 = vadd.f32 %v3662_v38, %v2081_v32  ;;  %v4159_v0 = vpop.f32.mrb[79].mxu1  ;;  %v4191_v28 = vpop.f32.mrb[79].mxu0  ;;  %v5598_v47 = vmul.f32 0.25, %v1997_v48  ;;  %v3637_v43 = vld [vmem:[%s6091_s5 + $0x160] sm:$0xff]  ;;  %v3638_v49 = vld [vmem:[%s6091_s5 + $0x168] sm:$0xff]  ;;  %v3692_v32 = vld [vmem:[%s6091_s5 + $0x1f8] sm:$0xff] }
 0xc97   :  { %v5600_v4 = vmul.f32 0.25, %v1998_v1  ;;  %v2378_v55 = vpack.c.bf16 %v2183_v5, %v2182_v44 }
 0xc99   :  { %v2372_v58 = vpack.c.bf16 %v5600_v4, %v5598_v47  ;;  %4387 = vmatprep.subr.msk.bf16.mxu0 %vm815_vm2, %v2378_v55  ;;  %v2405_v61 = vsel %vm815_vm2, %v2378_v55, 0 }
 0xc9a   :  { %v1901_v63 = vpop.f32.mrb[80].mxu1  ;;  %v2086_v7 = vpop.f32.mrb[80].mxu0  ;;  %4247 = vmatpush3.bf16.xpose.msra.mxu0 %v2405_v61 }
 0xc9b   :  { %v1999_v56 = vadd.f32 %v3633_v60, %v1901_v63  ;;  %v4162_v11 = vpop.f32.mrb[81].mxu1  ;;  %v4194_v12 = vpop.f32.mrb[81].mxu0  ;;  %v2184_v62 = vadd.f32 %v3663_v3, %v2086_v7 }
 0xc9c   :  { %v1904_v16 = vpop.f32.mrb[82].mxu1  ;;  %v2089_v9 = vpop.f32.mrb[82].mxu0 }
 0xc9d   :  { %v2000_v18 = vadd.f32 %v3634_v8, %v1904_v16  ;;  %v2185_v21 = vadd.f32 %v3664_v33, %v2089_v9  ;;  %v4163_v23 = vpop.f32.mrb[83].mxu1  ;;  %v4195_v15 = vpop.f32.mrb[83].mxu0  ;;  %v5618_v24 = vmul.f32 0.25, %v1999_v56  ;;  %v3639_v56 = vld [vmem:[%s6091_s5 + $0x170] sm:$0xff]  ;;  %v3693_v9 = vld [vmem:[%s6091_s5 + $0x200] sm:$0xff] }
 0xc9f   :  { %v5620_v27 = vmul.f32 0.25, %v2000_v18  ;;  %v2379_v29 = vpack.c.bf16 %v2185_v21, %v2184_v62  ;;  %v3640_v62 = vld [vmem:[%s6091_s5 + $0x178] sm:$0xff]  ;;  %v3694_v18 = vld [vmem:[%s6091_s5 + $0x208] sm:$0xff] }
 0xca1   :  { %v2373_v34 = vpack.c.bf16 %v5620_v27, %v5618_v24  ;;  %4388 = vmatprep.subr.msk.bf16.mxu0 %vm815_vm2, %v2379_v29  ;;  %v2408_v35 = vsel %vm815_vm2, %v2379_v29, 0  ;;  %v3699_v27 = vld [vmem:[%s6091_s5 + $0x230] sm:$0xff] }
 0xca2   :  { %v1959_v37 = vpop.f32.mrb[84].mxu1  ;;  %v2243_v57 = vpop.f32.mrb[84].mxu0  ;;  %4249 = vmatpush3.bf16.xpose.msra.mxu0 %v2408_v35 }
 0xca3   :  { %v2001_v26 = vadd.f32 %v3635_v13, %v1959_v37  ;;  %v4170_v22 = vpop.f32.mrb[85].mxu1  ;;  %v4218_v36 = vpop.f32.mrb[85].mxu0  ;;  %v2353_v50 = vadd.f32 %v3689_v40, %v2243_v57 }
 0xca4   :  { %v1962_v45 = vpop.f32.mrb[86].mxu1  ;;  %v2246_v46 = vpop.f32.mrb[86].mxu0 }
 0xca5   :  { %v2002_v51 = vadd.f32 %v3636_v39, %v1962_v45  ;;  %v2354_v53 = vadd.f32 %v3690_v41, %v2246_v46  ;;  %v4171_v17 = vpop.f32.mrb[87].mxu1  ;;  %v4219_v19 = vpop.f32.mrb[87].mxu0  ;;  %v5638_v25 = vmul.f32 0.25, %v2001_v26  ;;  %v3665_v46 = vld [vmem:[%s6091_s5 + $0x1b0] sm:$0xff] }
 0xca7   :  { %v5640_v52 = vmul.f32 0.25, %v2002_v51  ;;  %v2365_v42 = vpack.c.bf16 %v2354_v53, %v2353_v50  ;;  %v3666_v50 = vld [vmem:[%s6091_s5 + $0x1b8] sm:$0xff] }
 0xca9   :  { %v2374_v38 = vpack.c.bf16 %v5640_v52, %v5638_v25  ;;  %4268 = vmatprep.subr.bf16.mxu1 %v2365_v42 }
 0xcaa   :  { %v1967_v48 = vpop.f32.mrb[88].mxu1  ;;  %v2251_v31 = vpop.f32.mrb[88].mxu0  ;;  %4269 = vmatpush3.bf16.msra.mxu1 %v2365_v42 }
 0xcab   :  { %v2003_v44 = vadd.f32 %v3637_v43, %v1967_v48  ;;  %v4174_v1 = vpop.f32.mrb[89].mxu1  ;;  %v4222_v5 = vpop.f32.mrb[89].mxu0  ;;  %v2355_v55 = vadd.f32 %v3691_v2, %v2251_v31  ;;  %v3667_v2 = vld [vmem:[%s6091_s5 + $0x1c0] sm:$0xff] }
 0xcac   :  { %v1970_v0 = vpop.f32.mrb[90].mxu1  ;;  %v2254_v28 = vpop.f32.mrb[90].mxu0 }
 0xcad   :  { %v2004_v60 = vadd.f32 %v3638_v49, %v1970_v0  ;;  %v2356_v61 = vadd.f32 %v3692_v32, %v2254_v28  ;;  %v4175_v63 = vpop.f32.mrb[91].mxu1  ;;  %v4223_v7 = vpop.f32.mrb[91].mxu0  ;;  %v5656_v3 = vmul.f32 0.25, %v2003_v44  ;;  %v3668_v49 = vld [vmem:[%s6091_s5 + $0x1c8] sm:$0xff] }
 0xcae   :  { %v3670_v63 = vld [vmem:[%s6091_s5 + $0x1d8] sm:$0xff] }
 0xcaf   :  { %v5658_v8 = vmul.f32 0.25, %v2004_v60  ;;  %v2366_v33 = vpack.c.bf16 %v2356_v61, %v2355_v55  ;;  %v3669_v61 = vld [vmem:[%s6091_s5 + $0x1d0] sm:$0xff] }
 0xcb1   :  { %v2375_v11 = vpack.c.bf16 %v5658_v8, %v5656_v3  ;;  %4270 = vmatprep.subr.bf16.mxu1 %v2366_v33 }
 0xcb2   :  { %v1975_v12 = vpop.f32.mrb[92].mxu1  ;;  %v2259_v16 = vpop.f32.mrb[92].mxu0  ;;  %4271 = vmatpush3.bf16.msra.mxu1 %v2366_v33 }
 0xcb3   :  { %v2005_v21 = vadd.f32 %v3639_v56, %v1975_v12  ;;  %v4178_v23 = vpop.f32.mrb[93].mxu1  ;;  %v4226_v15 = vpop.f32.mrb[93].mxu0  ;;  %v2357_v35 = vadd.f32 %v3693_v9, %v2259_v16 }
 0xcb4   :  { %v1978_v29 = vpop.f32.mrb[94].mxu1  ;;  %v2262_v13 = vpop.f32.mrb[94].mxu0  ;;  %v3696_v23 = vld [vmem:[%s6091_s5 + $0x218] sm:$0xff] }
 0xcb5   :  { %v2006_v37 = vadd.f32 %v3640_v62, %v1978_v29  ;;  %v2358_v57 = vadd.f32 %v3694_v18, %v2262_v13  ;;  %v4179_v40 = vpop.f32.mrb[95].mxu1  ;;  %v4227_v39 = vpop.f32.mrb[95].mxu0  ;;  %v5674_v41 = vmul.f32 0.25, %v2005_v21  ;;  %v3695_v21 = vld [vmem:[%s6091_s5 + $0x210] sm:$0xff] }
 0xcb6   :  { %v3697_v39 = vld [vmem:[%s6091_s5 + $0x220] sm:$0xff] }
 0xcb7   :  { %v5676_v26 = vmul.f32 0.25, %v2006_v37  ;;  %v2367_v22 = vpack.c.bf16 %v2358_v57, %v2357_v35 }
 0xcb9   :  { %v2376_v36 = vpack.c.bf16 %v5676_v26, %v5674_v41  ;;  %4272 = vmatprep.subr.bf16.mxu1 %v2367_v22  ;;  %v4637_v41 = vld [vmem:[%s6092_s1 + $0x10] sm:$0xff] }
 0xcba   :  { %v2144_v45 = vpop.f32.mrb[96].mxu1  ;;  %4273 = vmatpush3.bf16.msra.mxu1 %v2367_v22  ;;  %v3698_v22 = vld [vmem:[%s6091_s5 + $0x228] sm:$0xff] }
 0xcbb   :  { %v4202_v51 = vpop.f32.mrb[97].mxu1  ;;  %v2186_v17 = vadd.f32 %v3665_v46, %v2144_v45 }
 0xcbc   :  { %v2147_v53 = vpop.f32.mrb[98].mxu1 }
 0xcbd   :  { %v2187_v19 = vadd.f32 %v3666_v50, %v2147_v53  ;;  %v4203_v42 = vpop.f32.mrb[99].mxu1 }
 0xcbf   :  { %v2380_v43 = vpack.c.bf16 %v2187_v19, %v2186_v17 }
 0xcc1   :  { %4389 = vmatprep.subr.msk.bf16.mxu0 %vm815_vm2, %v2380_v43  ;;  %v2411_v48 = vsel %vm815_vm2, %v2380_v43, 0 }
 0xcc2   :  { %v2152_v31 = vpop.f32.mrb[100].mxu1  ;;  %4251 = vmatpush3.bf16.xpose.msra.mxu0 %v2411_v48 }
 0xcc3   :  { %v4206_v32 = vpop.f32.mrb[101].mxu1  ;;  %v2188_v1 = vadd.f32 %v3667_v2, %v2152_v31  ;;  %v4639_v2 = vld [vmem:[%s6092_s1 + $0x18] sm:$0xff] }
 0xcc4   :  { %v2155_v44 = vpop.f32.mrb[102].mxu1 }
 0xcc5   :  { %v2189_v5 = vadd.f32 %v3668_v49, %v2155_v44  ;;  %v4207_v0 = vpop.f32.mrb[103].mxu1 }
 0xcc6   :  { %v4640_v0 = vld [vmem:[%s6092_s1 + $0x20] sm:$0xff] }
 0xcc7   :  { %v2381_v28 = vpack.c.bf16 %v2189_v5, %v2188_v1 }
 0xcc9   :  { %4390 = vmatprep.subr.msk.bf16.mxu0 %vm815_vm2, %v2381_v28  ;;  %v2414_v55 = vsel %vm815_vm2, %v2381_v28, 0 }
 0xcca   :  { %v2160_v60 = vpop.f32.mrb[104].mxu1  ;;  %4253 = vmatpush3.bf16.xpose.msra.mxu0 %v2414_v55 }
 0xccb   :  { %v4210_v7 = vpop.f32.mrb[105].mxu1  ;;  %v2190_v56 = vadd.f32 %v3669_v61, %v2160_v60 }
 0xccc   :  { %v2163_v33 = vpop.f32.mrb[106].mxu1 }
 0xccd   :  { %v2191_v12 = vadd.f32 %v3670_v63, %v2163_v33  ;;  %v4211_v16 = vpop.f32.mrb[107].mxu1  ;;  %v4641_v63 = vld [vmem:[%s6092_s1 + $0x30] sm:$0xff]  ;;  %v4642_v33 = vld [vmem:[%s6092_s1 + $0x28] sm:$0xff] }
 0xcce   :  { %v4643_v16 = vld [vmem:[%s6092_s1 + $0x38] sm:$0xff] }
 0xccf   :  { %v2382_v9 = vpack.c.bf16 %v2191_v12, %v2190_v56 }
 0xcd1   :  { %4391 = vmatprep.subr.msk.bf16.mxu0 %vm815_vm2, %v2382_v9  ;;  %v2417_v62 = vsel %vm815_vm2, %v2382_v9, 0 }
 0xcd2   :  { %v2317_v18 = vpop.f32.mrb[108].mxu1  ;;  %4255 = vmatpush3.bf16.xpose.msra.mxu0 %v2417_v62 }
 0xcd3   :  { %v4234_v15 = vpop.f32.mrb[109].mxu1  ;;  %4306 = vmatprep.subr.bf16.mxu0 %v4648_v59  ;;  %v2359_v13 = vadd.f32 %v3695_v21, %v2317_v18 }
 0xcd4   :  { %v2320_v29 = vpop.f32.mrb[110].mxu1  ;;  %v4644_v15 = vld [vmem:[%s6092_s1 + $0x40] sm:$0xff] }
 0xcd5   :  { %v2360_v35 = vadd.f32 %v3696_v23, %v2320_v29  ;;  %v4235_v37 = vpop.f32.mrb[111].mxu1 }
 0xcd7   :  { %v2368_v57 = vpack.c.bf16 %v2360_v35, %v2359_v13 }
 0xcd9   :  { %4257 = vmatmul.mubr.msk.bf16.vlgmr.msra.gmra.mrb[96].mxu0 %vm815_vm2, %v2372_v58  ;;  %4274 = vmatprep.subr.bf16.mxu1 %v2368_v57 }
 0xcda   :  { %v2325_v40 = vpop.f32.mrb[112].mxu1  ;;  %4260 = vmatprep.mubr.msk.bf16.mxu0 %vm815_vm2, %v2373_v34  ;;  %4275 = vmatpush3.bf16.msra.mxu1 %v2368_v57  ;;  %v3700_v34 = vld [vmem:[%s6091_s5 + $0x238] sm:$0xff]  ;;  %v4645_v57 = vld [vmem:[%s6092_s1 + $0x50] sm:$0xff] }
 0xcdb   :  { %v4238_v45 = vpop.f32.mrb[113].mxu1  ;;  %v2361_v4 = vadd.f32 %v3697_v39, %v2325_v40  ;;  %v4646_v39 = vld [vmem:[%s6092_s1 + $0x48] sm:$0xff] }
 0xcdc   :  { %v2328_v47 = vpop.f32.mrb[114].mxu1 }
 0xcdd   :  { %v2362_v58 = vadd.f32 %v3698_v22, %v2328_v47  ;;  %v4239_v46 = vpop.f32.mrb[115].mxu1  ;;  %v4647_v47 = vld [vmem:[%s6092_s1 + $0x58] sm:$0xff] }
 0xcdf   :  { %v2369_v50 = vpack.c.bf16 %v2362_v58, %v2361_v4 }
 0xce1   :  { %4261 = vmatmul.mubr.msk.bf16.gmra.mrb[100].mxu0 %vm815_vm2, %v2374_v38  ;;  %4276 = vmatprep.subr.bf16.mxu1 %v2369_v50 }
 0xce2   :  { %v2333_v24 = vpop.f32.mrb[116].mxu1  ;;  %4264 = vmatprep.mubr.msk.bf16.mxu0 %vm815_vm2, %v2375_v11  ;;  %4277 = vmatpush3.bf16.msra.mxu1 %v2369_v50  ;;  %v4636_v11 = vld [vmem:[%s6092_s1] sm:$0xff] }
 0xce3   :  { %v4242_v51 = vpop.f32.mrb[117].mxu1  ;;  %v2363_v52 = vadd.f32 %v3699_v27, %v2333_v24 }
 0xce4   :  { %v2336_v25 = vpop.f32.mrb[118].mxu1 }
 0xce5   :  { %v2364_v38 = vadd.f32 %v3700_v34, %v2336_v25  ;;  %v4243_v53 = vpop.f32.mrb[119].mxu1 }
 0xce7   :  { %v2370_v17 = vpack.c.bf16 %v2364_v38, %v2363_v52 }
 0xce9   :  { %4265 = vmatmul.mubr.msk.bf16.gmra.mrb[104].mxu0 %vm815_vm2, %v2376_v36  ;;  %4278 = vmatprep.subr.bf16.mxu1 %v2370_v17  ;;  %v4638_v36 = vld [vmem:[%s6092_s1 + $0x8] sm:$0xff] }
 0xcea   :  { %4279 = vmatpush3.bf16.msra.mxu1 %v2370_v17  ;;  %4308 = vmatprep.mubr.msk.bf16.mxu0 %vm4649_vm1, %v4648_v59 }
 0xceb   :  { %4292 = vmatprep.subr.bf16.mxu1 %v4648_v59 }
 0xdac   :  { %v4258_v3 = vpop.f32.mrb[96].mxu0 }
 0xdad   :  { %v2453_v8 = vpop.f32.mrb[97].mxu0  ;;  %v5752_v26 = vadd.f32 %v4637_v41, %v4258_v3 }
 0xdae   :  { %v2454_v19 = vadd.f32 %v4636_v11, %v2453_v8  ;;  %v4259_v42 = vpop.f32.mrb[98].mxu0 }
 0xdaf   :  { %v2456_v43 = vpop.f32.mrb[99].mxu0  ;;  %v2465_v49 = vadd.f32 %v4639_v2, %v4259_v42  ;;  %v2506_v1 = vsel %vm933_vm3, %v5752_v26, -inf }
 0xdb0   :  { %v2457_v48 = vadd.f32 %v4638_v36, %v2456_v43  ;;  %v2500_v31 = vsel %vm933_vm3, %v2454_v19, -inf }
 0xdb1   :  { %2501 = vmax.xlane.f32.xlu0 %v2500_v31  ;;  %v2509_v60 = vsel %vm933_vm3, %v2465_v49, -inf }
 0xdb2   :  { %v2503_v32 = vsel %vm933_vm3, %v2457_v48, -inf }
 0xdb3   :  { %2504 = vmax.xlane.f32.xlu1 %v2503_v32 }
 0xdb4   :  { %v4262_v44 = vpop.f32.mrb[100].mxu0 }
 0xdb5   :  { %v2469_v5 = vpop.f32.mrb[101].mxu0  ;;  %2507 = vmax.xlane.f32.xlu0 %v2506_v1  ;;  %v2478_v7 = vadd.f32 %v4641_v63, %v4262_v44 }
 0xdb6   :  { %v2470_v28 = vadd.f32 %v4640_v0, %v2469_v5  ;;  %v4263_v55 = vpop.f32.mrb[102].mxu0 }
 0xdb7   :  { %v2472_v61 = vpop.f32.mrb[103].mxu0  ;;  %2510 = vmax.xlane.f32.xlu1 %v2509_v60  ;;  %v2481_v9 = vadd.f32 %v4643_v16, %v4263_v55  ;;  %v2518_v21 = vsel %vm933_vm3, %v2478_v7, -inf }
 0xdb8   :  { %v2473_v56 = vadd.f32 %v4642_v33, %v2472_v61  ;;  %v2512_v12 = vsel %vm933_vm3, %v2470_v28, -inf }
 0xdb9   :  { %2513 = vmax.xlane.f32.xlu0 %v2512_v12  ;;  %v2521_v35 = vsel %vm933_vm3, %v2481_v9, -inf }
 0xdba   :  { %v2515_v62 = vsel %vm933_vm3, %v2473_v56, -inf }
 0xdbb   :  { %2516 = vmax.xlane.f32.xlu1 %v2515_v62 }
 0xdbc   :  { %v4266_v18 = vpop.f32.mrb[104].mxu0 }
 0xdbd   :  { %v2485_v23 = vpop.f32.mrb[105].mxu0  ;;  %2519 = vmax.xlane.f32.xlu0 %v2518_v21  ;;  %v5787_v40 = vadd.f32 %v4645_v57, %v4266_v18 }
 0xdbe   :  { %v2486_v29 = vadd.f32 %v4644_v15, %v2485_v23  ;;  %v4267_v13 = vpop.f32.mrb[106].mxu0 }
 0xdbf   :  { %v2488_v37 = vpop.f32.mrb[107].mxu0  ;;  %2522 = vmax.xlane.f32.xlu1 %v2521_v35  ;;  %v5796_v4 = vadd.f32 %v4647_v47, %v4267_v13  ;;  %v2530_v46 = vsel %vm933_vm3, %v5787_v40, -inf }
 0xdc0   :  { %v2489_v22 = vadd.f32 %v4646_v39, %v2488_v37  ;;  %v2524_v45 = vsel %vm933_vm3, %v2486_v29, -inf }
 0xdc1   :  { %2525 = vmax.xlane.f32.xlu0 %v2524_v45  ;;  %v2533_v50 = vsel %vm933_vm3, %v5796_v4, -inf }
 0xdc2   :  { %v2527_v58 = vsel %vm933_vm3, %v2489_v22, -inf }
 0xdc3   :  { %2528 = vmax.xlane.f32.xlu1 %v2527_v58 }
 0xdc5   :  { %2531 = vmax.xlane.f32.xlu0 %v2530_v46 }
 0xdc7   :  { %2534 = vmax.xlane.f32.xlu1 %v2533_v50 }
 0xe3e   :  { %v2502_v24 = vpop.xlane.xlu0 %2501 }
 0xe3f   :  { %v2536_v27 = vsub.f32 %v2454_v19, %v2502_v24 }
 0xe40   :  { %v2505_v34 = vpop.xlane.xlu1 %2504 }
 0xe41   :  { %v2548_v51 = vmul.f32 1.442695, %v2536_v27  ;;  %v2537_v25 = vsub.f32 %v2457_v48, %v2505_v34 }
 0xe42   :  { %v2508_v52 = vpop.xlane.xlu0 %2507 }
 0xe43   :  { %4552 = vpow2.f32 %v2548_v51  ;;  %v2550_v38 = vmul.f32 1.442695, %v2537_v25  ;;  %v2538_v53 = vsub.f32 %v5752_v26, %v2508_v52  ;;  %v4431_v51 = vld [vmem:[%s6093_s6 + $0x10] sm:$0xff]  }
 0xe44   :  { %v2511_v17 = vpop.xlane.xlu1 %2510  ;;  %4307 = vmatpush3.bf16.msra.mxu0 %v4431_v51 }
 0xe45   :  { %4554 = vpow2.f32 %v2550_v38  ;;  %v2552_v3 = vmul.f32 1.442695, %v2538_v53  ;;  %v2539_v8 = vsub.f32 %v2465_v49, %v2511_v17  ;;  %4336 = vmatprep.subr.bf16.mxu0 %v4648_v59 }
 0xe46   :  { %v2514_v11 = vpop.xlane.xlu0 %2513 }
 0xe47   :  { %4556 = vpow2.f32 %v2552_v3  ;;  %v2554_v42 = vmul.f32 1.442695, %v2539_v8  ;;  %v2540_v43 = vsub.f32 %v2470_v28, %v2514_v11 }
 0xe48   :  { %v2517_v41 = vpop.xlane.xlu1 %2516 }
 0xe49   :  { %4558 = vpow2.f32 %v2554_v42  ;;  %v2556_v36 = vmul.f32 1.442695, %v2540_v43  ;;  %v2541_v19 = vsub.f32 %v2473_v56, %v2517_v41 }
 0xe4a   :  { %v2520_v31 = vpop.xlane.xlu0 %2519 }
 0xe4b   :  { %4560 = vpow2.f32 %v2556_v36  ;;  %v2558_v48 = vmul.f32 1.442695, %v2541_v19  ;;  %v2542_v2 = vsub.f32 %v2478_v7, %v2520_v31 }
 0xe4c   :  { %v2523_v32 = vpop.xlane.xlu1 %2522 }
 0xe4d   :  { %v5804_v44 = vpop.eup %4552  ;;  %4562 = vpow2.f32 %v2558_v48  ;;  %v2560_v26 = vmul.f32 1.442695, %v2542_v2  ;;  %v2543_v1 = vsub.f32 %v2481_v9, %v2523_v32 }
 0xe4e   :  { %v2526_v5 = vpop.xlane.xlu0 %2525  ;;  %v2572_v49 = vsel %vm933_vm3, %v5804_v44, 0.0 }
 0xe4f   :  { %v5808_v0 = vpop.eup %4554  ;;  %4564 = vpow2.f32 %v2560_v26  ;;  %v2562_v28 = vmul.f32 1.442695, %v2543_v1  ;;  %v2544_v55 = vsub.f32 %v2486_v29, %v2526_v5  ;;  %2573 = vadd.xlane.f32.xlu0 %v2572_v49 }
 0xe50   :  { %v2529_v60 = vpop.xlane.xlu1 %2528  ;;  %v2575_v61 = vsel %vm933_vm3, %v5808_v0, 0.0 }
 0xe51   :  { %v5812_v63 = vpop.eup %4556  ;;  %4566 = vpow2.f32 %v2562_v28  ;;  %v2564_v7 = vmul.f32 1.442695, %v2544_v55  ;;  %v2545_v33 = vsub.f32 %v2489_v22, %v2529_v60  ;;  %2576 = vadd.xlane.f32.xlu1 %v2575_v61 }
 0xe52   :  { %v2532_v56 = vpop.xlane.xlu0 %2531  ;;  %v2578_v12 = vsel %vm933_vm3, %v5812_v63, 0.0 }
 0xe53   :  { %v5816_v16 = vpop.eup %4558  ;;  %4568 = vpow2.f32 %v2564_v7  ;;  %v2566_v9 = vmul.f32 1.442695, %v2545_v33  ;;  %v2546_v62 = vsub.f32 %v5787_v40, %v2532_v56  ;;  %2579 = vadd.xlane.f32.xlu0 %v2578_v12 }
 0xe54   :  { %v2535_v18 = vpop.xlane.xlu1 %2534  ;;  %v2581_v21 = vsel %vm933_vm3, %v5816_v16, 0.0 }
 0xe55   :  { %v5821_v23 = vpop.eup %4560  ;;  %4570 = vpow2.f32 %v2566_v9  ;;  %v2568_v15 = vmul.f32 1.442695, %v2546_v62  ;;  %v2547_v29 = vsub.f32 %v5796_v4, %v2535_v18  ;;  %2582 = vadd.xlane.f32.xlu1 %v2581_v21 }
 0xe56   :  { %v2584_v13 = vsel %vm933_vm3, %v5821_v23, 0.0 }
 0xe57   :  { %v5826_v35 = vpop.eup %4562  ;;  %4572 = vpow2.f32 %v2568_v15  ;;  %v2570_v37 = vmul.f32 1.442695, %v2547_v29  ;;  %2585 = vadd.xlane.f32.xlu0 %v2584_v13 }
 0xe58   :  { %v2587_v57 = vsel %vm933_vm3, %v5826_v35, 0.0 }
 0xe59   :  { %v5830_v40 = vpop.eup %4564  ;;  %4574 = vpow2.f32 %v2570_v37  ;;  %2588 = vadd.xlane.f32.xlu1 %v2587_v57 }
 0xe5a   :  { %v2590_v39 = vsel %vm933_vm3, %v5830_v40, 0.0 }
 0xe5b   :  { %v5834_v22 = vpop.eup %4566  ;;  %2591 = vadd.xlane.f32.xlu0 %v2590_v39 }
 0xe5c   :  { %v2593_v45 = vsel %vm933_vm3, %v5834_v22, 0.0 }
 0xe5d   :  { %v5838_v47 = vpop.eup %4568  ;;  %2594 = vadd.xlane.f32.xlu1 %v2593_v45 }
 0xe5e   :  { %v2596_v4 = vsel %vm933_vm3, %v5838_v47, 0.0 }
 0xe5f   :  { %v5842_v58 = vpop.eup %4570  ;;  %2597 = vadd.xlane.f32.xlu0 %v2596_v4 }
 0xe60   :  { %v2599_v46 = vsel %vm933_vm3, %v5842_v58, 0.0 }
 0xe61   :  { %v5846_v50 = vpop.eup %4572  ;;  %2600 = vadd.xlane.f32.xlu1 %v2599_v46 }
 0xe62   :  { %v2602_v24 = vsel %vm933_vm3, %v5846_v50, 0.0 }
 0xe63   :  { %v5850_v27 = vpop.eup %4574  ;;  %2603 = vadd.xlane.f32.xlu0 %v2602_v24 }
 0xe64   :  { %v2605_v34 = vsel %vm933_vm3, %v5850_v27, 0.0 }
 0xe65   :  { %2606 = vadd.xlane.f32.xlu1 %v2605_v34 }
 0xedc   :  { %v2574_v25 = vpop.xlane.xlu0 %2573 }
 0xedd   :  { %4576 = vrcp.f32 %v2574_v25 }
 0xede   :  { %v2577_v52 = vpop.xlane.xlu1 %2576 }
 0xedf   :  { %4578 = vrcp.f32 %v2577_v52 }
 0xee0   :  { %v2580_v38 = vpop.xlane.xlu0 %2579 }
 0xee1   :  { %4580 = vrcp.f32 %v2580_v38 }
 0xee2   :  { %v2583_v53 = vpop.xlane.xlu1 %2582 }
 0xee3   :  { %4582 = vrcp.f32 %v2583_v53 }
 0xee4   :  { %v2586_v17 = vpop.xlane.xlu0 %2585 }
 0xee5   :  { %4584 = vrcp.f32 %v2586_v17 }
 0xee6   :  { %v2589_v3 = vpop.xlane.xlu1 %2588 }
 0xee7   :  { %v4577_v8 = vpop.eup %4576  ;;  %4586 = vrcp.f32 %v2589_v3 }
 0xee8   :  { %v2592_v11 = vpop.xlane.xlu0 %2591  ;;  %v2620_v41 = vmul.f32 %v4577_v8, %v5804_v44  ;;  %v4430_v44 = vld [vmem:[%s6093_s6 + $0x18] sm:$0xff]  }
 0xee9   :  { %v4579_v42 = vpop.eup %4578  ;;  %4588 = vrcp.f32 %v2592_v11 }
 0xeea   :  { %v2595_v43 = vpop.xlane.xlu1 %2594  ;;  %v2621_v36 = vmul.f32 %v4579_v42, %v5808_v0 }
 0xeeb   :  { %v4581_v19 = vpop.eup %4580  ;;  %4590 = vrcp.f32 %v2595_v43  ;;  %v3725_v43 = vld [vmem:[%s6089_s2 + $0xe] ss:$0 sm:$0xff] }
 0xeec   :  { %v2598_v31 = vpop.xlane.xlu0 %2597  ;;  %v2632_v48 = vpack.c.bf16 %v2621_v36, %v2620_v41  ;;  %v2622_v32 = vmul.f32 %v4581_v19, %v5812_v63 }
 0xeed   :  { %v4583_v2 = vpop.eup %4582  ;;  %4592 = vrcp.f32 %v2598_v31 }
 0xeee   :  { %v2623_v26 = vmul.f32 %v4583_v2, %v5816_v16  ;;  %v2601_v1 = vpop.xlane.xlu1 %2600  ;;  %4280 = vmatprep.mubr.msk.bf16.mxu1 %vm933_vm3, %v2632_v48 }
 0xeef   :  { %v4585_v5 = vpop.eup %4584  ;;  %4594 = vrcp.f32 %v2601_v1 }
 0xef0   :  { %v2633_v49 = vpack.c.bf16 %v2623_v26, %v2622_v32  ;;  %v2604_v0 = vpop.xlane.xlu0 %2603  ;;  %v2624_v60 = vmul.f32 %v4585_v5, %v5821_v23 }
 0xef1   :  { %v4587_v28 = vpop.eup %4586  ;;  %4596 = vrcp.f32 %v2604_v0 }
 0xef2   :  { %v2607_v55 = vpop.xlane.xlu1 %2606  ;;  %4281 = vmatmul.mubr.msk.bf16.vlgmr.msra.gmra.mrb[120].mxu1 %vm933_vm3, %v2633_v49  ;;  %v2625_v61 = vmul.f32 %v4587_v28, %v5826_v35 }
 0xef3   :  { %v4589_v63 = vpop.eup %4588  ;;  %4598 = vrcp.f32 %v2607_v55  ;;  %4293 = vmatpush3.bf16.msra.mxu1 %v4430_v44 }
 0xef4   :  { %v2634_v7 = vpack.c.bf16 %v2625_v61, %v2624_v60  ;;  %4320 = vmatprep.subr.bf16.mxu1 %v4648_v59  ;;  %v2626_v56 = vmul.f32 %v4589_v63, %v5830_v40 }
 0xef5   :  { %v4591_v33 = vpop.eup %4590 }
 0xef6   :  { %4284 = vmatprep.mubr.msk.bf16.mxu1 %vm933_vm3, %v2634_v7  ;;  %v2627_v12 = vmul.f32 %v4591_v33, %v5834_v22 }
 0xef7   :  { %v4593_v16 = vpop.eup %4592 }
 0xef8   :  { %v2635_v9 = vpack.c.bf16 %v2627_v12, %v2626_v56  ;;  %v2628_v18 = vmul.f32 %v4593_v16, %v5838_v47 }
 0xef9   :  { %v4595_v62 = vpop.eup %4594 }
 0xefa   :  { %4285 = vmatmul.mubr.msk.bf16.gmra.mrb[124].mxu1 %vm933_vm3, %v2635_v9  ;;  %v2629_v21 = vmul.f32 %v4595_v62, %v5842_v58 }
 0xefb   :  { %v4597_v23 = vpop.eup %4596 }
 0xefc   :  { %v2636_v15 = vpack.c.bf16 %v2629_v21, %v2628_v18  ;;  %v2630_v13 = vmul.f32 %v4597_v23, %v5846_v50 }
 0xefd   :  { %v4599_v29 = vpop.eup %4598 }
 0xefe   :  { %4288 = vmatprep.mubr.msk.bf16.mxu1 %vm933_vm3, %v2636_v15  ;;  %v2631_v35 = vmul.f32 %v4599_v29, %v5850_v27 }
 0xf00   :  { %v2637_v37 = vpack.c.bf16 %v2631_v35, %v2630_v13 }
 0xf02   :  { %4289 = vmatmul.mubr.msk.bf16.gmra.mrb[128].mxu1 %vm933_vm3, %v2637_v37 }
 0xf03   :  { %4294 = vmatprep.mubr.msk.bf16.mxu1 %vm4649_vm1, %v4648_v59 }
 0xfc5   :  { %v4282_v57 = vpop.f32.mrb[120].mxu1 }
 0xfc6   :  { %v2690_v40 = vpop.f32.mrb[121].mxu1 }
 0xfc7   :  { %v4283_v39 = vpop.f32.mrb[122].mxu1 }
 0xfc8   :  { %v2738_v22 = vpack.c.bf16 %v4283_v39, %v4282_v57  ;;  %v2693_v45 = vpop.f32.mrb[123].mxu1 }
 0xfc9   :  { %v2737_v47 = vpack.c.bf16 %v2693_v45, %v2690_v40 }
 0xfcb   :  { %4309 = vmatmul.mubr.msk.bf16.vlgmr.msra.gmra.mrb[108].mxu0 %vm815_vm2, %v2737_v47 }
 0xfcc   :  { %4312 = vmatprep.mubr.msk.bf16.mxu0 %vm4649_vm1, %v4648_v59 }
 0xfcd   :  { %v4286_v4 = vpop.f32.mrb[124].mxu1 }
 0xfce   :  { %v2706_v58 = vpop.f32.mrb[125].mxu1 }
 0xfcf   :  { %v4287_v46 = vpop.f32.mrb[126].mxu1 }
 0xfd0   :  { %v2740_v50 = vpack.c.bf16 %v4287_v46, %v4286_v4  ;;  %v2709_v24 = vpop.f32.mrb[127].mxu1 }
 0xfd1   :  { %v2739_v27 = vpack.c.bf16 %v2709_v24, %v2706_v58 }
 0xfd2   :  { %4295 = vmatmul.mubr.msk.bf16.vlgmr.msra.gmra.mrb[132].mxu1 %vm815_vm2, %v2740_v50 }
 0xfd3   :  { %4313 = vmatmul.mubr.msk.bf16.gmra.mrb[112].mxu0 %vm815_vm2, %v2738_v22  ;;  %4298 = vmatprep.mubr.msk.bf16.mxu1 %vm4649_vm1, %v4648_v59 }
 0xfd4   :  { %4316 = vmatprep.mubr.msk.bf16.mxu0 %vm4649_vm1, %v4648_v59 }
 0xfd5   :  { %v4290_v34 = vpop.f32.mrb[128].mxu1 }
 0xfd6   :  { %v2722_v51 = vpop.f32.mrb[129].mxu1 }
 0xfd7   :  { %v4291_v25 = vpop.f32.mrb[130].mxu1 }
 0xfd8   :  { %v2742_v52 = vpack.c.bf16 %v4291_v25, %v4290_v34  ;;  %v2725_v38 = vpop.f32.mrb[131].mxu1 }
 0xfd9   :  { %v2741_v53 = vpack.c.bf16 %v2725_v38, %v2722_v51 }
 0xfdb   :  { %4299 = vmatmul.mubr.msk.bf16.gmra.mrb[136].mxu1 %vm815_vm2, %v2741_v53  ;;  %4317 = vmatmul.mubr.msk.bf16.gmra.mrb[116].mxu0 %vm815_vm2, %v2739_v27 }
 0xfdc   :  { %4302 = vmatprep.mubr.msk.bf16.mxu1 %vm4649_vm1, %v4648_v59  ;;  %4352 = vmatprep.mubr.msk.bf16.mxu0 %vm4649_vm1, %v4648_v59 }
 0xfe3   :  { %4303 = vmatmul.mubr.msk.bf16.gmra.mrb[140].mxu1 %vm815_vm2, %v2742_v52 }
 0xfe4   :  { %4324 = vmatprep.mubr.msk.bf16.mxu1 %vm4649_vm1, %v4648_v59 }
0x109e   :  { %v2870_v17 = vpop.f32.mrb[108].mxu0 }
0x109f   :  { %v4310_v3 = vpop.f32.mrb[109].mxu0 }
0x10a0   :  { %v2873_v8 = vpop.f32.mrb[110].mxu0 }
0x10a1   :  { %v4311_v11 = vpop.f32.mrb[111].mxu0 }
0x10a5   :  { %v2798_v42 = vpop.f32.mrb[132].mxu1 }
0x10a6   :  { %v2871_v41 = vadd.f32 %v2870_v17, %v2798_v42  ;;  %v4296_v36 = vpop.f32.mrb[133].mxu1  ;;  %v2878_v19 = vpop.f32.mrb[112].mxu0 }
0x10a7   :  { %v2801_v31 = vpop.f32.mrb[134].mxu1  ;;  %v4314_v48 = vpop.f32.mrb[113].mxu0 }
0x10a8   :  { %v2898_v2 = vadd.f32 %v3725_v43, %v2871_v41  ;;  %v2874_v32 = vadd.f32 %v2873_v8, %v2801_v31  ;;  %v4297_v26 = vpop.f32.mrb[135].mxu1  ;;  %v2881_v1 = vpop.f32.mrb[114].mxu0 }
0x10a9   :  { %v4315_v5 = vpop.f32.mrb[115].mxu0 }
0x10aa   :  { %v5904_v44 = vadd.f32 %v2898_v2, %v5395_v20  ;;  %v2899_v49 = vadd.f32 %v3725_v43, %v2874_v32 }
0x10ac   :  { %v5907_v0 = vadd.f32 %v2899_v49, %v5398_v30  ;;  %v2912_v28 = vsel %vm56_vm0, %v5904_v44, 0.0  ;;  %v4432_v49 = vld [vmem:[%s6094_s7 + $0x10] sm:$0xff]  }
0x10ad   :  { %2913 = vadd.xlane.f32.xlu0 %v2912_v28  ;;  %4321 = vmatpush3.bf16.msra.mxu1 %v4432_v49  ;;  %v4433_v28 = vld [vmem:[%s6094_s7 + $0x18] sm:$0xff]   ;;  %v3732_v49 = vld [vmem:[%s6096_s3 + $0x1] ss:$0 sm:$0xff] }
0x10ae   :  { %v2806_v55 = vpop.f32.mrb[136].mxu1  ;;  %v2886_v60 = vpop.f32.mrb[116].mxu0  ;;  %v2915_v61 = vsel %vm56_vm0, %v5907_v0, 0.0  ;;  %4322 = vmatprep.subr.bf16.mxu1 %v4648_v59 }
0x10af   :  { %v2879_v63 = vadd.f32 %v2878_v19, %v2806_v55  ;;  %v4318_v7 = vpop.f32.mrb[117].mxu0  ;;  %2916 = vadd.xlane.f32.xlu1 %v2915_v61  ;;  %v4300_v33 = vpop.f32.mrb[137].mxu1 }
0x10b0   :  { %v2809_v56 = vpop.f32.mrb[138].mxu1  ;;  %v2889_v20 = vpop.f32.mrb[118].mxu0 }
0x10b1   :  { %v2900_v12 = vadd.f32 %v3725_v43, %v2879_v63  ;;  %v2882_v16 = vadd.f32 %v2881_v1, %v2809_v56  ;;  %v4301_v9 = vpop.f32.mrb[139].mxu1  ;;  %v4319_v30 = vpop.f32.mrb[119].mxu0  ;;  %4323 = vmatpush3.bf16.msra.mxu1 %v4433_v28 }
0x10b2   :  { %4364 = vmatprep.subr.bf16.mxu1 %v4648_v59 }
0x10b3   :  { %v5914_v62 = vadd.f32 %v2900_v12, %v5405_v6  ;;  %v2901_v18 = vadd.f32 %v3725_v43, %v2882_v16 }
0x10b5   :  { %v5917_v21 = vadd.f32 %v2901_v18, %v5408_v54  ;;  %v2918_v23 = vsel %vm56_vm0, %v5914_v62, 0.0 }
0x10b6   :  { %2919 = vadd.xlane.f32.xlu0 %v2918_v23  ;;  %v2814_v15 = vpop.f32.mrb[140].mxu1  ;;  %v3726_v23 = vld [vmem:[%s6089_s2 + $0xc] ss:$0 sm:$0xff] }
0x10b7   :  { %v2887_v29 = vadd.f32 %v2886_v60, %v2814_v15  ;;  %v4304_v13 = vpop.f32.mrb[141].mxu1  ;;  %v2921_v35 = vsel %vm56_vm0, %v5917_v21, 0.0 }
0x10b8   :  { %2922 = vadd.xlane.f32.xlu1 %v2921_v35  ;;  %v2817_v37 = vpop.f32.mrb[142].mxu1 }
0x10b9   :  { %v2902_v57 = vadd.f32 %v3725_v43, %v2887_v29  ;;  %v2890_v40 = vadd.f32 %v2889_v20, %v2817_v37  ;;  %v4305_v6 = vpop.f32.mrb[143].mxu1 }
0x10bb   :  { %v5924_v39 = vadd.f32 %v2902_v57, %v5415_v10  ;;  %v2903_v54 = vadd.f32 %v3725_v43, %v2890_v40  ;;  %v3727_v40 = vld [vmem:[%s6089_s2 + $0xd] ss:$0 sm:$0xff] }
0x10bd   :  { %v5927_v22 = vadd.f32 %v2903_v54, %v5418_v14  ;;  %v2924_v45 = vsel %vm56_vm0, %v5924_v39, 0.0 }
0x10be   :  { %2925 = vadd.xlane.f32.xlu0 %v2924_v45 }
0x10bf   :  { %v2927_v47 = vsel %vm56_vm0, %v5927_v22, 0.0 }
0x10c0   :  { %2928 = vadd.xlane.f32.xlu1 %v2927_v47 }
0x113a   :  { %v2914_v4 = vpop.xlane.xlu0 %2913 }
0x113b   :  { %v2930_v58 = vmul.f32 0.03125, %v2914_v4 }
0x113c   :  { %v2917_v46 = vpop.xlane.xlu1 %2916 }
0x113d   :  { %v2936_v50 = vsub.f32 %v5904_v44, %v2930_v58  ;;  %v2931_v24 = vmul.f32 0.03125, %v2917_v46 }
0x113f   :  { %v2937_v10 = vsub.f32 %v5907_v0, %v2931_v24  ;;  %v2942_v27 = vmul.f32 %v2936_v50, %v2936_v50 }
0x1141   :  { %v2948_v14 = vsel %vm56_vm0, %v2942_v27, 0.0  ;;  %v2943_v34 = vmul.f32 %v2937_v10, %v2937_v10 }
0x1142   :  { %2949 = vadd.xlane.f32.xlu0 %v2948_v14 }
0x1143   :  { %v2920_v51 = vpop.xlane.xlu0 %2919  ;;  %v2951_v25 = vsel %vm56_vm0, %v2943_v34, 0.0 }
0x1144   :  { %v2932_v52 = vmul.f32 0.03125, %v2920_v51  ;;  %2952 = vadd.xlane.f32.xlu1 %v2951_v25 }
0x1145   :  { %v2923_v38 = vpop.xlane.xlu1 %2922 }
0x1146   :  { %v5938_v53 = vsub.f32 %v5914_v62, %v2932_v52  ;;  %v2933_v17 = vmul.f32 0.03125, %v2923_v38 }
0x1148   :  { %v5941_v3 = vsub.f32 %v5917_v21, %v2933_v17  ;;  %v2944_v8 = vmul.f32 %v5938_v53, %v5938_v53 }
0x114a   :  { %v2954_v11 = vsel %vm56_vm0, %v2944_v8, 0.0  ;;  %v2945_v42 = vmul.f32 %v5941_v3, %v5941_v3 }
0x114b   :  { %2955 = vadd.xlane.f32.xlu0 %v2954_v11  ;;  %v2926_v43 = vpop.xlane.xlu0 %2925 }
0x114c   :  { %v2934_v41 = vmul.f32 0.03125, %v2926_v43  ;;  %v2957_v36 = vsel %vm56_vm0, %v2945_v42, 0.0 }
0x114d   :  { %2958 = vadd.xlane.f32.xlu1 %v2957_v36  ;;  %v2929_v19 = vpop.xlane.xlu1 %2928 }
0x114e   :  { %v2940_v31 = vsub.f32 %v5924_v39, %v2934_v41  ;;  %v2935_v48 = vmul.f32 0.03125, %v2929_v19  ;;  %v4434_v19 = vld [vmem:[%s6095_s8 + $0x40] sm:$0xff]  }
0x114f   :  { %4337 = vmatpush3.bf16.msra.mxu0 %v4434_v19 }
0x1150   :  { %v2941_v2 = vsub.f32 %v5927_v22, %v2935_v48  ;;  %v2946_v32 = vmul.f32 %v2940_v31, %v2940_v31  ;;  %4338 = vmatprep.subr.bf16.mxu0 %v4648_v59  ;;  %v4436_v48 = vld [vmem:[%s6095_s8 + $0x50] sm:$0xff]  }
0x1152   :  { %v2960_v26 = vsel %vm56_vm0, %v2946_v32, 0.0  ;;  %v2947_v1 = vmul.f32 %v2941_v2, %v2941_v2  ;;  %v4438_v32 = vld [vmem:[%s6095_s8 + $0x60] sm:$0xff]  }
0x1153   :  { %2961 = vadd.xlane.f32.xlu0 %v2960_v26  ;;  %v4439_v26 = vld [vmem:[%s6095_s8 + $0x68] sm:$0xff]  }
0x1154   :  { %v2963_v5 = vsel %vm56_vm0, %v2947_v1, 0.0  ;;  %v4440_v1 = vld [vmem:[%s6095_s8 + $0x70] sm:$0xff]  }
0x1155   :  { %2964 = vadd.xlane.f32.xlu1 %v2963_v5  ;;  %v4441_v5 = vld [vmem:[%s6095_s8 + $0x78] sm:$0xff]  }
0x11cf   :  { %v2950_v55 = vpop.xlane.xlu0 %2949 }
0x11d0   :  { %v2966_v60 = vmul.f32 0.03125, %v2950_v55 }
0x11d1   :  { %v2953_v61 = vpop.xlane.xlu1 %2952 }
0x11d2   :  { %v2972_v63 = vadd.f32 1e-05, %v2966_v60  ;;  %v2967_v7 = vmul.f32 0.03125, %v2953_v61 }
0x11d4   :  { %4600 = vrsqrt.f32 %v2972_v63  ;;  %v2973_v33 = vadd.f32 1e-05, %v2967_v7 }
0x11d6   :  { %4602 = vrsqrt.f32 %v2973_v33 }
0x11d8   :  { %v2956_v56 = vpop.xlane.xlu0 %2955 }
0x11d9   :  { %v2968_v20 = vmul.f32 0.03125, %v2956_v56 }
0x11da   :  { %v2959_v12 = vpop.xlane.xlu1 %2958 }
0x11db   :  { %v2974_v16 = vadd.f32 1e-05, %v2968_v20  ;;  %v2969_v9 = vmul.f32 0.03125, %v2959_v12 }
0x11dd   :  { %4604 = vrsqrt.f32 %v2974_v16  ;;  %v2975_v30 = vadd.f32 1e-05, %v2969_v9 }
0x11de   :  { %v4601_v18 = vpop.eup %4600 }
0x11df   :  { %v2984_v15 = vmul.f32 %v4601_v18, %v2936_v50  ;;  %4606 = vrsqrt.f32 %v2975_v30 }
0x11e0   :  { %v4603_v29 = vpop.eup %4602  ;;  %v2962_v13 = vpop.xlane.xlu0 %2961 }
0x11e1   :  { %v2994_v35 = vmul.f32 %v3726_v23, %v2984_v15  ;;  %v2985_v37 = vmul.f32 %v4603_v29, %v2937_v10  ;;  %v2970_v57 = vmul.f32 0.03125, %v2962_v13 }
0x11e2   :  { %v2965_v6 = vpop.xlane.xlu1 %2964 }
0x11e3   :  { %v2995_v54 = vmul.f32 %v3726_v23, %v2985_v37  ;;  %v2976_v45 = vadd.f32 1e-05, %v2970_v57  ;;  %v2971_v47 = vmul.f32 0.03125, %v2965_v6  ;;  %v3004_v4 = vadd.f32 %v3727_v40, %v2994_v35 }
0x11e5   :  { %v3005_v58 = vadd.f32 %v3727_v40, %v2995_v54  ;;  %4608 = vrsqrt.f32 %v2976_v45  ;;  %v2977_v46 = vadd.f32 1e-05, %v2971_v47 }
0x11e7   :  { %v4605_v24 = vpop.eup %4604  ;;  %4610 = vrsqrt.f32 %v2977_v46  ;;  %v3010_v50 = vpack.c.bf16 %v3005_v58, %v3004_v4 }
0x11e8   :  { %v2986_v27 = vmul.f32 %v4605_v24, %v5938_v53 }
0x11e9   :  { %v4607_v14 = vpop.eup %4606  ;;  %4325 = vmatmul.mubr.msk.bf16.vlgmr.msra.gmra.mrb[144].mxu1 %vm56_vm0, %v3010_v50 }
0x11ea   :  { %v2987_v10 = vmul.f32 %v4607_v14, %v5941_v3  ;;  %4328 = vmatprep.mubr.msk.bf16.mxu1 %vm4649_vm1, %v4648_v59  ;;  %v2996_v34 = vmul.f32 %v3726_v23, %v2986_v27 }
0x11ec   :  { %v2997_v51 = vmul.f32 %v3726_v23, %v2987_v10  ;;  %v3006_v25 = vadd.f32 %v3727_v40, %v2996_v34 }
0x11ee   :  { %v3007_v52 = vadd.f32 %v3727_v40, %v2997_v51 }
0x11ef   :  { %v4609_v38 = vpop.eup %4608 }
0x11f0   :  { %v2988_v17 = vmul.f32 %v4609_v38, %v2940_v31  ;;  %v3011_v8 = vpack.c.bf16 %v3007_v52, %v3006_v25  ;;  %v4435_v31 = vld [vmem:[%s6095_s8 + $0x48] sm:$0xff]  }
0x11f1   :  { %v4611_v11 = vpop.eup %4610  ;;  %4339 = vmatpush3.bf16.msra.mxu0 %v4435_v31 }
0x11f2   :  { %v2989_v42 = vmul.f32 %v4611_v11, %v2941_v2  ;;  %4329 = vmatmul.mubr.msk.bf16.gmra.mrb[148].mxu1 %vm56_vm0, %v3011_v8  ;;  %v2998_v53 = vmul.f32 %v3726_v23, %v2988_v17  ;;  %4340 = vmatprep.subr.bf16.mxu0 %v4648_v59  ;;  %v4437_v2 = vld [vmem:[%s6095_s8 + $0x58] sm:$0xff]  }
0x11f3   :  { %4332 = vmatprep.mubr.msk.bf16.mxu1 %vm4649_vm1, %v4648_v59 }
0x11f4   :  { %v2999_v43 = vmul.f32 %v3726_v23, %v2989_v42  ;;  %v3008_v3 = vadd.f32 %v3727_v40, %v2998_v53 }
0x11f5   :  { %4341 = vmatpush3.bf16.msra.mxu0 %v4436_v48 }
0x11f6   :  { %v3009_v41 = vadd.f32 %v3727_v40, %v2999_v43  ;;  %4342 = vmatprep.subr.bf16.mxu0 %v4648_v59 }
0x11f8   :  { %v3012_v36 = vpack.c.bf16 %v3009_v41, %v3008_v3 }
0x11f9   :  { %4343 = vmatpush3.bf16.msra.mxu0 %v4437_v2 }
0x11fa   :  { %4333 = vmatmul.mubr.msk.bf16.gmra.mrb[152].mxu1 %vm56_vm0, %v3012_v36  ;;  %4344 = vmatprep.subr.bf16.mxu0 %v4648_v59 }
0x11fb   :  { %4368 = vmatprep.mubr.msk.bf16.mxu1 %vm4649_vm1, %v4648_v59 }
0x11fd   :  { %4345 = vmatpush3.bf16.msra.mxu0 %v4438_v32 }
0x11fe   :  { %4346 = vmatprep.subr.bf16.mxu0 %v4648_v59 }
0x1201   :  { %4347 = vmatpush3.bf16.msra.mxu0 %v4439_v26 }
0x1202   :  { %4348 = vmatprep.subr.bf16.mxu0 %v4648_v59 }
0x1205   :  { %4349 = vmatpush3.bf16.msra.mxu0 %v4440_v1 }
0x1206   :  { %4350 = vmatprep.subr.bf16.mxu0 %v4648_v59 }
0x1209   :  { %4351 = vmatpush3.bf16.msra.mxu0 %v4441_v5 }
0x12bc   :  { %v3078_v28 = vpop.f32.mrb[144].mxu1 }
0x12bd   :  { %v3079_v55 = vadd.f32 %v3732_v49, %v3078_v28  ;;  %v4326_v60 = vpop.f32.mrb[145].mxu1 }
0x12be   :  { %v3081_v61 = vpop.f32.mrb[146].mxu1 }
0x12bf   :  { %v3101_v63 = vmul.f32 %v3079_v55, %v3079_v55  ;;  %v3082_v7 = vadd.f32 %v3732_v49, %v3081_v61  ;;  %v4327_v33 = vpop.f32.mrb[147].mxu1 }
0x12c1   :  { %v3107_v56 = vmul.f32 %v3101_v63, %v3079_v55  ;;  %v3102_v20 = vmul.f32 %v3082_v7, %v3082_v7 }
0x12c3   :  { %v3113_v12 = vmul.f32 0.044715, %v3107_v56  ;;  %v3108_v16 = vmul.f32 %v3102_v20, %v3082_v7 }
0x12c5   :  { %v3119_v9 = vadd.f32 %v3113_v12, %v3079_v55  ;;  %v3114_v30 = vmul.f32 0.044715, %v3108_v16  ;;  %v3086_v18 = vpop.f32.mrb[148].mxu1 }
0x12c6   :  { %v3087_v23 = vadd.f32 %v3732_v49, %v3086_v18  ;;  %v4330_v15 = vpop.f32.mrb[149].mxu1 }
0x12c7   :  { %v3125_v29 = vmul.f32 0.7978846, %v3119_v9  ;;  %v3120_v13 = vadd.f32 %v3114_v30, %v3082_v7  ;;  %v3089_v35 = vpop.f32.mrb[150].mxu1 }
0x12c8   :  { %v3103_v37 = vmul.f32 %v3087_v23, %v3087_v23  ;;  %v3090_v57 = vadd.f32 %v3732_v49, %v3089_v35  ;;  %v4331_v40 = vpop.f32.mrb[151].mxu1 }
0x12c9   :  { %4612 = vtanh.f32 %v3125_v29  ;;  %v3126_v6 = vmul.f32 0.7978846, %v3120_v13 }
0x12ca   :  { %v3109_v54 = vmul.f32 %v3103_v37, %v3087_v23  ;;  %v3104_v45 = vmul.f32 %v3090_v57, %v3090_v57 }
0x12cb   :  { %4614 = vtanh.f32 %v3126_v6 }
0x12cc   :  { %v3115_v47 = vmul.f32 0.044715, %v3109_v54  ;;  %v3110_v4 = vmul.f32 %v3104_v45, %v3090_v57 }
0x12cd   :  { %v3094_v58 = vpop.f32.mrb[152].mxu1 }
0x12ce   :  { %v3121_v46 = vadd.f32 %v3115_v47, %v3087_v23  ;;  %v3116_v24 = vmul.f32 0.044715, %v3110_v4  ;;  %v3095_v50 = vadd.f32 %v3732_v49, %v3094_v58  ;;  %v4334_v27 = vpop.f32.mrb[153].mxu1 }
0x12cf   :  { %v3097_v14 = vpop.f32.mrb[154].mxu1 }
0x12d0   :  { %v3127_v10 = vmul.f32 0.7978846, %v3121_v46  ;;  %v3122_v34 = vadd.f32 %v3116_v24, %v3090_v57  ;;  %v3105_v51 = vmul.f32 %v3095_v50, %v3095_v50  ;;  %v3098_v25 = vadd.f32 %v3732_v49, %v3097_v14  ;;  %v4335_v52 = vpop.f32.mrb[155].mxu1 }
0x12d2   :  { %4616 = vtanh.f32 %v3127_v10  ;;  %v3128_v38 = vmul.f32 0.7978846, %v3122_v34  ;;  %v3111_v17 = vmul.f32 %v3105_v51, %v3095_v50  ;;  %v3106_v8 = vmul.f32 %v3098_v25, %v3098_v25 }
0x12d3   :  { %v4613_v11 = vpop.eup %4612 }
0x12d4   :  { %v3137_v42 = vadd.f32 1.0, %v4613_v11  ;;  %4618 = vtanh.f32 %v3128_v38  ;;  %v3117_v53 = vmul.f32 0.044715, %v3111_v17  ;;  %v3112_v43 = vmul.f32 %v3106_v8, %v3098_v25 }
0x12d5   :  { %v4615_v3 = vpop.eup %4614 }
0x12d6   :  { %v3143_v41 = vmul.f32 0.5, %v3137_v42  ;;  %v3138_v36 = vadd.f32 1.0, %v4615_v3  ;;  %v3123_v19 = vadd.f32 %v3117_v53, %v3095_v50  ;;  %v3118_v31 = vmul.f32 0.044715, %v3112_v43 }
0x12d8   :  { %v3144_v48 = vmul.f32 0.5, %v3138_v36  ;;  %v3129_v2 = vmul.f32 0.7978846, %v3123_v19  ;;  %v3124_v32 = vadd.f32 %v3118_v31, %v3098_v25  ;;  %v3149_v26 = vmul.f32 %v3143_v41, %v3079_v55 }
0x12da   :  { %v3150_v1 = vmul.f32 %v3144_v48, %v3082_v7  ;;  %4620 = vtanh.f32 %v3129_v2  ;;  %v3130_v5 = vmul.f32 0.7978846, %v3124_v32 }
0x12dc   :  { %v4617_v49 = vpop.eup %4616  ;;  %v3155_v28 = vpack.c.bf16 %v3150_v1, %v3149_v26  ;;  %4622 = vtanh.f32 %v3130_v5 }
0x12dd   :  { %v3139_v60 = vadd.f32 1.0, %v4617_v49 }
0x12de   :  { %v4619_v61 = vpop.eup %4618  ;;  %4353 = vmatmul.mubr.bf16.vlgmr.msra.gmra.mrb[120].mxu0 %v3155_v28 }
0x12df   :  { %4356 = vmatprep.mubr.msk.bf16.mxu0 %vm4649_vm1, %v4648_v59  ;;  %v3140_v63 = vadd.f32 1.0, %v4619_v61  ;;  %v3145_v33 = vmul.f32 0.5, %v3139_v60 }
0x12e1   :  { %v3146_v56 = vmul.f32 0.5, %v3140_v63  ;;  %v3151_v20 = vmul.f32 %v3145_v33, %v3087_v23  ;;  %v3754_v23 = vld [vmem:[%s6089_s2 + $0xf] ss:$0 sm:$0xff] }
0x12e3   :  { %v3152_v12 = vmul.f32 %v3146_v56, %v3090_v57 }
0x12e4   :  { %v4621_v16 = vpop.eup %4620 }
0x12e5   :  { %v3156_v9 = vpack.c.bf16 %v3152_v12, %v3151_v20  ;;  %v3141_v55 = vadd.f32 1.0, %v4621_v16 }
0x12e6   :  { %v4623_v7 = vpop.eup %4622 }
0x12e7   :  { %4357 = vmatmul.mubr.bf16.gmra.mrb[124].mxu0 %v3156_v9  ;;  %v3142_v30 = vadd.f32 1.0, %v4623_v7  ;;  %v3147_v18 = vmul.f32 0.5, %v3141_v55 }
0x12e8   :  { %4360 = vmatprep.mubr.msk.bf16.mxu0 %vm4649_vm1, %v4648_v59 }
0x12e9   :  { %v3148_v15 = vmul.f32 0.5, %v3142_v30  ;;  %v3153_v29 = vmul.f32 %v3147_v18, %v3095_v50 }
0x12eb   :  { %v3154_v13 = vmul.f32 %v3148_v15, %v3098_v25 }
0x12ed   :  { %v3157_v35 = vpack.c.bf16 %v3154_v13, %v3153_v29  ;;  %v4442_v13 = vld [vmem:[%s6097_s9] sm:$0xff]  }
0x12ee   :  { %4365 = vmatpush3.bf16.msra.mxu1 %v4442_v13 }
0x12ef   :  { %4361 = vmatmul.mubr.bf16.gmra.mrb[128].mxu0 %v3157_v35  ;;  %4366 = vmatprep.subr.bf16.mxu1 %v4648_v59  ;;  %v4443_v35 = vld [vmem:[%s6097_s9 + $0x8] sm:$0xff]  }
0x12f2   :  { %4367 = vmatpush3.bf16.msra.mxu1 %v4443_v35 }
0x13b1   :  { %v3262_v37 = vpop.f32.mrb[120].mxu0 }
0x13b2   :  { %v3263_v57 = vadd.f32 %v3754_v23, %v3262_v37  ;;  %v4354_v40 = vpop.f32.mrb[121].mxu0 }
0x13b3   :  { %v3265_v6 = vpop.f32.mrb[122].mxu0 }
0x13b4   :  { %v3285_v54 = vadd.f32 %v3263_v57, %v5904_v44  ;;  %v3266_v45 = vadd.f32 %v3754_v23, %v3265_v6  ;;  %v4355_v47 = vpop.f32.mrb[123].mxu0 }
0x13b6   :  { %v3286_v4 = vadd.f32 %v3266_v45, %v5907_v0  ;;  %v3293_v58 = vsel %vm56_vm0, %v3285_v54, 0.0 }
0x13b7   :  { %3294 = vadd.xlane.f32.xlu0 %v3293_v58 }
0x13b8   :  { %v3296_v46 = vsel %vm56_vm0, %v3286_v4, 0.0 }
0x13b9   :  { %3297 = vadd.xlane.f32.xlu1 %v3296_v46 }
0x13ba   :  { %v3270_v24 = vpop.f32.mrb[124].mxu0 }
0x13bb   :  { %v3271_v50 = vadd.f32 %v3754_v23, %v3270_v24  ;;  %v4358_v27 = vpop.f32.mrb[125].mxu0 }
0x13bc   :  { %v3273_v14 = vpop.f32.mrb[126].mxu0  ;;  %v3763_v27 = vld [vmem:[%s6089_s2 + $0x2] ss:$0 sm:$0xff] }
0x13bd   :  { %v3287_v10 = vadd.f32 %v3271_v50, %v5914_v62  ;;  %v3274_v34 = vadd.f32 %v3754_v23, %v3273_v14  ;;  %v4359_v51 = vpop.f32.mrb[127].mxu0 }
0x13bf   :  { %v3288_v44 = vadd.f32 %v3274_v34, %v5917_v21  ;;  %v3299_v25 = vsel %vm56_vm0, %v3287_v10, 0.0 }
0x13c0   :  { %3300 = vadd.xlane.f32.xlu0 %v3299_v25 }
0x13c1   :  { %v3302_v0 = vsel %vm56_vm0, %v3288_v44, 0.0 }
0x13c2   :  { %3303 = vadd.xlane.f32.xlu1 %v3302_v0  ;;  %v3278_v52 = vpop.f32.mrb[128].mxu0  ;;  %v3764_v0 = vld [vmem:[%s6089_s2 + $0x3] ss:$0 sm:$0xff] }
0x13c3   :  { %v3279_v38 = vadd.f32 %v3754_v23, %v3278_v52  ;;  %v4362_v17 = vpop.f32.mrb[129].mxu0 }
0x13c4   :  { %v3281_v8 = vpop.f32.mrb[130].mxu0 }
0x13c5   :  { %v3289_v11 = vadd.f32 %v3279_v38, %v5924_v39  ;;  %v3282_v42 = vadd.f32 %v3754_v23, %v3281_v8  ;;  %v4363_v53 = vpop.f32.mrb[131].mxu0 }
0x13c7   :  { %v3290_v62 = vadd.f32 %v3282_v42, %v5927_v22  ;;  %v3305_v43 = vsel %vm56_vm0, %v3289_v11, 0.0 }
0x13c8   :  { %3306 = vadd.xlane.f32.xlu0 %v3305_v43 }
0x13c9   :  { %v3308_v21 = vsel %vm56_vm0, %v3290_v62, 0.0 }
0x13ca   :  { %3309 = vadd.xlane.f32.xlu1 %v3308_v21 }
0x1444   :  { %v3295_v3 = vpop.xlane.xlu0 %3294 }
0x1445   :  { %v3311_v41 = vmul.f32 0.03125, %v3295_v3 }
0x1446   :  { %v3298_v36 = vpop.xlane.xlu1 %3297 }
0x1447   :  { %v3317_v19 = vsub.f32 %v3285_v54, %v3311_v41  ;;  %v3312_v31 = vmul.f32 0.03125, %v3298_v36 }
0x1449   :  { %v3318_v48 = vsub.f32 %v3286_v4, %v3312_v31  ;;  %v3323_v2 = vmul.f32 %v3317_v19, %v3317_v19 }
0x144b   :  { %v3329_v32 = vsel %vm56_vm0, %v3323_v2, 0.0  ;;  %v3324_v39 = vmul.f32 %v3318_v48, %v3318_v48 }
0x144c   :  { %3330 = vadd.xlane.f32.xlu0 %v3329_v32 }
0x144d   :  { %v3301_v26 = vpop.xlane.xlu0 %3300  ;;  %v3332_v22 = vsel %vm56_vm0, %v3324_v39, 0.0 }
0x144e   :  { %v3313_v1 = vmul.f32 0.03125, %v3301_v26  ;;  %3333 = vadd.xlane.f32.xlu1 %v3332_v22 }
0x144f   :  { %v3304_v5 = vpop.xlane.xlu1 %3303 }
0x1450   :  { %v6033_v49 = vsub.f32 %v3287_v10, %v3313_v1  ;;  %v3314_v28 = vmul.f32 0.03125, %v3304_v5 }
0x1452   :  { %v6035_v60 = vsub.f32 %v3288_v44, %v3314_v28  ;;  %v3325_v61 = vmul.f32 %v6033_v49, %v6033_v49 }
0x1454   :  { %v3335_v63 = vsel %vm56_vm0, %v3325_v61, 0.0  ;;  %v3326_v33 = vmul.f32 %v6035_v60, %v6035_v60  ;;  %v3765_v61 = vld [vmem:[%s6096_s3 + $0x2] ss:$0 sm:$0xff] }
0x1455   :  { %3336 = vadd.xlane.f32.xlu0 %v3335_v63  ;;  %v3307_v56 = vpop.xlane.xlu0 %3306 }
0x1456   :  { %v3315_v20 = vmul.f32 0.03125, %v3307_v56  ;;  %v3338_v12 = vsel %vm56_vm0, %v3326_v33, 0.0 }
0x1457   :  { %3339 = vadd.xlane.f32.xlu1 %v3338_v12  ;;  %v3310_v16 = vpop.xlane.xlu1 %3309 }
0x1458   :  { %v3321_v9 = vsub.f32 %v3289_v11, %v3315_v20  ;;  %v3316_v55 = vmul.f32 0.03125, %v3310_v16 }
0x145a   :  { %v3322_v7 = vsub.f32 %v3290_v62, %v3316_v55  ;;  %v3327_v30 = vmul.f32 %v3321_v9, %v3321_v9 }
0x145c   :  { %v3341_v18 = vsel %vm56_vm0, %v3327_v30, 0.0  ;;  %v3328_v15 = vmul.f32 %v3322_v7, %v3322_v7 }
0x145d   :  { %3342 = vadd.xlane.f32.xlu0 %v3341_v18 }
0x145e   :  { %v3344_v29 = vsel %vm56_vm0, %v3328_v15, 0.0 }
0x145f   :  { %3345 = vadd.xlane.f32.xlu1 %v3344_v29 }
0x14d9   :  { %v3331_v23 = vpop.xlane.xlu0 %3330 }
0x14da   :  { %v3347_v37 = vmul.f32 0.03125, %v3331_v23 }
0x14db   :  { %v3334_v57 = vpop.xlane.xlu1 %3333 }
0x14dc   :  { %v3353_v40 = vadd.f32 1e-05, %v3347_v37  ;;  %v3348_v6 = vmul.f32 0.03125, %v3334_v57 }
0x14de   :  { %4624 = vrsqrt.f32 %v3353_v40  ;;  %v3354_v54 = vadd.f32 1e-05, %v3348_v6 }
0x14e0   :  { %4626 = vrsqrt.f32 %v3354_v54 }
0x14e2   :  { %v3337_v45 = vpop.xlane.xlu0 %3336 }
0x14e3   :  { %v3349_v47 = vmul.f32 0.03125, %v3337_v45 }
0x14e4   :  { %v3340_v4 = vpop.xlane.xlu1 %3339 }
0x14e5   :  { %v3355_v58 = vadd.f32 1e-05, %v3349_v47  ;;  %v3350_v46 = vmul.f32 0.03125, %v3340_v4 }
0x14e7   :  { %4628 = vrsqrt.f32 %v3355_v58  ;;  %v3356_v24 = vadd.f32 1e-05, %v3350_v46 }
0x14e8   :  { %v4625_v50 = vpop.eup %4624 }
0x14e9   :  { %v3365_v14 = vmul.f32 %v4625_v50, %v3317_v19  ;;  %4630 = vrsqrt.f32 %v3356_v24 }
0x14ea   :  { %v4627_v10 = vpop.eup %4626  ;;  %v3343_v34 = vpop.xlane.xlu0 %3342 }
0x14eb   :  { %v3375_v51 = vmul.f32 %v3763_v27, %v3365_v14  ;;  %v3366_v44 = vmul.f32 %v4627_v10, %v3318_v48  ;;  %v3351_v25 = vmul.f32 0.03125, %v3343_v34 }
0x14ec   :  { %v3346_v52 = vpop.xlane.xlu1 %3345 }
0x14ed   :  { %v3376_v38 = vmul.f32 %v3763_v27, %v3366_v44  ;;  %v3357_v17 = vadd.f32 1e-05, %v3351_v25  ;;  %v3352_v8 = vmul.f32 0.03125, %v3346_v52  ;;  %v3385_v11 = vadd.f32 %v3764_v0, %v3375_v51 }
0x14ef   :  { %v3386_v42 = vadd.f32 %v3764_v0, %v3376_v38  ;;  %4632 = vrsqrt.f32 %v3357_v17  ;;  %v3358_v53 = vadd.f32 1e-05, %v3352_v8 }
0x14f1   :  { %v4629_v62 = vpop.eup %4628  ;;  %4634 = vrsqrt.f32 %v3358_v53  ;;  %v3391_v43 = vpack.c.bf16 %v3386_v42, %v3385_v11 }
0x14f2   :  { %v3367_v21 = vmul.f32 %v4629_v62, %v6033_v49 }
0x14f3   :  { %v4631_v3 = vpop.eup %4630  ;;  %4369 = vmatmul.mubr.msk.bf16.vlgmr.msra.gmra.mrb[156].mxu1 %vm56_vm0, %v3391_v43 }
0x14f4   :  { %v3368_v41 = vmul.f32 %v4631_v3, %v6035_v60  ;;  %4372 = vmatprep.mubr.msk.bf16.mxu1 %vm4649_vm1, %v4648_v59  ;;  %v3377_v36 = vmul.f32 %v3763_v27, %v3367_v21 }
0x14f6   :  { %v3378_v19 = vmul.f32 %v3763_v27, %v3368_v41  ;;  %v3387_v31 = vadd.f32 %v3764_v0, %v3377_v36 }
0x14f8   :  { %v3388_v48 = vadd.f32 %v3764_v0, %v3378_v19 }
0x14f9   :  { %v4633_v2 = vpop.eup %4632 }
0x14fa   :  { %v3369_v32 = vmul.f32 %v4633_v2, %v3321_v9  ;;  %v3392_v39 = vpack.c.bf16 %v3388_v48, %v3387_v31 }
0x14fb   :  { %v4635_v26 = vpop.eup %4634 }
0x14fc   :  { %v3370_v22 = vmul.f32 %v4635_v26, %v3322_v7  ;;  %4373 = vmatmul.mubr.msk.bf16.gmra.mrb[160].mxu1 %vm56_vm0, %v3392_v39  ;;  %v3379_v1 = vmul.f32 %v3763_v27, %v3369_v32 }
0x14fd   :  { %4376 = vmatprep.mubr.msk.bf16.mxu1 %vm4649_vm1, %v4648_v59 }
0x14fe   :  { %v3380_v5 = vmul.f32 %v3763_v27, %v3370_v22  ;;  %v3389_v49 = vadd.f32 %v3764_v0, %v3379_v1 }
0x1500   :  { %v3390_v28 = vadd.f32 %v3764_v0, %v3380_v5 }
0x1502   :  { %v3393_v60 = vpack.c.bf16 %v3390_v28, %v3389_v49 }
0x1504   :  { %4377 = vmatmul.mubr.msk.bf16.gmra.mrb[164].mxu1 %vm56_vm0, %v3393_v60 }
0x15c6   :  { %v3458_v63 = vpop.f32.mrb[156].mxu1 }
0x15c7   :  { %v3459_v33 = vadd.f32 %v3765_v61, %v3458_v63  ;;  %v4370_v56 = vpop.f32.mrb[157].mxu1 }
0x15c8   :  { %v3461_v20 = vpop.f32.mrb[158].mxu1 }
0x15c9   :  { %3481 = vst [vmem:[%s6098_s10] sm:$0xff] %v3459_v33  ;;  %v3462_v12 = vadd.f32 %v3765_v61, %v3461_v20  ;;  %v4371_v59 = vpop.f32.mrb[159].mxu1 }
0x15cb   :  { %3482 = vst [vmem:[%s6098_s10 + $0x8] sm:$0xff] %v3462_v12 }
0x15cf   :  { %v3466_v16 = vpop.f32.mrb[160].mxu1 }
0x15d0   :  { %v3467_v9 = vadd.f32 %v3765_v61, %v3466_v16  ;;  %v4374_v55 = vpop.f32.mrb[161].mxu1 }
0x15d1   :  { %v3469_v7 = vpop.f32.mrb[162].mxu1 }
0x15d2   :  { %3483 = vst [vmem:[%s6098_s10 + $0x10] sm:$0xff] %v3467_v9  ;;  %v3470_v30 = vadd.f32 %v3765_v61, %v3469_v7  ;;  %v4375_v18 = vpop.f32.mrb[163].mxu1 }
0x15d4   :  { %3484 = vst [vmem:[%s6098_s10 + $0x18] sm:$0xff] %v3470_v30 }
0x15d7   :  { %v3474_v15 = vpop.f32.mrb[164].mxu1 }
0x15d8   :  { %v3475_v29 = vadd.f32 %v3765_v61, %v3474_v15  ;;  %v4378_v13 = vpop.f32.mrb[165].mxu1 }
0x15d9   :  { %v3477_v35 = vpop.f32.mrb[166].mxu1 }
0x15da   :  { %3485 = vst [vmem:[%s6098_s10 + $0x20] sm:$0xff] %v3475_v29  ;;  %v3478_v23 = vadd.f32 %v3765_v61, %v3477_v35  ;;  %v4379_v37 = vpop.f32.mrb[167].mxu1 }
0x15dc   :  { %3486 = vst [vmem:[%s6098_s10 + $0x28] sm:$0xff] %v3478_v23 }

</bundles_post_ra>
